<compile_context>
chip_gen: v7x
topology: tpu7x:2x2x1
jax: 0.10.0
libtpu: 0.0.40
codegen_flags: <defaults>
</compile_context>

<pallas_src>
import functools

import jax
import jax.numpy as jnp
from jax.experimental import pallas as pl
from jax.experimental.pallas import tpu as pltpu


def _round_up(n, m):
    return ((n + m - 1) // m) * m


def fno_kernel(x_ref, ain_ref, bin_ref, a_ref, b_ref,
               p_ref, bo1_ref, wo2T_ref, bo2_ref, out_ref):
    """One batch tile per grid step.

    Shapes seen by the kernel (per step), padded/lane-dense:
      x_ref    : [Bt, KIp]       flattened inputs (bf16)
      ain_ref  : [KIp, WHp]      fused input transform  kron(I_W, W_in) (bf16)
      bin_ref  : [1, WHp]        (f32)
      a_ref    : [L, WHp, WHp]   fused (spatial + spectral) per-layer ops (bf16)
      b_ref    : [L, 1, WHp]     (f32)
      p_ref    : [WHp, Hp]       fused Linear(W, 1) of the output transform (bf16)
      bo1_ref  : [1, Hp]         (f32)
      wo2T_ref : [Hp, Op]        Linear(H, O) weight, transposed + padded (bf16)
      bo2_ref  : [1, Op]         (f32)
      out_ref  : [Bt, Op]        (f32)
    """
    f32 = jnp.float32
    bf16 = jnp.bfloat16

    # ---- input_transform: Linear(I, H) applied per window position ----
    h = jnp.dot(x_ref[...], ain_ref[...],
                preferred_element_type=f32) + bin_ref[...]            # [Bt, WHp] f32

    # ---- FNO layers: each is ONE fused bf16 MXU matmul, f32 accumulate ----
    num_layers = a_ref.shape[0]
    for l in range(num_layers):
        if l > 0:
            h = jnp.tanh(h)
        h = jnp.dot(h.astype(bf16), a_ref[l],
                    preferred_element_type=f32) + b_ref[l]            # [Bt, WHp]

    # ---- output_transform (output_reduction=True) ----
    # Linear(W, 1) over the window axis -> tanh -> Squeeze -> Linear(H, O)
    z = jnp.dot(h.astype(bf16), p_ref[...],
                preferred_element_type=f32) + bo1_ref[...]            # [Bt, Hp]
    z = jnp.tanh(z)
    out_ref[...] = jnp.dot(z.astype(bf16), wo2T_ref[...],
                           preferred_element_type=f32) + bo2_ref[...]  # [Bt, Op]


def make_fno_operators(win, bin_, ws, bs, wsp, wo1, bo1, wo2, bo2, *, window_size):
    """Operator-fusion glue.  Runs ONCE per set of weights (not in the hot path)."""
    f32 = jnp.float32
    bf16 = jnp.bfloat16

    I, H = win.shape
    L = ws.shape[0]
    S = wsp.shape[-1]
    O = wo2.shape[0]
    W = window_size
    K = W // 2 + 1
    WH = W * H
    assert S <= K

    # lane-dense padded dims
    KIp = max(128, _round_up(W * I, 128))
    WHp = max(128, _round_up(WH, 128))
    Hp = max(128, _round_up(H, 128))
    Op = max(128, _round_up(O, 128))

    # ---------- exact DFT matrices for rfft / mode truncation / irfft ----------
    F = jnp.fft.rfft(jnp.eye(W, dtype=f32), axis=1)                    # [W, K] complex
    Fr = jnp.real(F)[:, :S].astype(f32)                                # [W, S]
    Fi = jnp.imag(F)[:, :S].astype(f32)                                # [W, S]
    Gr = jnp.fft.irfft(jnp.eye(K, dtype=f32), n=W, axis=1)[:S].astype(f32)        # [S, W]
    Gi = jnp.fft.irfft(1j * jnp.eye(K, dtype=f32), n=W, axis=1)[:S].astype(f32)   # [S, W]

    # ---------- fused per-layer operators A_l[WH, WH] ----------
    # spectral:  A[(u,ci),(w,co)] = sum_k wsp[ci,co,k] * (Fr[u,k]Gr[k,w] + Fi[u,k]Gi[k,w])
    A_spec = (jnp.einsum('liok,uk,kw->luiwo', wsp, Fr, Gr) +
              jnp.einsum('liok,uk,kw->luiwo', wsp, Fi, Gi))            # [L, W, H, W, H]
    # spatial (1x1 conv over channels): delta(u,w) * ws[co,ci]
    A_spat = jnp.einsum('uw,loi->luiwo', jnp.eye(W, dtype=f32), ws)    # [L, W, H, W, H]
    A = (A_spec + A_spat).reshape(L, WH, WH)
    bL = jnp.broadcast_to(bs[:, None, :], (L, W, H)).reshape(L, 1, WH)

    # fused input transform: kron(I_W, win), bias tiled over window positions
    A_in = jnp.einsum('uw,ic->uiwc', jnp.eye(W, dtype=f32), win).reshape(W * I, WH)
    b_in = jnp.broadcast_to(bin_[None, :], (W, H)).reshape(1, WH)

    # fused output reduction: Linear(W, 1) over the window axis
    P = jnp.einsum('w,cd->wcd', wo1[0], jnp.eye(H, dtype=f32)).reshape(WH, H)
    wo2T = wo2.T                                                        # [H, O]

    # ---------- zero-pad to lane-dense shapes; bf16 MXU operands, f32 biases ----------
    A_in_p = jnp.zeros((KIp, WHp), f32).at[:W * I, :WH].set(A_in).astype(bf16)
    b_in_p = jnp.zeros((1, WHp), f32).at[:, :WH].set(b_in)
    A_p = jnp.zeros((L, WHp, WHp), f32).at[:, :WH, :WH].set(A).astype(bf16)
    bL_p = jnp.zeros((L, 1, WHp), f32).at[:, :, :WH].set(bL)
    P_p = jnp.zeros((WHp, Hp), f32).at[:WH, :H].set(P).astype(bf16)
    bo1_p = jnp.broadcast_to(bo1.reshape(1, 1).astype(f32), (1, Hp)) + jnp.zeros((1, Hp), f32)
    wo2T_p = jnp.zeros((Hp, Op), f32).at[:H, :O].set(wo2T).astype(bf16)
    bo2_p = jnp.zeros((1, Op), f32).at[:, :O].set(bo2[None, :])

    return dict(A_in=A_in_p, b_in=b_in_p, A=A_p, bL=bL_p, P=P_p, bo1=bo1_p,
                wo2T=wo2T_p, bo2=bo2_p)


@functools.partial(jax.jit, static_argnames=("out_size", "block_b", "single_buffer_weights"))
def fno_apply(x, ops, *, out_size, block_b=256, single_buffer_weights=True):
    """Hot path: pad the batch and launch the Pallas kernel.  x: [B, W, I] -> [B, O]."""
    B, W, I = x.shape
    KIp, WHp = ops["A_in"].shape
    L = ops["A"].shape[0]
    Hp, Op = ops["wo2T"].shape

    # ---------- batch tiling: sublane-aligned, >= 2 grid steps when possible ----------
    Bt = min(block_b, B)
    if B > 8:
        Bt = min(Bt, -(-B // 2))       # cap at ceil(B/2) so v7x's two TCs both get work
    Bt = max(8, _round_up(Bt, 8))
    Bp = _round_up(B, Bt)

    x_flat = jnp.zeros((Bp, KIp), jnp.bfloat16).at[:B, :W * I].set(
        x.reshape(B, W * I).astype(jnp.bfloat16))

    const2 = lambda b: (0, 0)
    const3 = lambda b: (0, 0, 0)
    # constant operator blocks never change across grid steps -> single-buffer them
    w_mode = pl.Buffered(1) if single_buffer_weights else None

    out = pl.pallas_call(
        fno_kernel,
        out_shape=jax.ShapeDtypeStruct((Bp, Op), jnp.float32),
        grid=(Bp // Bt,),
        in_specs=[
            pl.BlockSpec((Bt, KIp), lambda b: (b, 0)),                        # x tile
            pl.BlockSpec((KIp, WHp), const2, pipeline_mode=w_mode),           # A_in
            pl.BlockSpec((1, WHp), const2, pipeline_mode=w_mode),             # b_in
            pl.BlockSpec((L, WHp, WHp), const3, pipeline_mode=w_mode),        # fused layer ops
            pl.BlockSpec((L, 1, WHp), const3, pipeline_mode=w_mode),          # fused layer biases
            pl.BlockSpec((WHp, Hp), const2, pipeline_mode=w_mode),            # P (Linear(W,1))
            pl.BlockSpec((1, Hp), const2, pipeline_mode=w_mode),              # bo1
            pl.BlockSpec((Hp, Op), const2, pipeline_mode=w_mode),             # wo2T
            pl.BlockSpec((1, Op), const2, pipeline_mode=w_mode),              # bo2
        ],
        out_specs=pl.BlockSpec((Bt, Op), lambda b: (b, 0)),
        compiler_params=pltpu.CompilerParams(
            dimension_semantics=("parallel",),
            vmem_limit_bytes=32 * 1024 * 1024,
        ),
    )(x_flat, ops["A_in"], ops["b_in"], ops["A"], ops["bL"],
      ops["P"], ops["bo1"], ops["wo2T"], ops["bo2"])

    return out[:B, :out_size]


def fno_forward(x, win, bin_, ws, bs, wsp, wo1, bo1, wo2, bo2, *, block_b=256):
    """Convenience one-shot wrapper (operators rebuilt every call)."""
    ops = make_fno_operators(win, bin_, ws, bs, wsp, wo1, bo1, wo2, bo2,
                             window_size=x.shape[1])
    return fno_apply(x, ops, out_size=wo2.shape[0], block_b=block_b)


def fno_reference(x, win, bin_, ws, bs, wsp, wo1, bo1, wo2, bo2):
    """Pure-JAX reference mirroring the PyTorch module exactly (f32)."""
    B, W, I = x.shape
    L = ws.shape[0]
    S = wsp.shape[-1]
    K = W // 2 + 1

    h = x @ win + bin_                            # [B, W, H]
    h = jnp.transpose(h, (0, 2, 1))               # [B, H, W]   (Permute(0, 2, 1))
    for l in range(L):
        if l > 0:
            h = jnp.tanh(h)
        o1 = jnp.einsum('oi,biw->bow', ws[l], h) + bs[l][None, :, None]
        spec = jnp.fft.rfft(h, axis=-1)           # [B, H, K] complex
        y = (spec[:, :, None, :S] * wsp[l][None, :, :, :]).sum(axis=1)   # [B, Co, S]
        buf = jnp.zeros((B, h.shape[1], K), dtype=spec.dtype)
        buf = buf.at[:, :, :S].set(y)
        o2 = jnp.fft.irfft(buf, n=W, axis=-1)
        h = o1 + o2
    z = jnp.einsum('bhw,w->bh', h, wo1[0]) + bo1  # Linear(W, 1) + squeeze
    z = jnp.tanh(z)
    return z @ wo2.T + bo2                        # Linear(H, O)


if __name__ == "__main__":
    # FNO(input_size=4, output_size=2, num_layers=3, hidden_size=32,
    #     activation='tanh', window_size=16, output_reduction=True)
    B, W, I, H, O, L = 64, 16, 4, 32, 2, 3
    S = W // 2 + 1

    key = jax.random.PRNGKey(0)
    ks = jax.random.split(key, 10)
    unif = lambda k, shape, lo, hi: jax.random.uniform(k, shape, jnp.float32, lo, hi)

    lim_i = 1.0 / (I ** 0.5)
    lim_h = 1.0 / (H ** 0.5)
    lim_w = 1.0 / (W ** 0.5)

    win = unif(ks[0], (I, H), -lim_i, lim_i)          # Linear(I, H).weight.T
    bin_ = unif(ks[1], (H,), -lim_i, lim_i)
    ws = unif(ks[2], (L, H, H), -lim_h, lim_h)        # Conv1d weights [out, in]
    bs = unif(ks[3], (L, H), -lim_h, lim_h)
    wsp = unif(ks[4], (L, H, H, S), 0.0, 1.0 / (H * H))   # SpectralConv1d weights
    wo1 = unif(ks[5], (1, W), -lim_w, lim_w)          # Linear(W, 1)
    bo1 = unif(ks[6], (1,), -lim_w, lim_w)
    wo2 = unif(ks[7], (O, H), -lim_h, lim_h)          # Linear(H, O)
    bo2 = unif(ks[8], (O,), -lim_h, lim_h)

    x = jax.random.uniform(ks[9], (B, W, I), jnp.float32)

    # Operator-fusion glue runs ONCE, outside the hot path.
    ops = make_fno_operators(win, bin_, ws, bs, wsp, wo1, bo1, wo2, bo2, window_size=W)
    ops = jax.tree_util.tree_map(jax.block_until_ready, ops)

    try:
        out = jax.block_until_ready(fno_apply(x, ops, out_size=O, block_b=256))
    except Exception:
        # Fallback: identical kernel with default (double) buffering of the
        # constant operator blocks, in case this Pallas build rejects Buffered(1).
        out = jax.block_until_ready(
            fno_apply(x, ops, out_size=O, block_b=256, single_buffer_weights=False))

    ref = fno_reference(x, win, bin_, ws, bs, wsp, wo1, bo1, wo2, bo2)

    assert out.shape == (B, O), out.shape
    # bf16 MXU operands with f32 accumulation -> ~1e-3 relative error expected.
    assert jnp.allclose(out, ref, rtol=1e-2, atol=1e-2), float(jnp.max(jnp.abs(out - ref)))
    print("KERNEL_OK")
</pallas_src>

<mosaic_0001>
module attributes {stable_mosaic.version = 11 : i64} {
  func.func @fno_kernel(%arg0: i32, %arg1: memref<32x128xbf16, #tpu.memory_space<vmem>>, %arg2: memref<128x512xbf16, #tpu.memory_space<vmem>>, %arg3: memref<1x512xf32, #tpu.memory_space<vmem>>, %arg4: memref<3x512x512xbf16, #tpu.memory_space<vmem>>, %arg5: memref<3x1x512xf32, #tpu.memory_space<vmem>>, %arg6: memref<512x128xbf16, #tpu.memory_space<vmem>>, %arg7: memref<1x128xf32, #tpu.memory_space<vmem>>, %arg8: memref<128x128xbf16, #tpu.memory_space<vmem>>, %arg9: memref<1x128xf32, #tpu.memory_space<vmem>>, %arg10: memref<32x128xf32, #tpu.memory_space<vmem>>) attributes {dimension_semantics = [#tpu.dimension_semantics<parallel>], iteration_bounds = array<i64: 2>, scalar_prefetch = 0 : i64, scratch_operands = 0 : i64, tpu.core_type = #tpu.core_type<tc>, window_params = [{transform_indices = @transform_0, window_bounds = array<i64: 32, 128>}, {pipeline_mode = #tpu.pipeline_mode<synchronous>, transform_indices = @transform_1, window_bounds = array<i64: 128, 512>}, {pipeline_mode = #tpu.pipeline_mode<synchronous>, transform_indices = @transform_2, window_bounds = array<i64: 1, 512>}, {pipeline_mode = #tpu.pipeline_mode<synchronous>, transform_indices = @transform_3, window_bounds = array<i64: 3, 512, 512>}, {pipeline_mode = #tpu.pipeline_mode<synchronous>, transform_indices = @transform_4, window_bounds = array<i64: 3, 1, 512>}, {pipeline_mode = #tpu.pipeline_mode<synchronous>, transform_indices = @transform_5, window_bounds = array<i64: 512, 128>}, {pipeline_mode = #tpu.pipeline_mode<synchronous>, transform_indices = @transform_6, window_bounds = array<i64: 1, 128>}, {pipeline_mode = #tpu.pipeline_mode<synchronous>, transform_indices = @transform_7, window_bounds = array<i64: 128, 128>}, {pipeline_mode = #tpu.pipeline_mode<synchronous>, transform_indices = @transform_8, window_bounds = array<i64: 1, 128>}, {transform_indices = @transform_9, window_bounds = array<i64: 32, 128>}]} {
    %c0 = arith.constant 0 : index
    %c0_0 = arith.constant 0 : index
    %0 = vector.load %arg1[%c0, %c0_0] : memref<32x128xbf16, #tpu.memory_space<vmem>>, vector<32x128xbf16>
    %c0_1 = arith.constant 0 : index
    %c0_2 = arith.constant 0 : index
    %1 = vector.load %arg2[%c0_1, %c0_2] : memref<128x512xbf16, #tpu.memory_space<vmem>>, vector<128x512xbf16>
    %cst = arith.constant dense<0.000000e+00> : vector<32x512xf32>
    %2 = tpu.matmul %0, %1, %cst {dimension_numbers = #tpu.dot_dimension_numbers<[1], [0], [0], [1], [0, 0, 1, 1], [], []>} : vector<32x128xbf16>, vector<128x512xbf16>, vector<32x512xf32> -> vector<32x512xf32>
    %c0_3 = arith.constant 0 : index
    %c0_4 = arith.constant 0 : index
    %3 = vector.load %arg3[%c0_3, %c0_4] : memref<1x512xf32, #tpu.memory_space<vmem>>, vector<1x512xf32>
    %4 = vector.broadcast %3 : vector<1x512xf32> to vector<32x512xf32>
    %5 = arith.addf %2, %4 : vector<32x512xf32>
    %6 = arith.truncf %5 : vector<32x512xf32> to vector<32x512xbf16>
    %c0_5 = arith.constant 0 : index
    %c0_6 = arith.constant 0 : index
    %c0_7 = arith.constant 0 : index
    %7 = vector.load %arg4[%c0_5, %c0_6, %c0_7] : memref<3x512x512xbf16, #tpu.memory_space<vmem>>, vector<1x512x512xbf16>
    %8 = vector.shape_cast %7 : vector<1x512x512xbf16> to vector<512x512xbf16>
    %cst_8 = arith.constant dense<0.000000e+00> : vector<32x512xf32>
    %9 = tpu.matmul %6, %8, %cst_8 {dimension_numbers = #tpu.dot_dimension_numbers<[1], [0], [0], [1], [0, 0, 1, 1], [], []>} : vector<32x512xbf16>, vector<512x512xbf16>, vector<32x512xf32> -> vector<32x512xf32>
    %c0_9 = arith.constant 0 : index
    %c0_10 = arith.constant 0 : index
    %c0_11 = arith.constant 0 : index
    %10 = vector.load %arg5[%c0_9, %c0_10, %c0_11] : memref<3x1x512xf32, #tpu.memory_space<vmem>>, vector<1x1x512xf32>
    %11 = vector.shape_cast %10 : vector<1x1x512xf32> to vector<1x512xf32>
    %12 = vector.broadcast %11 : vector<1x512xf32> to vector<32x512xf32>
    %13 = arith.addf %9, %12 : vector<32x512xf32>
    %14 = math.tanh %13 : vector<32x512xf32>
    %15 = arith.truncf %14 : vector<32x512xf32> to vector<32x512xbf16>
    %c1 = arith.constant 1 : index
    %c0_12 = arith.constant 0 : index
    %c0_13 = arith.constant 0 : index
    %16 = vector.load %arg4[%c1, %c0_12, %c0_13] : memref<3x512x512xbf16, #tpu.memory_space<vmem>>, vector<1x512x512xbf16>
    %17 = vector.shape_cast %16 : vector<1x512x512xbf16> to vector<512x512xbf16>
    %cst_14 = arith.constant dense<0.000000e+00> : vector<32x512xf32>
    %18 = tpu.matmul %15, %17, %cst_14 {dimension_numbers = #tpu.dot_dimension_numbers<[1], [0], [0], [1], [0, 0, 1, 1], [], []>} : vector<32x512xbf16>, vector<512x512xbf16>, vector<32x512xf32> -> vector<32x512xf32>
    %c1_15 = arith.constant 1 : index
    %c0_16 = arith.constant 0 : index
    %c0_17 = arith.constant 0 : index
    %19 = vector.load %arg5[%c1_15, %c0_16, %c0_17] : memref<3x1x512xf32, #tpu.memory_space<vmem>>, vector<1x1x512xf32>
    %20 = vector.shape_cast %19 : vector<1x1x512xf32> to vector<1x512xf32>
    %21 = vector.broadcast %20 : vector<1x512xf32> to vector<32x512xf32>
    %22 = arith.addf %18, %21 : vector<32x512xf32>
    %23 = math.tanh %22 : vector<32x512xf32>
    %24 = arith.truncf %23 : vector<32x512xf32> to vector<32x512xbf16>
    %c2 = arith.constant 2 : index
    %c0_18 = arith.constant 0 : index
    %c0_19 = arith.constant 0 : index
    %25 = vector.load %arg4[%c2, %c0_18, %c0_19] : memref<3x512x512xbf16, #tpu.memory_space<vmem>>, vector<1x512x512xbf16>
    %26 = vector.shape_cast %25 : vector<1x512x512xbf16> to vector<512x512xbf16>
    %cst_20 = arith.constant dense<0.000000e+00> : vector<32x512xf32>
    %27 = tpu.matmul %24, %26, %cst_20 {dimension_numbers = #tpu.dot_dimension_numbers<[1], [0], [0], [1], [0, 0, 1, 1], [], []>} : vector<32x512xbf16>, vector<512x512xbf16>, vector<32x512xf32> -> vector<32x512xf32>
    %c2_21 = arith.constant 2 : index
    %c0_22 = arith.constant 0 : index
    %c0_23 = arith.constant 0 : index
    %28 = vector.load %arg5[%c2_21, %c0_22, %c0_23] : memref<3x1x512xf32, #tpu.memory_space<vmem>>, vector<1x1x512xf32>
    %29 = vector.shape_cast %28 : vector<1x1x512xf32> to vector<1x512xf32>
    %30 = vector.broadcast %29 : vector<1x512xf32> to vector<32x512xf32>
    %31 = arith.addf %27, %30 : vector<32x512xf32>
    %32 = arith.truncf %31 : vector<32x512xf32> to vector<32x512xbf16>
    %c0_24 = arith.constant 0 : index
    %c0_25 = arith.constant 0 : index
    %33 = vector.load %arg6[%c0_24, %c0_25] : memref<512x128xbf16, #tpu.memory_space<vmem>>, vector<512x128xbf16>
    %cst_26 = arith.constant dense<0.000000e+00> : vector<32x128xf32>
    %34 = tpu.matmul %32, %33, %cst_26 {dimension_numbers = #tpu.dot_dimension_numbers<[1], [0], [0], [1], [0, 0, 1, 1], [], []>} : vector<32x512xbf16>, vector<512x128xbf16>, vector<32x128xf32> -> vector<32x128xf32>
    %c0_27 = arith.constant 0 : index
    %c0_28 = arith.constant 0 : index
    %35 = vector.load %arg7[%c0_27, %c0_28] : memref<1x128xf32, #tpu.memory_space<vmem>>, vector<1x128xf32>
    %36 = vector.broadcast %35 : vector<1x128xf32> to vector<32x128xf32>
    %37 = arith.addf %34, %36 : vector<32x128xf32>
    %38 = math.tanh %37 : vector<32x128xf32>
    %39 = arith.truncf %38 : vector<32x128xf32> to vector<32x128xbf16>
    %c0_29 = arith.constant 0 : index
    %c0_30 = arith.constant 0 : index
    %40 = vector.load %arg8[%c0_29, %c0_30] : memref<128x128xbf16, #tpu.memory_space<vmem>>, vector<128x128xbf16>
    %cst_31 = arith.constant dense<0.000000e+00> : vector<32x128xf32>
    %41 = tpu.matmul %39, %40, %cst_31 {dimension_numbers = #tpu.dot_dimension_numbers<[1], [0], [0], [1], [0, 0, 1, 1], [], []>} : vector<32x128xbf16>, vector<128x128xbf16>, vector<32x128xf32> -> vector<32x128xf32>
    %c0_32 = arith.constant 0 : index
    %c0_33 = arith.constant 0 : index
    %42 = vector.load %arg9[%c0_32, %c0_33] : memref<1x128xf32, #tpu.memory_space<vmem>>, vector<1x128xf32>
    %43 = vector.broadcast %42 : vector<1x128xf32> to vector<32x128xf32>
    %44 = arith.addf %41, %43 : vector<32x128xf32>
    %c0_34 = arith.constant 0 : index
    %c0_35 = arith.constant 0 : index
    %45 = vector.load %arg10[%c0_34, %c0_35] : memref<32x128xf32, #tpu.memory_space<vmem>>, vector<32x128xf32>
    tpu.vector_store %arg10[%c0_34, %c0_35], %44 {strides = array<i32>} : memref<32x128xf32, #tpu.memory_space<vmem>>, vector<32x128xf32>,
    return
  }
  func.func @transform_0(%arg0: i32) -> (i32, i32) {
    %c0_i32 = arith.constant 0 : i32
    %c0_i32_0 = arith.constant 0 : i32
    return %arg0, %c0_i32 : i32, i32
  }
  func.func @transform_1(%arg0: i32) -> (i32, i32) {
    %c0_i32 = arith.constant 0 : i32
    %c0_i32_0 = arith.constant 0 : i32
    %c0_i32_1 = arith.constant 0 : i32
    return %c0_i32, %c0_i32_0 : i32, i32
  }
  func.func @transform_2(%arg0: i32) -> (i32, i32) {
    %c0_i32 = arith.constant 0 : i32
    %c0_i32_0 = arith.constant 0 : i32
    %c0_i32_1 = arith.constant 0 : i32
    return %c0_i32, %c0_i32_0 : i32, i32
  }
  func.func @transform_3(%arg0: i32) -> (i32, i32, i32) {
    %c0_i32 = arith.constant 0 : i32
    %c0_i32_0 = arith.constant 0 : i32
    %c0_i32_1 = arith.constant 0 : i32
    %c0_i32_2 = arith.constant 0 : i32
    return %c0_i32, %c0_i32_0, %c0_i32_1 : i32, i32, i32
  }
  func.func @transform_4(%arg0: i32) -> (i32, i32, i32) {
    %c0_i32 = arith.constant 0 : i32
    %c0_i32_0 = arith.constant 0 : i32
    %c0_i32_1 = arith.constant 0 : i32
    %c0_i32_2 = arith.constant 0 : i32
    return %c0_i32, %c0_i32_0, %c0_i32_1 : i32, i32, i32
  }
  func.func @transform_5(%arg0: i32) -> (i32, i32) {
    %c0_i32 = arith.constant 0 : i32
    %c0_i32_0 = arith.constant 0 : i32
    %c0_i32_1 = arith.constant 0 : i32
    return %c0_i32, %c0_i32_0 : i32, i32
  }
  func.func @transform_6(%arg0: i32) -> (i32, i32) {
    %c0_i32 = arith.constant 0 : i32
    %c0_i32_0 = arith.constant 0 : i32
    %c0_i32_1 = arith.constant 0 : i32
    return %c0_i32, %c0_i32_0 : i32, i32
  }
  func.func @transform_7(%arg0: i32) -> (i32, i32) {
    %c0_i32 = arith.constant 0 : i32
    %c0_i32_0 = arith.constant 0 : i32
    %c0_i32_1 = arith.constant 0 : i32
    return %c0_i32, %c0_i32_0 : i32, i32
  }
  func.func @transform_8(%arg0: i32) -> (i32, i32) {
    %c0_i32 = arith.constant 0 : i32
    %c0_i32_0 = arith.constant 0 : i32
    %c0_i32_1 = arith.constant 0 : i32
    return %c0_i32, %c0_i32_0 : i32, i32
  }
  func.func @transform_9(%arg0: i32) -> (i32, i32) {
    %c0_i32 = arith.constant 0 : i32
    %c0_i32_0 = arith.constant 0 : i32
    return %arg0, %c0_i32 : i32, i32
  }
}

module attributes {stable_mosaic.version = 11 : i64} {
  func.func @fno_kernel(%arg0: i32, %arg1: memref<32x128xbf16, #tpu.memory_space<vmem>>, %arg2: memref<128x512xbf16, #tpu.memory_space<vmem>>, %arg3: memref<1x512xf32, #tpu.memory_space<vmem>>, %arg4: memref<3x512x512xbf16, #tpu.memory_space<vmem>>, %arg5: memref<3x1x512xf32, #tpu.memory_space<vmem>>, %arg6: memref<512x128xbf16, #tpu.memory_space<vmem>>, %arg7: memref<1x128xf32, #tpu.memory_space<vmem>>, %arg8: memref<128x128xbf16, #tpu.memory_space<vmem>>, %arg9: memref<1x128xf32, #tpu.memory_space<vmem>>, %arg10: memref<32x128xf32, #tpu.memory_space<vmem>>) attributes {dimension_semantics = [#tpu.dimension_semantics<parallel>], iteration_bounds = array<i64: 2>, scalar_prefetch = 0 : i64, scratch_operands = 0 : i64, tpu.core_type = #tpu.core_type<tc>, window_params = [{transform_indices = @transform_0, window_bounds = array<i64: 32, 128>}, {pipeline_mode = #tpu.pipeline_mode<synchronous>, transform_indices = @transform_1, window_bounds = array<i64: 128, 512>}, {pipeline_mode = #tpu.pipeline_mode<synchronous>, transform_indices = @transform_2, window_bounds = array<i64: 1, 512>}, {pipeline_mode = #tpu.pipeline_mode<synchronous>, transform_indices = @transform_3, window_bounds = array<i64: 3, 512, 512>}, {pipeline_mode = #tpu.pipeline_mode<synchronous>, transform_indices = @transform_4, window_bounds = array<i64: 3, 1, 512>}, {pipeline_mode = #tpu.pipeline_mode<synchronous>, transform_indices = @transform_5, window_bounds = array<i64: 512, 128>}, {pipeline_mode = #tpu.pipeline_mode<synchronous>, transform_indices = @transform_6, window_bounds = array<i64: 1, 128>}, {pipeline_mode = #tpu.pipeline_mode<synchronous>, transform_indices = @transform_7, window_bounds = array<i64: 128, 128>}, {pipeline_mode = #tpu.pipeline_mode<synchronous>, transform_indices = @transform_8, window_bounds = array<i64: 1, 128>}, {transform_indices = @transform_9, window_bounds = array<i64: 32, 128>}]} {
    %c0 = arith.constant 0 : index
    %c0_0 = arith.constant 0 : index
    %0 = vector.load %arg1[%c0, %c0_0] : memref<32x128xbf16, #tpu.memory_space<vmem>>, vector<32x128xbf16>
    %c0_1 = arith.constant 0 : index
    %c0_2 = arith.constant 0 : index
    %1 = vector.load %arg2[%c0_1, %c0_2] : memref<128x512xbf16, #tpu.memory_space<vmem>>, vector<128x512xbf16>
    %cst = arith.constant dense<0.000000e+00> : vector<32x512xf32>
    %2 = tpu.matmul %0, %1, %cst {dimension_numbers = #tpu.dot_dimension_numbers<[1], [0], [0], [1], [0, 0, 1, 1], [], []>} : vector<32x128xbf16>, vector<128x512xbf16>, vector<32x512xf32> -> vector<32x512xf32>
    %c0_3 = arith.constant 0 : index
    %c0_4 = arith.constant 0 : index
    %3 = vector.load %arg3[%c0_3, %c0_4] : memref<1x512xf32, #tpu.memory_space<vmem>>, vector<1x512xf32>
    %4 = vector.broadcast %3 : vector<1x512xf32> to vector<32x512xf32>
    %5 = arith.addf %2, %4 : vector<32x512xf32>
    %6 = arith.truncf %5 : vector<32x512xf32> to vector<32x512xbf16>
    %c0_5 = arith.constant 0 : index
    %c0_6 = arith.constant 0 : index
    %c0_7 = arith.constant 0 : index
    %7 = vector.load %arg4[%c0_5, %c0_6, %c0_7] : memref<3x512x512xbf16, #tpu.memory_space<vmem>>, vector<1x512x512xbf16>
    %8 = vector.shape_cast %7 : vector<1x512x512xbf16> to vector<512x512xbf16>
    %cst_8 = arith.constant dense<0.000000e+00> : vector<32x512xf32>
    %9 = tpu.matmul %6, %8, %cst_8 {dimension_numbers = #tpu.dot_dimension_numbers<[1], [0], [0], [1], [0, 0, 1, 1], [], []>} : vector<32x512xbf16>, vector<512x512xbf16>, vector<32x512xf32> -> vector<32x512xf32>
    %c0_9 = arith.constant 0 : index
    %c0_10 = arith.constant 0 : index
    %c0_11 = arith.constant 0 : index
    %10 = vector.load %arg5[%c0_9, %c0_10, %c0_11] : memref<3x1x512xf32, #tpu.memory_space<vmem>>, vector<1x1x512xf32>
    %11 = vector.shape_cast %10 : vector<1x1x512xf32> to vector<1x512xf32>
    %12 = vector.broadcast %11 : vector<1x512xf32> to vector<32x512xf32>
    %13 = arith.addf %9, %12 : vector<32x512xf32>
    %14 = math.tanh %13 : vector<32x512xf32>
    %15 = arith.truncf %14 : vector<32x512xf32> to vector<32x512xbf16>
    %c1 = arith.constant 1 : index
    %c0_12 = arith.constant 0 : index
    %c0_13 = arith.constant 0 : index
    %16 = vector.load %arg4[%c1, %c0_12, %c0_13] : memref<3x512x512xbf16, #tpu.memory_space<vmem>>, vector<1x512x512xbf16>
    %17 = vector.shape_cast %16 : vector<1x512x512xbf16> to vector<512x512xbf16>
    %cst_14 = arith.constant dense<0.000000e+00> : vector<32x512xf32>
    %18 = tpu.matmul %15, %17, %cst_14 {dimension_numbers = #tpu.dot_dimension_numbers<[1], [0], [0], [1], [0, 0, 1, 1], [], []>} : vector<32x512xbf16>, vector<512x512xbf16>, vector<32x512xf32> -> vector<32x512xf32>
    %c1_15 = arith.constant 1 : index
    %c0_16 = arith.constant 0 : index
    %c0_17 = arith.constant 0 : index
    %19 = vector.load %arg5[%c1_15, %c0_16, %c0_17] : memref<3x1x512xf32, #tpu.memory_space<vmem>>, vector<1x1x512xf32>
    %20 = vector.shape_cast %19 : vector<1x1x512xf32> to vector<1x512xf32>
    %21 = vector.broadcast %20 : vector<1x512xf32> to vector<32x512xf32>
    %22 = arith.addf %18, %21 : vector<32x512xf32>
    %23 = math.tanh %22 : vector<32x512xf32>
    %24 = arith.truncf %23 : vector<32x512xf32> to vector<32x512xbf16>
    %c2 = arith.constant 2 : index
    %c0_18 = arith.constant 0 : index
    %c0_19 = arith.constant 0 : index
    %25 = vector.load %arg4[%c2, %c0_18, %c0_19] : memref<3x512x512xbf16, #tpu.memory_space<vmem>>, vector<1x512x512xbf16>
    %26 = vector.shape_cast %25 : vector<1x512x512xbf16> to vector<512x512xbf16>
    %cst_20 = arith.constant dense<0.000000e+00> : vector<32x512xf32>
    %27 = tpu.matmul %24, %26, %cst_20 {dimension_numbers = #tpu.dot_dimension_numbers<[1], [0], [0], [1], [0, 0, 1, 1], [], []>} : vector<32x512xbf16>, vector<512x512xbf16>, vector<32x512xf32> -> vector<32x512xf32>
    %c2_21 = arith.constant 2 : index
    %c0_22 = arith.constant 0 : index
    %c0_23 = arith.constant 0 : index
    %28 = vector.load %arg5[%c2_21, %c0_22, %c0_23] : memref<3x1x512xf32, #tpu.memory_space<vmem>>, vector<1x1x512xf32>
    %29 = vector.shape_cast %28 : vector<1x1x512xf32> to vector<1x512xf32>
    %30 = vector.broadcast %29 : vector<1x512xf32> to vector<32x512xf32>
    %31 = arith.addf %27, %30 : vector<32x512xf32>
    %32 = arith.truncf %31 : vector<32x512xf32> to vector<32x512xbf16>
    %c0_24 = arith.constant 0 : index
    %c0_25 = arith.constant 0 : index
    %33 = vector.load %arg6[%c0_24, %c0_25] : memref<512x128xbf16, #tpu.memory_space<vmem>>, vector<512x128xbf16>
    %cst_26 = arith.constant dense<0.000000e+00> : vector<32x128xf32>
    %34 = tpu.matmul %32, %33, %cst_26 {dimension_numbers = #tpu.dot_dimension_numbers<[1], [0], [0], [1], [0, 0, 1, 1], [], []>} : vector<32x512xbf16>, vector<512x128xbf16>, vector<32x128xf32> -> vector<32x128xf32>
    %c0_27 = arith.constant 0 : index
    %c0_28 = arith.constant 0 : index
    %35 = vector.load %arg7[%c0_27, %c0_28] : memref<1x128xf32, #tpu.memory_space<vmem>>, vector<1x128xf32>
    %36 = vector.broadcast %35 : vector<1x128xf32> to vector<32x128xf32>
    %37 = arith.addf %34, %36 : vector<32x128xf32>
    %38 = math.tanh %37 : vector<32x128xf32>
    %39 = arith.truncf %38 : vector<32x128xf32> to vector<32x128xbf16>
    %c0_29 = arith.constant 0 : index
    %c0_30 = arith.constant 0 : index
    %40 = vector.load %arg8[%c0_29, %c0_30] : memref<128x128xbf16, #tpu.memory_space<vmem>>, vector<128x128xbf16>
    %cst_31 = arith.constant dense<0.000000e+00> : vector<32x128xf32>
    %41 = tpu.matmul %39, %40, %cst_31 {dimension_numbers = #tpu.dot_dimension_numbers<[1], [0], [0], [1], [0, 0, 1, 1], [], []>} : vector<32x128xbf16>, vector<128x128xbf16>, vector<32x128xf32> -> vector<32x128xf32>
    %c0_32 = arith.constant 0 : index
    %c0_33 = arith.constant 0 : index
    %42 = vector.load %arg9[%c0_32, %c0_33] : memref<1x128xf32, #tpu.memory_space<vmem>>, vector<1x128xf32>
    %43 = vector.broadcast %42 : vector<1x128xf32> to vector<32x128xf32>
    %44 = arith.addf %41, %43 : vector<32x128xf32>
    %c0_34 = arith.constant 0 : index
    %c0_35 = arith.constant 0 : index
    %45 = vector.load %arg10[%c0_34, %c0_35] : memref<32x128xf32, #tpu.memory_space<vmem>>, vector<32x128xf32>
    tpu.vector_store %arg10[%c0_34, %c0_35], %44 {strides = array<i32>} : memref<32x128xf32, #tpu.memory_space<vmem>>, vector<32x128xf32>,
    return
  }
  func.func @transform_0(%arg0: i32) -> (i32, i32) {
    %c0_i32 = arith.constant 0 : i32
    %c0_i32_0 = arith.constant 0 : i32
    return %arg0, %c0_i32 : i32, i32
  }
  func.func @transform_1(%arg0: i32) -> (i32, i32) {
    %c0_i32 = arith.constant 0 : i32
    %c0_i32_0 = arith.constant 0 : i32
    %c0_i32_1 = arith.constant 0 : i32
    return %c0_i32, %c0_i32_0 : i32, i32
  }
  func.func @transform_2(%arg0: i32) -> (i32, i32) {
    %c0_i32 = arith.constant 0 : i32
    %c0_i32_0 = arith.constant 0 : i32
    %c0_i32_1 = arith.constant 0 : i32
    return %c0_i32, %c0_i32_0 : i32, i32
  }
  func.func @transform_3(%arg0: i32) -> (i32, i32, i32) {
    %c0_i32 = arith.constant 0 : i32
    %c0_i32_0 = arith.constant 0 : i32
    %c0_i32_1 = arith.constant 0 : i32
    %c0_i32_2 = arith.constant 0 : i32
    return %c0_i32, %c0_i32_0, %c0_i32_1 : i32, i32, i32
  }
  func.func @transform_4(%arg0: i32) -> (i32, i32, i32) {
    %c0_i32 = arith.constant 0 : i32
    %c0_i32_0 = arith.constant 0 : i32
    %c0_i32_1 = arith.constant 0 : i32
    %c0_i32_2 = arith.constant 0 : i32
    return %c0_i32, %c0_i32_0, %c0_i32_1 : i32, i32, i32
  }
  func.func @transform_5(%arg0: i32) -> (i32, i32) {
    %c0_i32 = arith.constant 0 : i32
    %c0_i32_0 = arith.constant 0 : i32
    %c0_i32_1 = arith.constant 0 : i32
    return %c0_i32, %c0_i32_0 : i32, i32
  }
  func.func @transform_6(%arg0: i32) -> (i32, i32) {
    %c0_i32 = arith.constant 0 : i32
    %c0_i32_0 = arith.constant 0 : i32
    %c0_i32_1 = arith.constant 0 : i32
    return %c0_i32, %c0_i32_0 : i32, i32
  }
  func.func @transform_7(%arg0: i32) -> (i32, i32) {
    %c0_i32 = arith.constant 0 : i32
    %c0_i32_0 = arith.constant 0 : i32
    %c0_i32_1 = arith.constant 0 : i32
    return %c0_i32, %c0_i32_0 : i32, i32
  }
  func.func @transform_8(%arg0: i32) -> (i32, i32) {
    %c0_i32 = arith.constant 0 : i32
    %c0_i32_0 = arith.constant 0 : i32
    %c0_i32_1 = arith.constant 0 : i32
    return %c0_i32, %c0_i32_0 : i32, i32
  }
  func.func @transform_9(%arg0: i32) -> (i32, i32) {
    %c0_i32 = arith.constant 0 : i32
    %c0_i32_0 = arith.constant 0 : i32
    return %arg0, %c0_i32 : i32, i32
  }
}

</mosaic_0001>

<bundles_post_ra>
// kernel: fno_apply.1
= control target key start
LH: loop header
LB: loop body
LE: loop exit
PB: predicated region body
PF: predicated region fallthrough
CT: control target
= control target key end

     0   :  { %14 = vsyncpa [#allocation3], 0  ;;  %s6615_s0 = inlined_call_operand.vmem [shape: bf16[64,128], index: 0, kind: input, shape index: {}]   ;;  %s6616_s1 = inlined_call_operand.hbm [shape: bf16[128,512], index: 1, kind: input, shape index: {}]   ;;  %s6617_s2 = inlined_call_operand.hbm [shape: f32[1,512], index: 2, kind: input, shape index: {}]   ;;  %s6618_s3 = inlined_call_operand.hbm [shape: bf16[3,512,512], index: 3, kind: input, shape index: {}]   ;;  %s6619_s4 = inlined_call_operand.hbm [shape: f32[3,1,512], index: 4, kind: input, shape index: {}]   ;;  %s6620_s5 = inlined_call_operand.hbm [shape: bf16[512,128], index: 5, kind: input, shape index: {}]   ;;  %s6621_s6 = inlined_call_operand.hbm [shape: f32[1,128], index: 6, kind: input, shape index: {}]   ;;  %s6622_s7 = inlined_call_operand.hbm [shape: bf16[128,128], index: 7, kind: input, shape index: {}]   ;;  %s6623_s8 = inlined_call_operand.hbm [shape: f32[1,128], index: 8, kind: input, shape index: {}]   ;;  %s6624_s9 = inlined_call_operand.vmem [shape: f32[64,128], index: 9, kind: output, shape index: {}]  }
   0x1   :  { %15 = vsyncpa [#allocation5], 0 }
   0x2   :  { %16 = vsyncpa [#allocation8], 0 }
   0x3   :  { %17 = vsyncpa [#allocation11], 0 }
   0x4   :  { %18 = vsyncpa [#allocation14], 0  ;;  %s6300_s30 = smov 0  }
   0x5 LB: > { %s6237_s10 = smov [#allocation4]   ;;  %s6628_s12 = sadd.s32 4294967295, %s6235_s30   ;;  %s6235_s30 = sphi %s6300_s30, %s24_s30  }
   0x6   : > { %s275_s11 = sshll.u32 %s6237_s10, 4  ;;  %p4486_p0 = scmp.ge.s32.totalorder %s6235_s30, 1  ;;  %s6314_s11 = int_to_ptr.vmem [resolvable:$true] %s275_s11 }
   0x7   : > { %p249_p1 = scmp.lt.s32.totalorder %s6235_s30, 3  ;;  %p6310_p2 = scmp.eq.s32.totalorder %s6628_s12, 0 }
   0x8   : > { %s6238_s15 = smov [#allocation7]   ;;  %s6239_s18 = smov [#allocation10]  }
   0x9   : > { %s6633_s13 = scalar_select %p6310_p2, 1, 0 }
   0xa   : > { %p6316_p3 = pnand %p4486_p0, %p249_p1  ;;  %s298_s16 = sshll.u32 %s6238_s15, 4  ;;  %s6322_s16 = int_to_ptr.vmem [resolvable:$true] %s298_s16 }
   0xb   : > { %s325_s19 = sshll.u32 %s6239_s18, 4  ;;  %s6240_s20 = smov [#allocation2]   ;;  %s6330_s19 = int_to_ptr.vmem [resolvable:$true] %s325_s19 }
   0xc   : > { %s6634_s14 = scalar_select %p6316_p3, 1, 0 }
   0xd   : > { %p5185_p4 = pneg %p6316_p3  ;;  %s6332_s21 = sshll.u32 %s6240_s20, 4  ;;  %s262_s21 = int_to_ptr.vmem [resolvable:$true] %s6332_s21 }
   0xe   : > { %s5985_s24 = scalar_lea.hbm %s6617_s2, 64 }
   0xf   : > { %p6326_p5 = pnand %p6310_p2, %p5185_p4  ;;  %p5986_p6 = scmp.ne.s32.totalorder %s6617_s2, %s5985_s24 }
  0x10   : > { %p5992_p10 = scmp.lt.u32.totalorder %s5985_s24, %s6617_s2 }
  0x11   : > { %p6342_p7 = pneg %p6326_p5 }
  0x13   : > { %p5988_p8 = pnand %p6342_p7, %p5986_p6 }
  0x15   : > { %p5989_p9 = pneg %p5988_p8 }
  0x17   : > { %p5994_p11 = pnand %p5992_p10, %p5989_p9 }
  0x19   : > { %5997 = shalt.err (!%p5994_p11)
}
  0x1a   : > { %s5998_s10 = scalar_lea.vmem %s6314_s11, 64  ;;  %p6006_p1 = scmp.lt.s32.totalorder %s6314_s11, %s6314_s11 }
  0x1b   : > { %p5999_p12 = scmp.ne.s32.totalorder %s6314_s11, %s5998_s10  ;;  %p6007_p4 = scmp.lt.s32.totalorder %s5998_s10, %s5998_s10 }
  0x1d   : > { %p6001_p13 = pnand %p5999_p12, %p6342_p7  ;;  %p6008_p6 = por %p6007_p4, %p6006_p1 }
  0x1f   : > { %p6002_p0 = pneg %p6001_p13 }
  0x21   : > { %p6009_p8 = pnand %p6008_p6, %p6002_p0 }
  0x23   : > { %6012 = shalt.err (!%p6009_p8)
}
  0x24   : > { %5191 = dma.hbm_to_vmem [thread:$0]  (!%p6326_p5), %s6617_s2, 64, %s6314_s11, [#allocation5]  }
  0x25   : > { %s6013_s23 = scalar_lea.hbm %s6619_s4, 192 }
  0x26   : > { %p6014_p9 = scmp.ne.s32.totalorder %s6619_s4, %s6013_s23  ;;  %p6020_p12 = scmp.lt.u32.totalorder %s6013_s23, %s6619_s4 }
  0x28   : > { %p6016_p10 = pnand %p6014_p9, %p6342_p7 }
  0x2a   : > { %p6017_p11 = pneg %p6016_p10 }
  0x2c   : > { %p6022_p13 = pnand %p6020_p12, %p6017_p11 }
  0x2e   : > { %6025 = shalt.err (!%p6022_p13)
}
  0x2f   : > { %s6026_s11 = scalar_lea.vmem %s6322_s16, 192  ;;  %p6034_p6 = scmp.lt.s32.totalorder %s6322_s16, %s6322_s16 }
  0x30   : > { %p6027_p0 = scmp.ne.s32.totalorder %s6322_s16, %s6026_s11  ;;  %p6035_p8 = scmp.lt.s32.totalorder %s6026_s11, %s6026_s11 }
  0x32   : > { %p6029_p1 = pnand %p6027_p0, %p6342_p7  ;;  %p6036_p9 = por %p6035_p8, %p6034_p6 }
  0x34   : > { %p6030_p4 = pneg %p6029_p1 }
  0x36   : > { %p6037_p10 = pnand %p6036_p9, %p6030_p4 }
  0x38   : > { %6040 = shalt.err (!%p6037_p10)
}
  0x39   : > { %s6629_s29 = smov 64   ;;  %s6631_s10 = smov 4  }
  0x3a   : > { %5197 = dma.hbm_to_vmem [thread:$0]  (!%p6326_p5), %s6619_s4, 192, %s6322_s16, [#allocation8], %s6629_s29, %s6629_s29, %s6631_s10  }
  0x3b   : > { %s6041_s23 = scalar_lea.hbm %s6621_s6, 16 }
  0x3c   : > { %p6042_p11 = scmp.ne.s32.totalorder %s6621_s6, %s6041_s23  ;;  %p6048_p0 = scmp.lt.u32.totalorder %s6041_s23, %s6621_s6 }
  0x3e   : > { %p6044_p12 = pnand %p6042_p11, %p6342_p7 }
  0x40   : > { %p6045_p13 = pneg %p6044_p12 }
  0x42   : > { %p6050_p1 = pnand %p6048_p0, %p6045_p13 }
  0x44   : > { %6053 = shalt.err (!%p6050_p1)
}
  0x45   : > { %s6054_s16 = scalar_lea.vmem %s6330_s19, 16  ;;  %s6061_s11 = scalar_lea.vmem %s6330_s19, 32 }
  0x46   : > { %p6055_p4 = scmp.ne.s32.totalorder %s6330_s19, %s6054_s16  ;;  %p6062_p9 = scmp.lt.s32.totalorder %s6330_s19, %s6330_s19 }
  0x47   : > { %p6063_p10 = scmp.lt.s32.totalorder %s6061_s11, %s6054_s16 }
  0x48   : > { %p6057_p6 = pnand %p6055_p4, %p6342_p7 }
  0x49   : > { %p6064_p11 = por %p6063_p10, %p6062_p9 }
  0x4a   : > { %p6058_p8 = pneg %p6057_p6 }
  0x4c   : > { %p6065_p12 = pnand %p6064_p11, %p6058_p8 }
  0x4e   : > { %6068 = shalt.err (!%p6065_p12)
}
  0x4f   : > { %5203 = dma.hbm_to_vmem [thread:$0]  (!%p6326_p5), %s6621_s6, 16, %s6330_s19, [#allocation11]  }
  0x50   : > { %s6069_s23 = scalar_lea.hbm %s6616_s1, 4096 }
  0x51   : > { %p6070_p13 = scmp.ne.s32.totalorder %s6616_s1, %s6069_s23  ;;  %p6076_p4 = scmp.lt.u32.totalorder %s6069_s23, %s6616_s1 }
  0x53   : > { %p6072_p0 = pnand %p6070_p13, %p6342_p7 }
  0x55   : > { %p6073_p1 = pneg %p6072_p0 }
  0x57   : > { %p6078_p6 = pnand %p6076_p4, %p6073_p1 }
  0x59   : > { %6081 = shalt.err (!%p6078_p6)
}
  0x5a   : > { %s6082_s16 = scalar_lea.vmem %s262_s21, 4096  ;;  %p6090_p11 = scmp.lt.s32.totalorder %s262_s21, %s262_s21 }
  0x5b   : > { %p6083_p8 = scmp.ne.s32.totalorder %s262_s21, %s6082_s16  ;;  %p6091_p12 = scmp.lt.s32.totalorder %s6082_s16, %s6082_s16 }
  0x5d   : > { %p6085_p9 = pnand %p6083_p8, %p6342_p7  ;;  %p6092_p2 = por %p6091_p12, %p6090_p11 }
  0x5f   : > { %p6086_p10 = pneg %p6085_p9 }
  0x61   : > { %p6093_p3 = pnand %p6092_p2, %p6086_p10 }
  0x63   : > { %6096 = shalt.err (!%p6093_p3)
}
  0x64   : > { %s6243_s19 = smov 256   ;;  %s6244_s11 = smov 16  }
  0x65   : > { %5188 = dma.hbm_to_vmem [thread:$0]  (!%p6326_p5), %s6616_s1, 4096, %s262_s21, [#allocation3], %s6243_s19, %s6243_s19, %s6244_s11  }
  0x66   : > { %s6245_s20 = smov [#allocation6]   ;;  %s6246_s23 = smov [#allocation9]  }
  0x67   : > { %s285_s22 = sshll.u32 %s6245_s20, 4  ;;  %s311_s24 = sshll.u32 %s6246_s23, 4  ;;  %s286_s22 = int_to_ptr.vmem [resolvable:$true] %s285_s22  ;;  %s312_s24 = int_to_ptr.vmem [resolvable:$true] %s311_s24 }
  0x68   : > { %s6097_s28 = scalar_lea.hbm %s6618_s3, 49152 }
  0x69   : > { %p6098_p2 = scmp.ne.s32.totalorder %s6618_s3, %s6097_s28  ;;  %p6104_p0 = scmp.lt.u32.totalorder %s6097_s28, %s6618_s3 }
  0x6b   : > { %p6100_p3 = pnand %p6098_p2, %p6342_p7 }
  0x6d   : > { %p6101_p13 = pneg %p6100_p3 }
  0x6f   : > { %p6106_p1 = pnand %p6104_p0, %p6101_p13 }
  0x71   : > { %6109 = shalt.err (!%p6106_p1)
}
  0x72   : > { %s6110_s21 = scalar_lea.vmem %s286_s22, 49152  ;;  %p6118_p9 = scmp.lt.s32.totalorder %s286_s22, %s286_s22 }
  0x73   : > { %p6111_p4 = scmp.ne.s32.totalorder %s286_s22, %s6110_s21  ;;  %p6119_p10 = scmp.lt.s32.totalorder %s6110_s21, %s6110_s21 }
  0x75   : > { %p6113_p6 = pnand %p6111_p4, %p6342_p7  ;;  %p6120_p11 = por %p6119_p10, %p6118_p9 }
  0x77   : > { %p6114_p8 = pneg %p6113_p6 }
  0x79   : > { %p6121_p12 = pnand %p6120_p11, %p6114_p8 }
  0x7b   : > { %6124 = shalt.err (!%p6121_p12)
}
  0x7c   : > { %5194 = dma.hbm_to_vmem [thread:$0]  (!%p6326_p5), %s6618_s3, 49152, %s286_s22, [#allocation5], %s6243_s19, %s6243_s19, %s6244_s11  }
  0x7d   : > { %s6125_s18 = scalar_lea.hbm %s6620_s5, 4096 }
  0x7e   : > { %p6126_p2 = scmp.ne.s32.totalorder %s6620_s5, %s6125_s18  ;;  %p6132_p0 = scmp.lt.u32.totalorder %s6125_s18, %s6620_s5 }
  0x80   : > { %p6128_p3 = pnand %p6126_p2, %p6342_p7 }
  0x82   : > { %p6129_p13 = pneg %p6128_p3 }
  0x84   : > { %p6134_p1 = pnand %p6132_p0, %p6129_p13 }
  0x86   : > { %6137 = shalt.err (!%p6134_p1)
}
  0x87   : > { %s6138_s28 = scalar_lea.vmem %s312_s24, 4096  ;;  %p6146_p9 = scmp.lt.s32.totalorder %s312_s24, %s312_s24 }
  0x88   : > { %p6139_p4 = scmp.ne.s32.totalorder %s312_s24, %s6138_s28  ;;  %p6147_p10 = scmp.lt.s32.totalorder %s6138_s28, %s6138_s28 }
  0x8a   : > { %p6141_p6 = pnand %p6139_p4, %p6342_p7  ;;  %p6148_p11 = por %p6147_p10, %p6146_p9 }
  0x8c   : > { %p6142_p8 = pneg %p6141_p6 }
  0x8e   : > { %p6149_p12 = pnand %p6148_p11, %p6142_p8 }
  0x90   : > { %6152 = shalt.err (!%p6149_p12)
}
  0x91   : > { %s6637_s19 = smov 4   ;;  %s6638_s11 = smov 64  }
  0x92   : > { %5200 = dma.hbm_to_vmem [thread:$0]  (!%p6326_p5), %s6620_s5, 4096, %s312_s24, [#allocation8], %s6638_s11, %s6638_s11, %s6637_s19  }
  0x93   : > { %s6247_s21 = smov [#allocation12]   ;;  %s6248_s15 = smov [#allocation13]  }
  0x94   : > { %s335_s12 = sshll.u32 %s6247_s21, 4  ;;  %s349_s29 = sshll.u32 %s6248_s15, 4  ;;  %s336_s12 = int_to_ptr.vmem [resolvable:$true] %s335_s12  ;;  %s350_s29 = int_to_ptr.vmem [resolvable:$true] %s349_s29 }
  0x95   : > { %s6153_s20 = scalar_lea.hbm %s6622_s7, 1024 }
  0x96   : > { %p6154_p2 = scmp.ne.s32.totalorder %s6622_s7, %s6153_s20  ;;  %p6160_p0 = scmp.lt.u32.totalorder %s6153_s20, %s6622_s7 }
  0x98   : > { %p6156_p3 = pnand %p6154_p2, %p6342_p7 }
  0x9a   : > { %p6157_p13 = pneg %p6156_p3 }
  0x9c   : > { %p6162_p1 = pnand %p6160_p0, %p6157_p13 }
  0x9e   : > { %6165 = shalt.err (!%p6162_p1)
}
  0x9f   : > { %s6166_s24 = scalar_lea.vmem %s336_s12, 1024  ;;  %p6174_p9 = scmp.lt.s32.totalorder %s336_s12, %s336_s12 }
  0xa0   : > { %p6167_p4 = scmp.ne.s32.totalorder %s336_s12, %s6166_s24  ;;  %p6175_p10 = scmp.lt.s32.totalorder %s6166_s24, %s6166_s24 }
  0xa2   : > { %p6169_p6 = pnand %p6167_p4, %p6342_p7  ;;  %p6176_p11 = por %p6175_p10, %p6174_p9 }
  0xa4   : > { %p6170_p8 = pneg %p6169_p6 }
  0xa6   : > { %p6177_p12 = pnand %p6176_p11, %p6170_p8 }
  0xa8   : > { %6180 = shalt.err (!%p6177_p12)
}
  0xa9   : > { %5206 = dma.hbm_to_vmem [thread:$0]  (!%p6326_p5), %s6622_s7, 1024, %s336_s12, [#allocation11], %s6638_s11, %s6638_s11, %s6637_s19  }
  0xaa   : > { %s6181_s10 = scalar_lea.hbm %s6623_s8, 16 }
  0xab   : > { %p6182_p2 = scmp.ne.s32.totalorder %s6623_s8, %s6181_s10  ;;  %p6188_p0 = scmp.lt.u32.totalorder %s6181_s10, %s6623_s8 }
  0xad   : > { %p6184_p3 = pnand %p6182_p2, %p6342_p7 }
  0xaf   : > { %p6185_p13 = pneg %p6184_p3 }
  0xb1   : > { %p6190_p1 = pnand %p6188_p0, %p6185_p13 }
  0xb3   : > { %6193 = shalt.err (!%p6190_p1)
}
  0xb4   : > { %s6194_s26 = scalar_lea.vmem %s350_s29, 16  ;;  %s6201_s19 = scalar_lea.vmem %s350_s29, 32 }
  0xb5   : > { %p6195_p4 = scmp.ne.s32.totalorder %s350_s29, %s6194_s26  ;;  %p6202_p9 = scmp.lt.s32.totalorder %s350_s29, %s350_s29 }
  0xb6   : > { %p6203_p10 = scmp.lt.s32.totalorder %s6201_s19, %s6194_s26 }
  0xb7   : > { %p6197_p6 = pnand %p6195_p4, %p6342_p7 }
  0xb8   : > { %p6204_p11 = por %p6203_p10, %p6202_p9 }
  0xb9   : > { %p6198_p8 = pneg %p6197_p6 }
  0xbb   : > { %p6205_p12 = pnand %p6204_p11, %p6198_p8 }
  0xbd   : > { %6208 = shalt.err (!%p6205_p12)
}
  0xbe   : > { %5209 = dma.hbm_to_vmem [thread:$0]  (!%p6326_p5), %s6623_s8, 16, %s350_s29, [#allocation14]  }
  0xbf   : > { %p6639_p2 = scmp.ne.s32.totalorder %s6634_s14, 0 }
  0xc0   : > { %p6640_p3 = scmp.ne.s32.totalorder (!%p6639_p2), %s6633_s13, 0 }
  0xc1   : > { %371 = sbr.rel (%p6639_p2) target bundleno = 1803 (0x70b), region = 56 }
  0xc8   : > { %6214 = dma.done.wait (%p6640_p3), [#allocation3], 4096  }
  0xc9   : > { %6216 = vsyncadd (%p6640_p3), [#allocation3], 4294963200 }
  0xca   : > { %6218 = dma.done.wait (%p6640_p3), [#allocation5], 49216  }
  0xcb   : > { %6220 = vsyncadd (%p6640_p3), [#allocation5], 4294918080 }
  0xcc   : > { %6222 = dma.done.wait (%p6640_p3), [#allocation8], 4288  }
  0xcd   : > { %6224 = vsyncadd (%p6640_p3), [#allocation8], 4294963008 }
  0xce   : > { %6226 = dma.done.wait (%p6640_p3), [#allocation11], 1040  }
  0xcf   : > { %6228 = vsyncadd (%p6640_p3), [#allocation11], 4294966256 }
  0xd0   : > { %6230 = dma.done.wait (%p6640_p3), [#allocation14], 16  }
  0xd1   : > { %6232 = vsyncadd (%p6640_p3), [#allocation14], 4294967280  ;;  %v6249_v0 = vmov 0   ;;  %s6641_s14 = sadd.s32 4294967295, %s6235_s30   ;;  %v5247_v1 = vld [vmem:[#allocation2 + $0x4] ss:$16 sps:$4 sm:$0xff]  }
  0xd2   : > { %710 = vmatprep.mubr.bf16.mxu0 %v6249_v0  ;;  %763 = vmatprep.mubr.bf16.mxu1 %v6249_v0  ;;  %s4505_s17 = sshll.u32 %s6641_s14, 2  ;;  %v5249_v2 = vld [vmem:[#allocation2] ss:$16 sps:$4 sm:$0xff]   ;;  %v5250_v3 = vld [vmem:[#allocation2 + $0x24] ss:$16 sps:$4 sm:$0xff]  }
  0xd3   : > { %p436_p5 = scmp.lt.s32.totalorder %s4505_s17, 7  ;;  %678 = vmatprep.subr.bf16.mxu0 %v5247_v1  ;;  %v5252_v4 = vld [vmem:[#allocation2 + $0x20] ss:$16 sps:$4 sm:$0xff]   ;;  %v5253_v5 = vld [vmem:[#allocation2 + $0x44] ss:$16 sps:$4 sm:$0xff]  }
  0xd4   : > { %679 = vmatpush1.bf16.msra.mxu0 %v5249_v2  ;;  %v5255_v6 = vld [vmem:[#allocation2 + $0x40] ss:$16 sps:$4 sm:$0xff]   ;;  %v5256_v7 = vld [vmem:[#allocation2 + $0x64] ss:$16 sps:$4 sm:$0xff]   ;;  %v5272_v10 = vld [vmem:[#allocation2 + $0xc] ss:$16 sps:$4 sm:$0xff]  }
  0xd5   : > { %s6643_s17 = smov (!%p436_p5, %s4505_s17), 7  ;;  %680 = vmatprep.subr.bf16.mxu0 %v5250_v3  ;;  %v5258_v8 = vld [vmem:[#allocation2 + $0x60] ss:$16 sps:$4 sm:$0xff]   ;;  %v5259_v9 = vld [vmem:[#allocation2 + $0x84] ss:$16 sps:$4 sm:$0xff]   ;;  %731 = vmatprep.subr.bf16.mxu1 %v5272_v10 }
  0xd6   : > { %s4506_s13 = sshll.u32 %s6643_s17, 2  ;;  %v5274_v11 = vld [vmem:[#allocation2 + $0x8] ss:$16 sps:$4 sm:$0xff]   ;;  %v5275_v12 = vld [vmem:[#allocation2 + $0x2c] ss:$16 sps:$4 sm:$0xff]   ;;  %s4508_s24 = sshll.u32 %s6643_s17, 3 }
  0xd7   : > { %s6542_s28 = scalar_lea.vmem %s6615_s0, %s4506_s13  ;;  %v5261_v13 = vld [vmem:[#allocation2 + $0x80] ss:$16 sps:$4 sm:$0xff]   ;;  %732 = vmatpush1.bf16.msra.mxu1 %v5274_v11  ;;  %v5277_v14 = vld [vmem:[#allocation2 + $0x28] ss:$16 sps:$4 sm:$0xff]   ;;  %v5262_v15 = vld [vmem:[#allocation2 + $0xa4] ss:$16 sps:$4 sm:$0xff]   ;;  %s445_s21 = scalar_lea.vmem %s6624_s9, %s4508_s24 }
  0xd8   : > { %681 = vmatpush1.bf16.msra.mxu0 %v5252_v4  ;;  %733 = vmatprep.subr.bf16.mxu1 %v5275_v12  ;;  %v5278_v16 = vld [vmem:[#allocation2 + $0x4c] ss:$16 sps:$4 sm:$0xff]   ;;  %v5264_v17 = vld [vmem:[#allocation2 + $0xa0] ss:$16 sps:$4 sm:$0xff]   ;;  %v5265_v18 = vld [vmem:[#allocation2 + $0xc4] ss:$16 sps:$4 sm:$0xff]  }
  0xd9   : > { %682 = vmatprep.subr.bf16.mxu0 %v5253_v5  ;;  %v5280_v19 = vld [vmem:[#allocation2 + $0x48] ss:$16 sps:$4 sm:$0xff]   ;;  %v5281_v20 = vld [vmem:[#allocation2 + $0x6c] ss:$16 sps:$4 sm:$0xff]   ;;  %v5267_v21 = vld [vmem:[#allocation2 + $0xc0] ss:$16 sps:$4 sm:$0xff]  }
  0xda   : > { %v5283_v22 = vld [vmem:[#allocation2 + $0x68] ss:$16 sps:$4 sm:$0xff]   ;;  %v5268_v23 = vld [vmem:[#allocation2 + $0xe4] ss:$16 sps:$4 sm:$0xff]   ;;  %v5284_v24 = vld [vmem:[#allocation2 + $0x8c] ss:$16 sps:$4 sm:$0xff]  }
  0xdb   : > { %734 = vmatpush1.bf16.msra.mxu1 %v5277_v14  ;;  %v5270_v25 = vld [vmem:[#allocation2 + $0xe0] ss:$16 sps:$4 sm:$0xff]   ;;  %v5286_v26 = vld [vmem:[#allocation2 + $0x88] ss:$16 sps:$4 sm:$0xff]   ;;  %v5287_v27 = vld [vmem:[#allocation2 + $0xac] ss:$16 sps:$4 sm:$0xff]  }
  0xdc   : > { %683 = vmatpush1.bf16.msra.mxu0 %v5255_v6  ;;  %735 = vmatprep.subr.bf16.mxu1 %v5278_v16  ;;  %v5299_v28 = vld [vmem:[#allocation6 + $0x4] ss:$16 sps:$4 sm:$0xff]   ;;  %v5271_v29 = vld [vmem:[%s6542_s28] sm:$0xff]   ;;  %v5291_v31 = vld [vmem:[#allocation2 + $0xcc] ss:$16 sps:$4 sm:$0xff]  }
  0xdd   : > { %684 = vmatprep.subr.bf16.mxu0 %v5256_v7  ;;  %v5289_v30 = vld [vmem:[#allocation2 + $0xa8] ss:$16 sps:$4 sm:$0xff]   ;;  %v5297_v32 = vld [vmem:[#allocation6] ss:$16 sps:$4 sm:$0xff]   ;;  %v5294_v35 = vld [vmem:[#allocation2 + $0xec] ss:$16 sps:$4 sm:$0xff]  }
  0xde   : > { %v5305_v33 = vld [vmem:[#allocation6 + $0x24] ss:$16 sps:$4 sm:$0xff]   ;;  %v5303_v36 = vld [vmem:[#allocation6 + $0x20] ss:$16 sps:$4 sm:$0xff]   ;;  %v5302_v40 = vld [vmem:[#allocation6 + $0xc] ss:$16 sps:$4 sm:$0xff]  }
  0xdf   : > { %736 = vmatpush1.bf16.msra.mxu1 %v5280_v19  ;;  %v5293_v34 = vld [vmem:[#allocation2 + $0xc8] ss:$16 sps:$4 sm:$0xff]   ;;  %v5309_v41 = vld [vmem:[#allocation6 + $0x40] ss:$16 sps:$4 sm:$0xff]   ;;  %v5300_v43 = vld [vmem:[#allocation6 + $0x8] ss:$16 sps:$4 sm:$0xff]  }
  0xe0   : > { %685 = vmatpush1.bf16.msra.mxu0 %v5258_v8  ;;  %737 = vmatprep.subr.bf16.mxu1 %v5281_v20  ;;  %v5311_v37 = vld [vmem:[#allocation6 + $0x44] ss:$16 sps:$4 sm:$0xff]   ;;  %v5308_v44 = vld [vmem:[#allocation6 + $0x2c] ss:$16 sps:$4 sm:$0xff]   ;;  %v5315_v45 = vld [vmem:[#allocation6 + $0x60] ss:$16 sps:$4 sm:$0xff]  }
  0xe1   : > { %686 = vmatprep.subr.bf16.mxu0 %v5259_v9  ;;  %v5290_v38 = vld [vmem:[%s6542_s28 + $0x8] sm:$0xff]   ;;  %v5314_v48 = vld [vmem:[#allocation6 + $0x4c] ss:$16 sps:$4 sm:$0xff]   ;;  %v5321_v49 = vld [vmem:[#allocation6 + $0x80] ss:$16 sps:$4 sm:$0xff]  }
  0xe2   : > { %v5296_v39 = vld [vmem:[#allocation2 + $0xe8] ss:$16 sps:$4 sm:$0xff]   ;;  %v5306_v47 = vld [vmem:[#allocation6 + $0x28] ss:$16 sps:$4 sm:$0xff]   ;;  %v5320_v52 = vld [vmem:[#allocation6 + $0x6c] ss:$16 sps:$4 sm:$0xff]  }
  0xe3   : > { %738 = vmatpush1.bf16.msra.mxu1 %v5283_v22  ;;  %v5317_v42 = vld [vmem:[#allocation6 + $0x64] ss:$16 sps:$4 sm:$0xff]   ;;  %v5312_v51 = vld [vmem:[#allocation6 + $0x48] ss:$16 sps:$4 sm:$0xff]   ;;  %v5327_v53 = vld [vmem:[#allocation6 + $0xa0] ss:$16 sps:$4 sm:$0xff]  }
  0xe4   : > { %687 = vmatpush1.bf16.msra.mxu0 %v5261_v13  ;;  %739 = vmatprep.subr.bf16.mxu1 %v5284_v24  ;;  %v5323_v46 = vld [vmem:[#allocation6 + $0x84] ss:$16 sps:$4 sm:$0xff]   ;;  %v5318_v55 = vld [vmem:[#allocation6 + $0x68] ss:$16 sps:$4 sm:$0xff]   ;;  %v5326_v56 = vld [vmem:[#allocation6 + $0x8c] ss:$16 sps:$4 sm:$0xff]  }
  0xe5   : > { %688 = vmatprep.subr.bf16.mxu0 %v5262_v15  ;;  %v5329_v50 = vld [vmem:[#allocation6 + $0xa4] ss:$16 sps:$4 sm:$0xff]   ;;  %v5333_v57 = vld [vmem:[#allocation6 + $0xc0] ss:$16 sps:$4 sm:$0xff]   ;;  %v5324_v59 = vld [vmem:[#allocation6 + $0x88] ss:$16 sps:$4 sm:$0xff]  }
  0xe6   : > { %v5335_v54 = vld [vmem:[#allocation6 + $0xc4] ss:$16 sps:$4 sm:$0xff]   ;;  %v5332_v60 = vld [vmem:[#allocation6 + $0xac] ss:$16 sps:$4 sm:$0xff]   ;;  %v5339_v61 = vld [vmem:[#allocation6 + $0xe0] ss:$16 sps:$4 sm:$0xff]  }
  0xe7   : > { %740 = vmatpush1.bf16.msra.mxu1 %v5286_v26  ;;  %v5341_v58 = vld [vmem:[#allocation6 + $0xe4] ss:$16 sps:$4 sm:$0xff]   ;;  %v5330_v63 = vld [vmem:[#allocation6 + $0xa8] ss:$16 sps:$4 sm:$0xff]   ;;  %v5345_v1 = vld [vmem:[#allocation6 + $0x100] ss:$16 sps:$4 sm:$0xff]  }
  0xe8   : > { %689 = vmatpush1.bf16.msra.mxu0 %v5264_v17  ;;  %741 = vmatprep.subr.bf16.mxu1 %v5287_v27  ;;  %v5347_v62 = vld [vmem:[#allocation6 + $0x104] ss:$16 sps:$4 sm:$0xff]   ;;  %v5336_v3 = vld [vmem:[#allocation6 + $0xc8] ss:$16 sps:$4 sm:$0xff]   ;;  %v5344_v4 = vld [vmem:[#allocation6 + $0xec] ss:$16 sps:$4 sm:$0xff]  }
  0xe9   : > { %690 = vmatprep.subr.bf16.mxu0 %v5265_v18  ;;  %v5353_v2 = vld [vmem:[#allocation6 + $0x124] ss:$16 sps:$4 sm:$0xff]   ;;  %v5351_v5 = vld [vmem:[#allocation6 + $0x120] ss:$16 sps:$4 sm:$0xff]   ;;  %v5342_v7 = vld [vmem:[#allocation6 + $0xe8] ss:$16 sps:$4 sm:$0xff]  }
  0xea   : > { %v5359_v6 = vld [vmem:[#allocation6 + $0x144] ss:$16 sps:$4 sm:$0xff]   ;;  %v5350_v8 = vld [vmem:[#allocation6 + $0x10c] ss:$16 sps:$4 sm:$0xff]   ;;  %v5357_v9 = vld [vmem:[#allocation6 + $0x140] ss:$16 sps:$4 sm:$0xff]  }
  0xeb   : > { %742 = vmatpush1.bf16.msra.mxu1 %v5289_v30  ;;  %v5365_v10 = vld [vmem:[#allocation6 + $0x164] ss:$16 sps:$4 sm:$0xff]   ;;  %v5348_v11 = vld [vmem:[#allocation6 + $0x108] ss:$16 sps:$4 sm:$0xff]   ;;  %v5356_v12 = vld [vmem:[#allocation6 + $0x12c] ss:$16 sps:$4 sm:$0xff]  }
  0xec   : > { %691 = vmatpush1.bf16.msra.mxu0 %v5267_v21  ;;  %743 = vmatprep.subr.bf16.mxu1 %v5291_v31  ;;  %v5363_v13 = vld [vmem:[#allocation6 + $0x160] ss:$16 sps:$4 sm:$0xff]   ;;  %v5371_v14 = vld [vmem:[#allocation6 + $0x184] ss:$16 sps:$4 sm:$0xff]   ;;  %v5354_v15 = vld [vmem:[#allocation6 + $0x128] ss:$16 sps:$4 sm:$0xff]  }
  0xed   : > { %692 = vmatprep.subr.bf16.mxu0 %v5268_v23  ;;  %v5362_v16 = vld [vmem:[#allocation6 + $0x14c] ss:$16 sps:$4 sm:$0xff]   ;;  %v5369_v17 = vld [vmem:[#allocation6 + $0x180] ss:$16 sps:$4 sm:$0xff]   ;;  %v5377_v18 = vld [vmem:[#allocation6 + $0x1a4] ss:$16 sps:$4 sm:$0xff]  }
  0xee   : > { %v5360_v19 = vld [vmem:[#allocation6 + $0x148] ss:$16 sps:$4 sm:$0xff]   ;;  %v5368_v20 = vld [vmem:[#allocation6 + $0x16c] ss:$16 sps:$4 sm:$0xff]   ;;  %v5375_v21 = vld [vmem:[#allocation6 + $0x1a0] ss:$16 sps:$4 sm:$0xff]  }
  0xef   : > { %744 = vmatpush1.bf16.msra.mxu1 %v5293_v34  ;;  %v5366_v22 = vld [vmem:[#allocation6 + $0x168] ss:$16 sps:$4 sm:$0xff]   ;;  %v5374_v23 = vld [vmem:[#allocation6 + $0x18c] ss:$16 sps:$4 sm:$0xff]   ;;  %v5383_v27 = vld [vmem:[#allocation6 + $0x1c4] ss:$16 sps:$4 sm:$0xff]  }
  0xf0   : > { %693 = vmatpush1.bf16.msra.mxu0 %v5270_v25  ;;  %745 = vmatprep.subr.bf16.mxu1 %v5294_v35  ;;  %v5372_v24 = vld [vmem:[#allocation6 + $0x188] ss:$16 sps:$4 sm:$0xff]   ;;  %v5380_v25 = vld [vmem:[#allocation6 + $0x1ac] ss:$16 sps:$4 sm:$0xff]   ;;  %v5389_v31 = vld [vmem:[#allocation6 + $0x1e4] ss:$16 sps:$4 sm:$0xff]  }
  0xf1   : > { %1582 = vmatprep.subr.bf16.mxu0 %v5299_v28  ;;  %v5378_v26 = vld [vmem:[#allocation6 + $0x1a8] ss:$16 sps:$4 sm:$0xff]   ;;  %v5386_v28 = vld [vmem:[#allocation6 + $0x1cc] ss:$16 sps:$4 sm:$0xff]   ;;  %v5395_v35 = vld [vmem:[#allocation6 + $0x204] ss:$16 sps:$4 sm:$0xff]  }
  0xf2   : > { %v5384_v30 = vld [vmem:[#allocation6 + $0x1c8] ss:$16 sps:$4 sm:$0xff]  }
  0xf3   : > { %711 = vmatmul.mubr.bf16.vlgmr.msra.gmra.mrb[0].mxu0 %v5271_v29  ;;  %746 = vmatpush1.bf16.msra.mxu1 %v5296_v39  ;;  %v5390_v34 = vld [vmem:[#allocation6 + $0x1e8] ss:$16 sps:$4 sm:$0xff]  }
  0xf4   : > { %720 = vmatprep.mubr.bf16.mxu0 %v6249_v0  ;;  %1583 = vmatpush1.bf16.msra.mxu0 %v5297_v32  ;;  %v5392_v32 = vld [vmem:[#allocation6 + $0x1ec] ss:$16 sps:$4 sm:$0xff]  }
  0xf5   : > { %1584 = vmatprep.subr.bf16.mxu0 %v5305_v33  ;;  %1688 = vmatprep.subr.bf16.mxu1 %v5302_v40  ;;  %v5387_v33 = vld [vmem:[#allocation6 + $0x1e0] ss:$16 sps:$4 sm:$0xff]   ;;  %v484_v40 = vld [vmem:[#allocation4] sm:$0xf] }
  0xf6   : > { %764 = vmatmul.mubr.bf16.vlgmr.msra.gmra.mrb[0].mxu1 %v5271_v29  ;;  %v5381_v29 = vld [vmem:[#allocation6 + $0x1c0] ss:$16 sps:$4 sm:$0xff]  }
  0xf7   : > { %773 = vmatprep.mubr.bf16.mxu1 %v6249_v0  ;;  %1689 = vmatpush1.bf16.msra.mxu1 %v5300_v43  ;;  %v5338_v0 = vld [vmem:[#allocation6 + $0xcc] ss:$16 sps:$4 sm:$0xff]  }
  0xf8   : > { %1585 = vmatpush1.bf16.msra.mxu0 %v5303_v36  ;;  %1690 = vmatprep.subr.bf16.mxu1 %v5308_v44  ;;  %v5398_v36 = vld [vmem:[#allocation6 + $0x20c] ss:$16 sps:$4 sm:$0xff]  }
  0xf9   : > { %1586 = vmatprep.subr.bf16.mxu0 %v5311_v37  ;;  %v486_v37 = vlaneseq }
  0xfb   : > { %721 = vmatmul.mubr.bf16.gmra.mrb[4].mxu0 %v5290_v38  ;;  %1691 = vmatpush1.bf16.msra.mxu1 %v5306_v47 }
  0xfc   : > { %1587 = vmatpush1.bf16.msra.mxu0 %v5309_v41  ;;  %1692 = vmatprep.subr.bf16.mxu1 %v5314_v48 }
  0xfd   : > { %1588 = vmatprep.subr.bf16.mxu0 %v5317_v42 }
  0xfe   : > { %774 = vmatmul.mubr.bf16.gmra.mrb[4].mxu1 %v5290_v38  ;;  %v487_v38 = vshrl.u32 %v486_v37, 7  ;;  %v5425_v37 = vld [vmem:[#allocation6 + $0x2a4] ss:$16 sps:$4 sm:$0xff]  }
  0xff   : > { %1693 = vmatpush1.bf16.msra.mxu1 %v5312_v51 }
 0x100   : > { %1589 = vmatpush1.bf16.msra.mxu0 %v5315_v45  ;;  %1694 = vmatprep.subr.bf16.mxu1 %v5320_v52  ;;  %v6548_v39 = vsub.s32 0, %v487_v38  ;;  %v6550_v41 = vsub.s32 1, %v487_v38 }
 0x101   : > { %1590 = vmatprep.subr.bf16.mxu0 %v5323_v46 }
 0x102   : > { %v489_v42 = vrot.slane %v484_v40, %v6548_v39  ;;  %v493_v44 = vrot.slane %v484_v40, %v6550_v41 }
 0x103   : > { %1695 = vmatpush1.bf16.msra.mxu1 %v5318_v55  ;;  %v5393_v55 = vld [vmem:[#allocation6 + $0x200] ss:$16 sps:$4 sm:$0xff]  }
 0x104   : > { %1591 = vmatpush1.bf16.msra.mxu0 %v5321_v49  ;;  %1696 = vmatprep.subr.bf16.mxu1 %v5326_v56  ;;  %v5396_v56 = vld [vmem:[#allocation6 + $0x208] ss:$16 sps:$4 sm:$0xff]  }
 0x105   : > { %1592 = vmatprep.subr.bf16.mxu0 %v5329_v50 }
 0x107   : > { %1697 = vmatpush1.bf16.msra.mxu1 %v5324_v59  ;;  %v5404_v59 = vld [vmem:[#allocation6 + $0x22c] ss:$16 sps:$4 sm:$0xff]  }
 0x108   : > { %1593 = vmatpush1.bf16.msra.mxu0 %v5327_v53  ;;  %1698 = vmatprep.subr.bf16.mxu1 %v5332_v60  ;;  %v6554_v53 = vsub.s32 2, %v487_v38 }
 0x109   : > { %1594 = vmatprep.subr.bf16.mxu0 %v5335_v54 }
 0x10b   : > { %1699 = vmatpush1.bf16.msra.mxu1 %v5330_v63  ;;  %v497_v63 = vrot.slane %v484_v40, %v6554_v53 }
 0x10c   : > { %1595 = vmatpush1.bf16.msra.mxu0 %v5333_v57  ;;  %1700 = vmatprep.subr.bf16.mxu1 %v5338_v0  ;;  %v6556_v57 = vsub.s32 3, %v487_v38  ;;  %v5399_v0 = vld [vmem:[#allocation6 + $0x220] ss:$16 sps:$4 sm:$0xff]   ;;  %v5428_v38 = vld [vmem:[#allocation6 + $0x2ac] ss:$16 sps:$4 sm:$0xff]  }
 0x10d   : > { %1596 = vmatprep.subr.bf16.mxu0 %v5341_v58  ;;  %v5401_v58 = vld [vmem:[#allocation6 + $0x224] ss:$16 sps:$4 sm:$0xff]  }
 0x10f   : > { %1701 = vmatpush1.bf16.msra.mxu1 %v5336_v3 }
 0x110   : > { %1597 = vmatpush1.bf16.msra.mxu0 %v5339_v61  ;;  %1702 = vmatprep.subr.bf16.mxu1 %v5344_v4  ;;  %v501_v4 = vrot.slane %v484_v40, %v6556_v57 }
 0x111   : > { %1598 = vmatprep.subr.bf16.mxu0 %v5347_v62 }
 0x113   : > { %1703 = vmatpush1.bf16.msra.mxu1 %v5342_v7 }
 0x114   : > { %1599 = vmatpush1.bf16.msra.mxu0 %v5345_v1  ;;  %1704 = vmatprep.subr.bf16.mxu1 %v5350_v8  ;;  %v5402_v1 = vld [vmem:[#allocation6 + $0x228] ss:$16 sps:$4 sm:$0xff]  }
 0x115   : > { %1600 = vmatprep.subr.bf16.mxu0 %v5353_v2 }
 0x117   : > { %1705 = vmatpush1.bf16.msra.mxu1 %v5348_v11 }
 0x118   : > { %1601 = vmatpush1.bf16.msra.mxu0 %v5351_v5  ;;  %1706 = vmatprep.subr.bf16.mxu1 %v5356_v12  ;;  %v5407_v5 = vld [vmem:[#allocation6 + $0x244] ss:$16 sps:$4 sm:$0xff]  }
 0x119   : > { %1602 = vmatprep.subr.bf16.mxu0 %v5359_v6  ;;  %v5410_v6 = vld [vmem:[#allocation6 + $0x24c] ss:$16 sps:$4 sm:$0xff]  }
 0x11b   : > { %1707 = vmatpush1.bf16.msra.mxu1 %v5354_v15  ;;  %v5408_v15 = vld [vmem:[#allocation6 + $0x248] ss:$16 sps:$4 sm:$0xff]  }
 0x11c   : > { %1603 = vmatpush1.bf16.msra.mxu0 %v5357_v9  ;;  %1708 = vmatprep.subr.bf16.mxu1 %v5362_v16 }
 0x11d   : > { %1604 = vmatprep.subr.bf16.mxu0 %v5365_v10 }
 0x11f   : > { %1709 = vmatpush1.bf16.msra.mxu1 %v5360_v19  ;;  %v5413_v19 = vld [vmem:[#allocation6 + $0x264] ss:$16 sps:$4 sm:$0xff]  }
 0x120   : > { %1605 = vmatpush1.bf16.msra.mxu0 %v5363_v13  ;;  %1710 = vmatprep.subr.bf16.mxu1 %v5368_v20  ;;  %v5416_v20 = vld [vmem:[#allocation6 + $0x26c] ss:$16 sps:$4 sm:$0xff]  }
 0x121   : > { %1606 = vmatprep.subr.bf16.mxu0 %v5371_v14  ;;  %v5405_v14 = vld [vmem:[#allocation6 + $0x240] ss:$16 sps:$4 sm:$0xff]  }
 0x123   : > { %1711 = vmatpush1.bf16.msra.mxu1 %v5366_v22 }
 0x124   : > { %1607 = vmatpush1.bf16.msra.mxu0 %v5369_v17  ;;  %1712 = vmatprep.subr.bf16.mxu1 %v5374_v23 }
 0x125   : > { %1608 = vmatprep.subr.bf16.mxu0 %v5377_v18 }
 0x127   : > { %1713 = vmatpush1.bf16.msra.mxu1 %v5372_v24 }
 0x128   : > { %1609 = vmatpush1.bf16.msra.mxu0 %v5375_v21  ;;  %1714 = vmatprep.subr.bf16.mxu1 %v5380_v25  ;;  %v5411_v25 = vld [vmem:[#allocation6 + $0x260] ss:$16 sps:$4 sm:$0xff]  }
 0x129   : > { %1610 = vmatprep.subr.bf16.mxu0 %v5383_v27 }
 0x12b   : > { %1715 = vmatpush1.bf16.msra.mxu1 %v5378_v26  ;;  %v5414_v26 = vld [vmem:[#allocation6 + $0x268] ss:$16 sps:$4 sm:$0xff]  }
 0x12c   : > { %1716 = vmatprep.subr.bf16.mxu1 %v5386_v28  ;;  %1611 = vmatpush1.bf16.msra.mxu0 %v5381_v29  ;;  %v5419_v28 = vld [vmem:[#allocation6 + $0x284] ss:$16 sps:$4 sm:$0xff]   ;;  %v5422_v29 = vld [vmem:[#allocation6 + $0x28c] ss:$16 sps:$4 sm:$0xff]  }
 0x12d   : > { %1612 = vmatprep.subr.bf16.mxu0 %v5389_v31 }
 0x12f   : > { %1717 = vmatpush1.bf16.msra.mxu1 %v5384_v30 }
 0x130   : > { %1718 = vmatprep.subr.bf16.mxu1 %v5392_v32  ;;  %1613 = vmatpush1.bf16.msra.mxu0 %v5387_v33  ;;  %v5417_v33 = vld [vmem:[#allocation6 + $0x280] ss:$16 sps:$4 sm:$0xff]  }
 0x131   : > { %1635 = vmatprep.subr.bf16.mxu0 %v5395_v35 }
 0x133   : > { %1719 = vmatpush1.bf16.msra.mxu1 %v5390_v34  ;;  %v5420_v34 = vld [vmem:[#allocation6 + $0x288] ss:$16 sps:$4 sm:$0xff]  }
 0x134   : > { %1741 = vmatprep.subr.bf16.mxu1 %v5398_v36 }
 0x1c6   : > { %v712_v43 = vpop.f32.mrb[0].mxu0 }
 0x1c7   : > { %v714_v45 = vpop.f32.mrb[1].mxu0  ;;  %v713_v47 = vadd.f32 %v712_v43, %v489_v42 }
 0x1c8   : > { %v716_v46 = vpop.f32.mrb[2].mxu0  ;;  %v715_v50 = vadd.f32 %v714_v45, %v493_v44  ;;  %v5423_v45 = vld [vmem:[#allocation6 + $0x2a0] ss:$16 sps:$4 sm:$0xff]  }
 0x1c9   : > { %v717_v48 = vadd.f32 %v716_v46, %v489_v42  ;;  %v718_v49 = vpop.f32.mrb[3].mxu0  ;;  %v765_v10 = vpop.f32.mrb[0].mxu1  ;;  %v5426_v46 = vld [vmem:[#allocation6 + $0x2a8] ss:$16 sps:$4 sm:$0xff]  }
 0x1ca   : > { %v719_v51 = vadd.f32 %v718_v49, %v493_v44  ;;  %v766_v12 = vadd.f32 %v765_v10, %v497_v63  ;;  %v767_v13 = vpop.f32.mrb[1].mxu1  ;;  %v5434_v49 = vld [vmem:[#allocation6 + $0x2cc] ss:$16 sps:$4 sm:$0xff]   ;;  %v5467_v10 = vld [vmem:[#allocation6 + $0x384] ss:$16 sps:$4 sm:$0xff]  }
 0x1cb   : > { %v784_v52 = vpack.c.bf16 %v717_v48, %v713_v47  ;;  %v768_v17 = vadd.f32 %v767_v13, %v501_v4  ;;  %v769_v18 = vpop.f32.mrb[2].mxu1  ;;  %v5431_v48 = vld [vmem:[#allocation6 + $0x2c4] ss:$16 sps:$4 sm:$0xff]   ;;  %v5468_v13 = vld [vmem:[#allocation6 + $0x388] ss:$16 sps:$4 sm:$0xff]  }
 0x1cc   : > { %v785_v54 = vpack.c.bf16 %v719_v51, %v715_v50  ;;  %v770_v21 = vadd.f32 %v769_v18, %v497_v63  ;;  %v771_v22 = vpop.f32.mrb[3].mxu1  ;;  %v5429_v50 = vld [vmem:[#allocation6 + $0x2c0] ss:$16 sps:$4 sm:$0xff]   ;;  %v5432_v51 = vld [vmem:[#allocation6 + $0x2c8] ss:$16 sps:$4 sm:$0xff]  }
 0x1cd   : > { %v772_v23 = vadd.f32 %v771_v22, %v501_v4  ;;  %v5479_v18 = vld [vmem:[#allocation6 + $0x3c4] ss:$16 sps:$4 sm:$0xff]  }
 0x1ce   : > { %1614 = vmatprep.mubr.bf16.mxu0 %v785_v54  ;;  %1720 = vmatprep.mubr.bf16.mxu1 %v785_v54  ;;  %v722_v60 = vpop.f32.mrb[4].mxu0  ;;  %v6560_v24 = vpack.c.bf16 %v770_v21, %v766_v12  ;;  %v5440_v54 = vld [vmem:[#allocation6 + $0x2ec] ss:$16 sps:$4 sm:$0xff]   ;;  %v5465_v12 = vld [vmem:[#allocation6 + $0x380] ss:$16 sps:$4 sm:$0xff]  }
 0x1cf   : > { %1615 = vmatmul.mubr.bf16.vlgmr.msra.gmra.mrb[8].mxu0 %v784_v52  ;;  %1721 = vmatmul.mubr.bf16.vlgmr.msra.gmra.mrb[8].mxu1 %v784_v52  ;;  %v723_v61 = vadd.f32 %v722_v60, %v489_v42  ;;  %v724_v62 = vpop.f32.mrb[5].mxu0  ;;  %v787_v27 = vpack.c.bf16 %v772_v23, %v768_v17  ;;  %v5437_v52 = vld [vmem:[#allocation6 + $0x2e4] ss:$16 sps:$4 sm:$0xff]   ;;  %v5441_v60 = vld [vmem:[#allocation6 + $0x300] ss:$16 sps:$4 sm:$0xff]  }
 0x1d0   : > { %1636 = vmatpush1.bf16.msra.mxu0 %v5393_v55  ;;  %1742 = vmatpush1.bf16.msra.mxu1 %v5396_v56  ;;  %v725_v2 = vadd.f32 %v724_v62, %v493_v44  ;;  %v726_v3 = vpop.f32.mrb[6].mxu0  ;;  %v5435_v55 = vld [vmem:[#allocation6 + $0x2e0] ss:$16 sps:$4 sm:$0xff]   ;;  %v5438_v56 = vld [vmem:[#allocation6 + $0x2e8] ss:$16 sps:$4 sm:$0xff]  }
 0x1d1   : > { %1637 = vmatprep.subr.bf16.mxu0 %v5401_v58  ;;  %1743 = vmatprep.subr.bf16.mxu1 %v5404_v59  ;;  %v727_v7 = vadd.f32 %v726_v3, %v489_v42  ;;  %v728_v8 = vpop.f32.mrb[7].mxu0  ;;  %v775_v30 = vpop.f32.mrb[4].mxu1  ;;  %v5443_v58 = vld [vmem:[#allocation6 + $0x304] ss:$16 sps:$4 sm:$0xff]   ;;  %v5446_v59 = vld [vmem:[#allocation6 + $0x30c] ss:$16 sps:$4 sm:$0xff]  }
 0x1d2   : > { %v729_v9 = vadd.f32 %v728_v8, %v493_v44  ;;  %v776_v31 = vadd.f32 %v775_v30, %v497_v63  ;;  %v777_v32 = vpop.f32.mrb[5].mxu1  ;;  %v5449_v62 = vld [vmem:[#allocation6 + $0x324] ss:$16 sps:$4 sm:$0xff]   ;;  %v5458_v3 = vld [vmem:[#allocation6 + $0x34c] ss:$16 sps:$4 sm:$0xff]  }
 0x1d3   : > { %v788_v11 = vpack.c.bf16 %v727_v7, %v723_v61  ;;  %v778_v35 = vadd.f32 %v777_v32, %v501_v4  ;;  %v779_v36 = vpop.f32.mrb[6].mxu1  ;;  %v5444_v61 = vld [vmem:[#allocation6 + $0x308] ss:$16 sps:$4 sm:$0xff]   ;;  %v5464_v7 = vld [vmem:[#allocation6 + $0x36c] ss:$16 sps:$4 sm:$0xff]  }
 0x1d4   : > { %1638 = vmatpush1.bf16.msra.mxu0 %v5399_v0  ;;  %1744 = vmatpush1.bf16.msra.mxu1 %v5402_v1  ;;  %v789_v16 = vpack.c.bf16 %v729_v9, %v725_v2  ;;  %v780_v40 = vadd.f32 %v779_v36, %v497_v63  ;;  %v781_v42 = vpop.f32.mrb[7].mxu1  ;;  %v5452_v63 = vld [vmem:[#allocation6 + $0x32c] ss:$16 sps:$4 sm:$0xff]   ;;  %v5447_v0 = vld [vmem:[#allocation6 + $0x320] ss:$16 sps:$4 sm:$0xff]  }
 0x1d5   : > { %1639 = vmatprep.subr.bf16.mxu0 %v5407_v5  ;;  %1745 = vmatprep.subr.bf16.mxu1 %v5410_v6  ;;  %v782_v43 = vadd.f32 %v781_v42, %v501_v4  ;;  %v5450_v1 = vld [vmem:[#allocation6 + $0x328] ss:$16 sps:$4 sm:$0xff]   ;;  %v5455_v2 = vld [vmem:[#allocation6 + $0x344] ss:$16 sps:$4 sm:$0xff]   ;;  %v5453_v4 = vld [vmem:[#allocation6 + $0x340] ss:$16 sps:$4 sm:$0xff]  }
 0x1d6   : > { %1624 = vmatprep.mubr.bf16.mxu0 %v789_v16  ;;  %1730 = vmatprep.mubr.bf16.mxu1 %v789_v16  ;;  %v6562_v44 = vpack.c.bf16 %v780_v40, %v776_v31  ;;  %v5456_v5 = vld [vmem:[#allocation6 + $0x348] ss:$16 sps:$4 sm:$0xff]   ;;  %v5461_v6 = vld [vmem:[#allocation6 + $0x364] ss:$16 sps:$4 sm:$0xff]   ;;  %v5459_v8 = vld [vmem:[#allocation6 + $0x360] ss:$16 sps:$4 sm:$0xff]  }
 0x1d7   : > { %1625 = vmatmul.mubr.bf16.gmra.mrb[12].mxu0 %v788_v11  ;;  %1731 = vmatmul.mubr.bf16.gmra.mrb[12].mxu1 %v788_v11  ;;  %v6564_v47 = vpack.c.bf16 %v782_v43, %v778_v35  ;;  %v5462_v9 = vld [vmem:[#allocation6 + $0x368] ss:$16 sps:$4 sm:$0xff]   ;;  %v5470_v11 = vld [vmem:[#allocation6 + $0x38c] ss:$16 sps:$4 sm:$0xff]   ;;  %v5471_v16 = vld [vmem:[#allocation6 + $0x3a0] ss:$16 sps:$4 sm:$0xff]  }
 0x1d8   : > { %1640 = vmatpush1.bf16.msra.mxu0 %v5405_v14  ;;  %1746 = vmatpush1.bf16.msra.mxu1 %v5408_v15  ;;  %v5473_v14 = vld [vmem:[#allocation6 + $0x3a4] ss:$16 sps:$4 sm:$0xff]   ;;  %v5476_v15 = vld [vmem:[#allocation6 + $0x3ac] ss:$16 sps:$4 sm:$0xff]   ;;  %v5474_v17 = vld [vmem:[#allocation6 + $0x3a8] ss:$16 sps:$4 sm:$0xff]  }
 0x1d9   : > { %1641 = vmatprep.subr.bf16.mxu0 %v5413_v19  ;;  %1747 = vmatprep.subr.bf16.mxu1 %v5416_v20  ;;  %v5482_v19 = vld [vmem:[#allocation6 + $0x3cc] ss:$16 sps:$4 sm:$0xff]   ;;  %v5477_v20 = vld [vmem:[#allocation6 + $0x3c0] ss:$16 sps:$4 sm:$0xff]   ;;  %v5480_v21 = vld [vmem:[#allocation6 + $0x3c8] ss:$16 sps:$4 sm:$0xff]  }
 0x1da   : > { %1667 = vmatprep.mubr.bf16.mxu0 %v787_v27  ;;  %1773 = vmatprep.mubr.bf16.mxu1 %v787_v27  ;;  %v5485_v22 = vld [vmem:[#allocation6 + $0x3e4] ss:$16 sps:$4 sm:$0xff]   ;;  %v5488_v23 = vld [vmem:[#allocation6 + $0x3ec] ss:$16 sps:$4 sm:$0xff]   ;;  %v5492_v30 = vld [vmem:[#allocation6 + $0x408] ss:$16 sps:$4 sm:$0xff]  }
 0x1db   : > { %v5491_v27 = vld [vmem:[#allocation6 + $0x404] ss:$16 sps:$4 sm:$0xff]   ;;  %v5500_v32 = vld [vmem:[#allocation6 + $0x42c] ss:$16 sps:$4 sm:$0xff]   ;;  %v5507_v42 = vld [vmem:[#allocation6 + $0x460] ss:$16 sps:$4 sm:$0xff]  }
 0x1dc   : > { %1642 = vmatpush1.bf16.msra.mxu0 %v5411_v25  ;;  %1748 = vmatpush1.bf16.msra.mxu1 %v5414_v26  ;;  %v5483_v25 = vld [vmem:[#allocation6 + $0x3e0] ss:$16 sps:$4 sm:$0xff]   ;;  %v5486_v26 = vld [vmem:[#allocation6 + $0x3e8] ss:$16 sps:$4 sm:$0xff]   ;;  %v5497_v31 = vld [vmem:[#allocation6 + $0x424] ss:$16 sps:$4 sm:$0xff]  }
 0x1dd   : > { %1643 = vmatprep.subr.bf16.mxu0 %v5419_v28  ;;  %1749 = vmatprep.subr.bf16.mxu1 %v5422_v29  ;;  %v5494_v28 = vld [vmem:[#allocation6 + $0x40c] ss:$16 sps:$4 sm:$0xff]   ;;  %v5489_v29 = vld [vmem:[#allocation6 + $0x400] ss:$16 sps:$4 sm:$0xff]   ;;  %v5503_v35 = vld [vmem:[#allocation6 + $0x444] ss:$16 sps:$4 sm:$0xff]  }
 0x1de   : > { %v5506_v36 = vld [vmem:[#allocation6 + $0x44c] ss:$16 sps:$4 sm:$0xff]   ;;  %v5509_v40 = vld [vmem:[#allocation6 + $0x464] ss:$16 sps:$4 sm:$0xff]   ;;  %v5510_v43 = vld [vmem:[#allocation6 + $0x468] ss:$16 sps:$4 sm:$0xff]  }
 0x1e0   : > { %1644 = vmatpush1.bf16.msra.mxu0 %v5417_v33  ;;  %1750 = vmatpush1.bf16.msra.mxu1 %v5420_v34  ;;  %v5495_v33 = vld [vmem:[#allocation6 + $0x420] ss:$16 sps:$4 sm:$0xff]   ;;  %v5498_v34 = vld [vmem:[#allocation6 + $0x428] ss:$16 sps:$4 sm:$0xff]  }
 0x1e1   : > { %1645 = vmatprep.subr.bf16.mxu0 %v5425_v37  ;;  %1751 = vmatprep.subr.bf16.mxu1 %v5428_v38  ;;  %v5501_v37 = vld [vmem:[#allocation6 + $0x440] ss:$16 sps:$4 sm:$0xff]   ;;  %v5504_v38 = vld [vmem:[#allocation6 + $0x448] ss:$16 sps:$4 sm:$0xff]  }
 0x1e4   : > { %1646 = vmatpush1.bf16.msra.mxu0 %v5423_v45  ;;  %1752 = vmatpush1.bf16.msra.mxu1 %v5426_v46  ;;  %v5515_v45 = vld [vmem:[#allocation6 + $0x484] ss:$16 sps:$4 sm:$0xff]   ;;  %v5518_v46 = vld [vmem:[#allocation6 + $0x48c] ss:$16 sps:$4 sm:$0xff]  }
 0x1e5   : > { %1647 = vmatprep.subr.bf16.mxu0 %v5431_v48  ;;  %1753 = vmatprep.subr.bf16.mxu1 %v5434_v49  ;;  %v5516_v48 = vld [vmem:[#allocation6 + $0x488] ss:$16 sps:$4 sm:$0xff]   ;;  %v5521_v49 = vld [vmem:[#allocation6 + $0x4a4] ss:$16 sps:$4 sm:$0xff]  }
 0x1e8   : > { %1648 = vmatpush1.bf16.msra.mxu0 %v5429_v50  ;;  %1754 = vmatpush1.bf16.msra.mxu1 %v5432_v51  ;;  %v5524_v50 = vld [vmem:[#allocation6 + $0x4ac] ss:$16 sps:$4 sm:$0xff]   ;;  %v5519_v51 = vld [vmem:[#allocation6 + $0x4a0] ss:$16 sps:$4 sm:$0xff]  }
 0x1e9   : > { %1649 = vmatprep.subr.bf16.mxu0 %v5437_v52  ;;  %1755 = vmatprep.subr.bf16.mxu1 %v5440_v54  ;;  %v5527_v52 = vld [vmem:[#allocation6 + $0x4c4] ss:$16 sps:$4 sm:$0xff]   ;;  %v5530_v54 = vld [vmem:[#allocation6 + $0x4cc] ss:$16 sps:$4 sm:$0xff]  }
 0x1ec   : > { %1650 = vmatpush1.bf16.msra.mxu0 %v5435_v55  ;;  %1756 = vmatpush1.bf16.msra.mxu1 %v5438_v56  ;;  %v5525_v55 = vld [vmem:[#allocation6 + $0x4c0] ss:$16 sps:$4 sm:$0xff]   ;;  %v5528_v56 = vld [vmem:[#allocation6 + $0x4c8] ss:$16 sps:$4 sm:$0xff]  }
 0x1ed   : > { %1651 = vmatprep.subr.bf16.mxu0 %v5443_v58  ;;  %1757 = vmatprep.subr.bf16.mxu1 %v5446_v59  ;;  %v5533_v58 = vld [vmem:[#allocation6 + $0x4e4] ss:$16 sps:$4 sm:$0xff]   ;;  %v5536_v59 = vld [vmem:[#allocation6 + $0x4ec] ss:$16 sps:$4 sm:$0xff]  }
 0x1f0   : > { %1652 = vmatpush1.bf16.msra.mxu0 %v5441_v60  ;;  %1758 = vmatpush1.bf16.msra.mxu1 %v5444_v61  ;;  %v5531_v60 = vld [vmem:[#allocation6 + $0x4e0] ss:$16 sps:$4 sm:$0xff]   ;;  %v5534_v61 = vld [vmem:[#allocation6 + $0x4e8] ss:$16 sps:$4 sm:$0xff]  }
 0x1f1   : > { %1653 = vmatprep.subr.bf16.mxu0 %v5449_v62  ;;  %1759 = vmatprep.subr.bf16.mxu1 %v5452_v63  ;;  %v5539_v62 = vld [vmem:[#allocation6 + $0x504] ss:$16 sps:$4 sm:$0xff]   ;;  %v5542_v63 = vld [vmem:[#allocation6 + $0x50c] ss:$16 sps:$4 sm:$0xff]  }
 0x1f4   : > { %1654 = vmatpush1.bf16.msra.mxu0 %v5447_v0  ;;  %1760 = vmatpush1.bf16.msra.mxu1 %v5450_v1  ;;  %v5537_v0 = vld [vmem:[#allocation6 + $0x500] ss:$16 sps:$4 sm:$0xff]   ;;  %v5540_v1 = vld [vmem:[#allocation6 + $0x508] ss:$16 sps:$4 sm:$0xff]  }
 0x1f5   : > { %1655 = vmatprep.subr.bf16.mxu0 %v5455_v2  ;;  %1761 = vmatprep.subr.bf16.mxu1 %v5458_v3  ;;  %v5545_v2 = vld [vmem:[#allocation6 + $0x524] ss:$16 sps:$4 sm:$0xff]   ;;  %v5548_v3 = vld [vmem:[#allocation6 + $0x52c] ss:$16 sps:$4 sm:$0xff]  }
 0x1f8   : > { %1656 = vmatpush1.bf16.msra.mxu0 %v5453_v4  ;;  %1762 = vmatpush1.bf16.msra.mxu1 %v5456_v5  ;;  %v5543_v4 = vld [vmem:[#allocation6 + $0x520] ss:$16 sps:$4 sm:$0xff]   ;;  %v5546_v5 = vld [vmem:[#allocation6 + $0x528] ss:$16 sps:$4 sm:$0xff]  }
 0x1f9   : > { %1657 = vmatprep.subr.bf16.mxu0 %v5461_v6  ;;  %1763 = vmatprep.subr.bf16.mxu1 %v5464_v7  ;;  %v5551_v6 = vld [vmem:[#allocation6 + $0x544] ss:$16 sps:$4 sm:$0xff]   ;;  %v5554_v7 = vld [vmem:[#allocation6 + $0x54c] ss:$16 sps:$4 sm:$0xff]  }
 0x1fc   : > { %1658 = vmatpush1.bf16.msra.mxu0 %v5459_v8  ;;  %1764 = vmatpush1.bf16.msra.mxu1 %v5462_v9  ;;  %v5549_v8 = vld [vmem:[#allocation6 + $0x540] ss:$16 sps:$4 sm:$0xff]   ;;  %v5552_v9 = vld [vmem:[#allocation6 + $0x548] ss:$16 sps:$4 sm:$0xff]  }
 0x1fd   : > { %1659 = vmatprep.subr.bf16.mxu0 %v5467_v10  ;;  %1765 = vmatprep.subr.bf16.mxu1 %v5470_v11  ;;  %v5557_v10 = vld [vmem:[#allocation6 + $0x564] ss:$16 sps:$4 sm:$0xff]   ;;  %v5560_v11 = vld [vmem:[#allocation6 + $0x56c] ss:$16 sps:$4 sm:$0xff]  }
 0x200   : > { %1660 = vmatpush1.bf16.msra.mxu0 %v5465_v12  ;;  %1766 = vmatpush1.bf16.msra.mxu1 %v5468_v13  ;;  %v5555_v12 = vld [vmem:[#allocation6 + $0x560] ss:$16 sps:$4 sm:$0xff]   ;;  %v5558_v13 = vld [vmem:[#allocation6 + $0x568] ss:$16 sps:$4 sm:$0xff]  }
 0x201   : > { %1661 = vmatprep.subr.bf16.mxu0 %v5473_v14  ;;  %1767 = vmatprep.subr.bf16.mxu1 %v5476_v15  ;;  %v5563_v14 = vld [vmem:[#allocation6 + $0x584] ss:$16 sps:$4 sm:$0xff]   ;;  %v5566_v15 = vld [vmem:[#allocation6 + $0x58c] ss:$16 sps:$4 sm:$0xff]  }
 0x204   : > { %1662 = vmatpush1.bf16.msra.mxu0 %v5471_v16  ;;  %1768 = vmatpush1.bf16.msra.mxu1 %v5474_v17  ;;  %v5561_v16 = vld [vmem:[#allocation6 + $0x580] ss:$16 sps:$4 sm:$0xff]   ;;  %v5564_v17 = vld [vmem:[#allocation6 + $0x588] ss:$16 sps:$4 sm:$0xff]  }
 0x205   : > { %1663 = vmatprep.subr.bf16.mxu0 %v5479_v18  ;;  %1769 = vmatprep.subr.bf16.mxu1 %v5482_v19  ;;  %v5569_v18 = vld [vmem:[#allocation6 + $0x5a4] ss:$16 sps:$4 sm:$0xff]   ;;  %v5572_v19 = vld [vmem:[#allocation6 + $0x5ac] ss:$16 sps:$4 sm:$0xff]  }
 0x208   : > { %1664 = vmatpush1.bf16.msra.mxu0 %v5477_v20  ;;  %1770 = vmatpush1.bf16.msra.mxu1 %v5480_v21  ;;  %v5567_v20 = vld [vmem:[#allocation6 + $0x5a0] ss:$16 sps:$4 sm:$0xff]   ;;  %v5570_v21 = vld [vmem:[#allocation6 + $0x5a8] ss:$16 sps:$4 sm:$0xff]  }
 0x209   : > { %1665 = vmatprep.subr.bf16.mxu0 %v5485_v22  ;;  %1771 = vmatprep.subr.bf16.mxu1 %v5488_v23  ;;  %v5575_v22 = vld [vmem:[#allocation6 + $0x5c4] ss:$16 sps:$4 sm:$0xff]   ;;  %v5578_v23 = vld [vmem:[#allocation6 + $0x5cc] ss:$16 sps:$4 sm:$0xff]  }
 0x20c   : > { %1666 = vmatpush1.bf16.msra.mxu0 %v5483_v25  ;;  %1772 = vmatpush1.bf16.msra.mxu1 %v5486_v26  ;;  %v5573_v25 = vld [vmem:[#allocation6 + $0x5c0] ss:$16 sps:$4 sm:$0xff]   ;;  %v5576_v26 = vld [vmem:[#allocation6 + $0x5c8] ss:$16 sps:$4 sm:$0xff]  }
 0x20d   : > { %2610 = vmatprep.subr.bf16.mxu0 %v5491_v27  ;;  %2716 = vmatprep.subr.bf16.mxu1 %v5494_v28  ;;  %v5581_v27 = vld [vmem:[#allocation6 + $0x5e4] ss:$16 sps:$4 sm:$0xff]   ;;  %v5584_v28 = vld [vmem:[#allocation6 + $0x5ec] ss:$16 sps:$4 sm:$0xff]  }
 0x20f   : > { %1668 = vmatmul.mubr.bf16.vlgmr.msra.gmra.mrb[8].mxu0 %v6560_v24  ;;  %1774 = vmatmul.mubr.bf16.vlgmr.msra.gmra.mrb[8].mxu1 %v6560_v24  ;;  %v5512_v24 = vld [vmem:[#allocation6 + $0x46c] ss:$16 sps:$4 sm:$0xff]  }
 0x210   : > { %1677 = vmatprep.mubr.bf16.mxu0 %v6564_v47  ;;  %1783 = vmatprep.mubr.bf16.mxu1 %v6564_v47  ;;  %v5513_v47 = vld [vmem:[#allocation6 + $0x480] ss:$16 sps:$4 sm:$0xff]  }
 0x211   : > { %2611 = vmatpush1.bf16.msra.mxu0 %v5489_v29  ;;  %2717 = vmatpush1.bf16.msra.mxu1 %v5492_v30  ;;  %v5579_v29 = vld [vmem:[#allocation6 + $0x5e0] ss:$16 sps:$4 sm:$0xff]   ;;  %v5582_v30 = vld [vmem:[#allocation6 + $0x5e8] ss:$16 sps:$4 sm:$0xff]  }
 0x212   : > { %2612 = vmatprep.subr.bf16.mxu0 %v5497_v31  ;;  %2718 = vmatprep.subr.bf16.mxu1 %v5500_v32  ;;  %v5587_v31 = vld [vmem:[#allocation6 + $0x604] ss:$16 sps:$4 sm:$0xff]   ;;  %v5590_v32 = vld [vmem:[#allocation6 + $0x60c] ss:$16 sps:$4 sm:$0xff]  }
 0x215   : > { %2613 = vmatpush1.bf16.msra.mxu0 %v5495_v33  ;;  %2719 = vmatpush1.bf16.msra.mxu1 %v5498_v34  ;;  %v920_v33 = vld [vmem:[#allocation7] sm:$0xf] }
 0x216   : > { %2614 = vmatprep.subr.bf16.mxu0 %v5503_v35  ;;  %2720 = vmatprep.subr.bf16.mxu1 %v5506_v36  ;;  %v925_v34 = vrot.slane %v920_v33, %v6548_v39  ;;  %v933_v35 = vrot.slane %v920_v33, %v6554_v53  ;;  %v929_v36 = vrot.slane %v920_v33, %v6550_v41 }
 0x217   : > { %1678 = vmatmul.mubr.bf16.gmra.mrb[12].mxu0 %v6562_v44  ;;  %1784 = vmatmul.mubr.bf16.gmra.mrb[12].mxu1 %v6562_v44  ;;  %v5522_v44 = vld [vmem:[#allocation6 + $0x4a8] ss:$16 sps:$4 sm:$0xff]  }
 0x219   : > { %2615 = vmatpush1.bf16.msra.mxu0 %v5501_v37  ;;  %2721 = vmatpush1.bf16.msra.mxu1 %v5504_v38  ;;  %v937_v37 = vrot.slane %v920_v33, %v6556_v57  ;;  %v5599_v33 = vld [vmem:[#allocation6 + $0x644] ss:$16 sps:$4 sm:$0xff]  }
 0x21a   : > { %2616 = vmatprep.subr.bf16.mxu0 %v5509_v40  ;;  %2722 = vmatprep.subr.bf16.mxu1 %v5512_v24 }
 0x21d   : > { %2617 = vmatpush1.bf16.msra.mxu0 %v5507_v42  ;;  %2723 = vmatpush1.bf16.msra.mxu1 %v5510_v43 }
 0x21e   : > { %2618 = vmatprep.subr.bf16.mxu0 %v5515_v45  ;;  %2724 = vmatprep.subr.bf16.mxu1 %v5518_v46 }
 0x221   : > { %2619 = vmatpush1.bf16.msra.mxu0 %v5513_v47  ;;  %2725 = vmatpush1.bf16.msra.mxu1 %v5516_v48 }
 0x222   : > { %2620 = vmatprep.subr.bf16.mxu0 %v5521_v49  ;;  %2726 = vmatprep.subr.bf16.mxu1 %v5524_v50 }
 0x225   : > { %2621 = vmatpush1.bf16.msra.mxu0 %v5519_v51  ;;  %2727 = vmatpush1.bf16.msra.mxu1 %v5522_v44 }
 0x226   : > { %2622 = vmatprep.subr.bf16.mxu0 %v5527_v52  ;;  %2728 = vmatprep.subr.bf16.mxu1 %v5530_v54 }
 0x229   : > { %2623 = vmatpush1.bf16.msra.mxu0 %v5525_v55  ;;  %2729 = vmatpush1.bf16.msra.mxu1 %v5528_v56 }
 0x22a   : > { %2624 = vmatprep.subr.bf16.mxu0 %v5533_v58  ;;  %2730 = vmatprep.subr.bf16.mxu1 %v5536_v59 }
 0x22d   : > { %2625 = vmatpush1.bf16.msra.mxu0 %v5531_v60  ;;  %2731 = vmatpush1.bf16.msra.mxu1 %v5534_v61 }
 0x22e   : > { %2626 = vmatprep.subr.bf16.mxu0 %v5539_v62  ;;  %2732 = vmatprep.subr.bf16.mxu1 %v5542_v63 }
 0x231   : > { %2627 = vmatpush1.bf16.msra.mxu0 %v5537_v0  ;;  %2733 = vmatpush1.bf16.msra.mxu1 %v5540_v1 }
 0x232   : > { %2628 = vmatprep.subr.bf16.mxu0 %v5545_v2  ;;  %2734 = vmatprep.subr.bf16.mxu1 %v5548_v3 }
 0x235   : > { %2629 = vmatpush1.bf16.msra.mxu0 %v5543_v4  ;;  %2735 = vmatpush1.bf16.msra.mxu1 %v5546_v5 }
 0x236   : > { %2630 = vmatprep.subr.bf16.mxu0 %v5551_v6  ;;  %2736 = vmatprep.subr.bf16.mxu1 %v5554_v7 }
 0x239   : > { %2631 = vmatpush1.bf16.msra.mxu0 %v5549_v8  ;;  %2737 = vmatpush1.bf16.msra.mxu1 %v5552_v9 }
 0x23a   : > { %2632 = vmatprep.subr.bf16.mxu0 %v5557_v10  ;;  %2738 = vmatprep.subr.bf16.mxu1 %v5560_v11 }
 0x23d   : > { %2633 = vmatpush1.bf16.msra.mxu0 %v5555_v12  ;;  %2739 = vmatpush1.bf16.msra.mxu1 %v5558_v13 }
 0x23e   : > { %2634 = vmatprep.subr.bf16.mxu0 %v5563_v14  ;;  %2740 = vmatprep.subr.bf16.mxu1 %v5566_v15 }
 0x241   : > { %2635 = vmatpush1.bf16.msra.mxu0 %v5561_v16  ;;  %2741 = vmatpush1.bf16.msra.mxu1 %v5564_v17 }
 0x242   : > { %2636 = vmatprep.subr.bf16.mxu0 %v5569_v18  ;;  %2742 = vmatprep.subr.bf16.mxu1 %v5572_v19 }
 0x245   : > { %2637 = vmatpush1.bf16.msra.mxu0 %v5567_v20  ;;  %2743 = vmatpush1.bf16.msra.mxu1 %v5570_v21  ;;  %v5585_v20 = vld [vmem:[#allocation6 + $0x600] ss:$16 sps:$4 sm:$0xff]   ;;  %v5588_v21 = vld [vmem:[#allocation6 + $0x608] ss:$16 sps:$4 sm:$0xff]  }
 0x246   : > { %2638 = vmatprep.subr.bf16.mxu0 %v5575_v22  ;;  %2744 = vmatprep.subr.bf16.mxu1 %v5578_v23  ;;  %v5593_v23 = vld [vmem:[#allocation6 + $0x624] ss:$16 sps:$4 sm:$0xff]  }
 0x249   : > { %2639 = vmatpush1.bf16.msra.mxu0 %v5573_v25  ;;  %2745 = vmatpush1.bf16.msra.mxu1 %v5576_v26  ;;  %v5596_v25 = vld [vmem:[#allocation6 + $0x62c] ss:$16 sps:$4 sm:$0xff]  }
 0x24a   : > { %2640 = vmatprep.subr.bf16.mxu0 %v5581_v27  ;;  %2746 = vmatprep.subr.bf16.mxu1 %v5584_v28 }
 0x24d   : > { %2641 = vmatpush1.bf16.msra.mxu0 %v5579_v29  ;;  %2747 = vmatpush1.bf16.msra.mxu1 %v5582_v30  ;;  %v5591_v30 = vld [vmem:[#allocation6 + $0x620] ss:$16 sps:$4 sm:$0xff]  }
 0x24e   : > { %2663 = vmatprep.subr.bf16.mxu0 %v5587_v31  ;;  %2769 = vmatprep.subr.bf16.mxu1 %v5590_v32  ;;  %v5594_v31 = vld [vmem:[#allocation6 + $0x628] ss:$16 sps:$4 sm:$0xff]  }
 0x2e2   : > { %v1669_v38 = vpop.f32.mrb[8].mxu0  ;;  %v1775_v40 = vpop.f32.mrb[8].mxu1 }
 0x2e3   : > { %v5057_v24 = vadd.f32 %v1669_v38, %v925_v34  ;;  %v5065_v42 = vadd.f32 %v1775_v40, %v933_v35  ;;  %v1671_v43 = vpop.f32.mrb[9].mxu0  ;;  %v1777_v45 = vpop.f32.mrb[9].mxu1 }
 0x2e4   : > { %v5058_v46 = vadd.f32 %v1671_v43, %v929_v36  ;;  %v5066_v47 = vadd.f32 %v1777_v45, %v937_v37  ;;  %v1673_v48 = vpop.f32.mrb[10].mxu0  ;;  %v1779_v49 = vpop.f32.mrb[10].mxu1  ;;  %v5600_v43 = vld [vmem:[#allocation6 + $0x648] ss:$16 sps:$4 sm:$0xff]  }
 0x2e5   : > { %5913 = vtanh.f32 %v5057_v24  ;;  %v5059_v50 = vadd.f32 %v1673_v48, %v925_v34  ;;  %v1675_v51 = vpop.f32.mrb[11].mxu0  ;;  %v1781_v44 = vpop.f32.mrb[11].mxu1  ;;  %v5067_v52 = vadd.f32 %v1779_v49, %v933_v35  ;;  %v5603_v48 = vld [vmem:[#allocation6 + $0x660] ss:$16 sps:$4 sm:$0xff]   ;;  %v5606_v49 = vld [vmem:[#allocation6 + $0x668] ss:$16 sps:$4 sm:$0xff]  }
 0x2e6   : > { %5915 = vtanh.f32 %v5065_v42  ;;  %v5060_v54 = vadd.f32 %v1675_v51, %v929_v36  ;;  %v5068_v55 = vadd.f32 %v1781_v44, %v937_v37  ;;  %v5597_v42 = vld [vmem:[#allocation6 + $0x640] ss:$16 sps:$4 sm:$0xff]   ;;  %v5614_v51 = vld [vmem:[#allocation6 + $0x68c] ss:$16 sps:$4 sm:$0xff]  }
 0x2e7   : > { %5917 = vtanh.f32 %v5058_v46  ;;  %v5605_v46 = vld [vmem:[#allocation6 + $0x664] ss:$16 sps:$4 sm:$0xff]   ;;  %v5609_v44 = vld [vmem:[#allocation6 + $0x680] ss:$16 sps:$4 sm:$0xff]  }
 0x2e8   : > { %5919 = vtanh.f32 %v5066_v47  ;;  %v5608_v47 = vld [vmem:[#allocation6 + $0x66c] ss:$16 sps:$4 sm:$0xff]  }
 0x2e9   : > { %5921 = vtanh.f32 %v5059_v50  ;;  %v5611_v50 = vld [vmem:[#allocation6 + $0x684] ss:$16 sps:$4 sm:$0xff]  }
 0x2ea   : > { %5923 = vtanh.f32 %v5067_v52  ;;  %v1679_v56 = vpop.f32.mrb[12].mxu0  ;;  %v1785_v58 = vpop.f32.mrb[12].mxu1  ;;  %v5612_v52 = vld [vmem:[#allocation6 + $0x688] ss:$16 sps:$4 sm:$0xff]  }
 0x2eb   : > { %5925 = vtanh.f32 %v5060_v54  ;;  %v5061_v59 = vadd.f32 %v1679_v56, %v925_v34  ;;  %v5069_v60 = vadd.f32 %v1785_v58, %v933_v35  ;;  %v1681_v61 = vpop.f32.mrb[13].mxu0  ;;  %v1787_v62 = vpop.f32.mrb[13].mxu1  ;;  %v5617_v54 = vld [vmem:[#allocation6 + $0x6a4] ss:$16 sps:$4 sm:$0xff]   ;;  %v5615_v56 = vld [vmem:[#allocation6 + $0x6a0] ss:$16 sps:$4 sm:$0xff]  }
 0x2ec   : > { %5927 = vtanh.f32 %v5068_v55  ;;  %v5062_v63 = vadd.f32 %v1681_v61, %v929_v36  ;;  %v5070_v0 = vadd.f32 %v1787_v62, %v937_v37  ;;  %v1683_v1 = vpop.f32.mrb[14].mxu0  ;;  %v1789_v2 = vpop.f32.mrb[14].mxu1  ;;  %v5620_v55 = vld [vmem:[#allocation6 + $0x6ac] ss:$16 sps:$4 sm:$0xff]   ;;  %v5618_v58 = vld [vmem:[#allocation6 + $0x6a8] ss:$16 sps:$4 sm:$0xff]  }
 0x2ed   : > { %5929 = vtanh.f32 %v5061_v59  ;;  %v5063_v3 = vadd.f32 %v1683_v1, %v925_v34  ;;  %v1685_v4 = vpop.f32.mrb[15].mxu0  ;;  %v1791_v5 = vpop.f32.mrb[15].mxu1  ;;  %v5071_v6 = vadd.f32 %v1789_v2, %v933_v35  ;;  %v5602_v34 = vld [vmem:[#allocation6 + $0x64c] ss:$16 sps:$4 sm:$0xff]   ;;  %v5623_v59 = vld [vmem:[#allocation6 + $0x6c4] ss:$16 sps:$4 sm:$0xff]  }
 0x2ee   : > { %5931 = vtanh.f32 %v5069_v60  ;;  %v5064_v8 = vadd.f32 %v1685_v4, %v929_v36  ;;  %v5072_v10 = vadd.f32 %v1791_v5, %v937_v37  ;;  %v5626_v60 = vld [vmem:[#allocation6 + $0x6cc] ss:$16 sps:$4 sm:$0xff]   ;;  %v5621_v61 = vld [vmem:[#allocation6 + $0x6c0] ss:$16 sps:$4 sm:$0xff]   ;;  %v5624_v62 = vld [vmem:[#allocation6 + $0x6c8] ss:$16 sps:$4 sm:$0xff]  }
 0x2ef   : > { %v5914_v7 = vpop.eup %5913  ;;  %5933 = vtanh.f32 %v5062_v63  ;;  %v5629_v63 = vld [vmem:[#allocation6 + $0x6e4] ss:$16 sps:$4 sm:$0xff]   ;;  %v5627_v1 = vld [vmem:[#allocation6 + $0x6e0] ss:$16 sps:$4 sm:$0xff]   ;;  %v5630_v2 = vld [vmem:[#allocation6 + $0x6e8] ss:$16 sps:$4 sm:$0xff]  }
 0x2f0   : > { %v5916_v9 = vpop.eup %5915  ;;  %5935 = vtanh.f32 %v5070_v0  ;;  %v5632_v0 = vld [vmem:[#allocation6 + $0x6ec] ss:$16 sps:$4 sm:$0xff]   ;;  %v5633_v5 = vld [vmem:[#allocation6 + $0x700] ss:$16 sps:$4 sm:$0xff]  }
 0x2f1   : > { %v5918_v11 = vpop.eup %5917  ;;  %5937 = vtanh.f32 %v5063_v3  ;;  %v5635_v3 = vld [vmem:[#allocation6 + $0x704] ss:$16 sps:$4 sm:$0xff]   ;;  %v5638_v4 = vld [vmem:[#allocation6 + $0x70c] ss:$16 sps:$4 sm:$0xff]  }
 0x2f2   : > { %v5920_v12 = vpop.eup %5919  ;;  %5939 = vtanh.f32 %v5071_v6  ;;  %v5636_v6 = vld [vmem:[#allocation6 + $0x708] ss:$16 sps:$4 sm:$0xff]  }
 0x2f3   : > { %v5922_v13 = vpop.eup %5921  ;;  %5941 = vtanh.f32 %v5064_v8  ;;  %v5644_v8 = vld [vmem:[#allocation6 + $0x72c] ss:$16 sps:$4 sm:$0xff]  }
 0x2f4   : > { %v5924_v14 = vpop.eup %5923  ;;  %5943 = vtanh.f32 %v5072_v10  ;;  %v1810_v15 = vpack.c.bf16 %v5922_v13, %v5914_v7  ;;  %v5641_v7 = vld [vmem:[#allocation6 + $0x724] ss:$16 sps:$4 sm:$0xff]   ;;  %v5642_v10 = vld [vmem:[#allocation6 + $0x728] ss:$16 sps:$4 sm:$0xff]   ;;  %v5645_v13 = vld [vmem:[#allocation6 + $0x740] ss:$16 sps:$4 sm:$0xff]  }
 0x2f5   : > { %v5926_v16 = vpop.eup %5925  ;;  %v6576_v17 = vpack.c.bf16 %v5924_v14, %v5916_v9  ;;  %v5639_v9 = vld [vmem:[#allocation6 + $0x720] ss:$16 sps:$4 sm:$0xff]   ;;  %v5648_v14 = vld [vmem:[#allocation6 + $0x748] ss:$16 sps:$4 sm:$0xff]  }
 0x2f6   : > { %v5928_v18 = vpop.eup %5927  ;;  %v1811_v19 = vpack.c.bf16 %v5926_v16, %v5918_v11  ;;  %v5647_v11 = vld [vmem:[#allocation6 + $0x744] ss:$16 sps:$4 sm:$0xff]   ;;  %v5656_v16 = vld [vmem:[#allocation6 + $0x76c] ss:$16 sps:$4 sm:$0xff]  }
 0x2f7   : > { %v5930_v22 = vpop.eup %5929  ;;  %v1813_v26 = vpack.c.bf16 %v5928_v18, %v5920_v12  ;;  %v5650_v12 = vld [vmem:[#allocation6 + $0x74c] ss:$16 sps:$4 sm:$0xff]   ;;  %v5651_v18 = vld [vmem:[#allocation6 + $0x760] ss:$16 sps:$4 sm:$0xff]  }
 0x2f8   : > { %v5932_v27 = vpop.eup %5931  ;;  %2642 = vmatprep.mubr.bf16.mxu0 %v1811_v19  ;;  %2748 = vmatprep.mubr.bf16.mxu1 %v1811_v19  ;;  %v5654_v19 = vld [vmem:[#allocation6 + $0x768] ss:$16 sps:$4 sm:$0xff]  }
 0x2f9   : > { %v5934_v28 = vpop.eup %5933  ;;  %2643 = vmatmul.mubr.bf16.vlgmr.msra.gmra.mrb[16].mxu0 %v1810_v15  ;;  %2749 = vmatmul.mubr.bf16.vlgmr.msra.gmra.mrb[16].mxu1 %v1810_v15  ;;  %v5653_v15 = vld [vmem:[#allocation6 + $0x764] ss:$16 sps:$4 sm:$0xff]  }
 0x2fa   : > { %v5936_v29 = vpop.eup %5935  ;;  %2664 = vmatpush1.bf16.msra.mxu0 %v5585_v20  ;;  %2770 = vmatpush1.bf16.msra.mxu1 %v5588_v21  ;;  %v5659_v20 = vld [vmem:[#allocation6 + $0x784] ss:$16 sps:$4 sm:$0xff]   ;;  %v5662_v21 = vld [vmem:[#allocation6 + $0x78c] ss:$16 sps:$4 sm:$0xff]  }
 0x2fb   : > { %v5938_v32 = vpop.eup %5937  ;;  %2665 = vmatprep.subr.bf16.mxu0 %v5593_v23  ;;  %2771 = vmatprep.subr.bf16.mxu1 %v5596_v25  ;;  %v5660_v23 = vld [vmem:[#allocation6 + $0x788] ss:$16 sps:$4 sm:$0xff]   ;;  %v5665_v25 = vld [vmem:[#allocation6 + $0x7a4] ss:$16 sps:$4 sm:$0xff]  }
 0x2fc   : > { %v5940_v35 = vpop.eup %5939  ;;  %v1814_v36 = vpack.c.bf16 %v5938_v32, %v5930_v22  ;;  %v5657_v22 = vld [vmem:[#allocation6 + $0x780] ss:$16 sps:$4 sm:$0xff]   ;;  %v5672_v32 = vld [vmem:[#allocation6 + $0x7c8] ss:$16 sps:$4 sm:$0xff]  }
 0x2fd   : > { %v5942_v37 = vpop.eup %5941  ;;  %v6578_v38 = vpack.c.bf16 %v5940_v35, %v5932_v27  ;;  %v5663_v27 = vld [vmem:[#allocation6 + $0x7a0] ss:$16 sps:$4 sm:$0xff]  }
 0x2fe   : > { %v5944_v40 = vpop.eup %5943  ;;  %2666 = vmatpush1.bf16.msra.mxu0 %v5591_v30  ;;  %2772 = vmatpush1.bf16.msra.mxu1 %v5594_v31  ;;  %v1815_v24 = vpack.c.bf16 %v5942_v37, %v5934_v28  ;;  %v5666_v28 = vld [vmem:[#allocation6 + $0x7a8] ss:$16 sps:$4 sm:$0xff]   ;;  %v5674_v30 = vld [vmem:[#allocation6 + $0x7cc] ss:$16 sps:$4 sm:$0xff]   ;;  %v5669_v31 = vld [vmem:[#allocation6 + $0x7c0] ss:$16 sps:$4 sm:$0xff]  }
 0x2ff   : > { %2667 = vmatprep.subr.bf16.mxu0 %v5599_v33  ;;  %2773 = vmatprep.subr.bf16.mxu1 %v5602_v34  ;;  %v6580_v45 = vpack.c.bf16 %v5944_v40, %v5936_v29  ;;  %v5671_v29 = vld [vmem:[#allocation6 + $0x7c4] ss:$16 sps:$4 sm:$0xff]   ;;  %v5680_v34 = vld [vmem:[#allocation6 + $0x7ec] ss:$16 sps:$4 sm:$0xff]   ;;  %v5675_v35 = vld [vmem:[#allocation6 + $0x7e0] ss:$16 sps:$4 sm:$0xff]  }
 0x300   : > { %2652 = vmatprep.mubr.bf16.mxu0 %v1815_v24  ;;  %2758 = vmatprep.mubr.bf16.mxu1 %v1815_v24  ;;  %v5677_v33 = vld [vmem:[#allocation6 + $0x7e4] ss:$16 sps:$4 sm:$0xff]   ;;  %v5686_v40 = vld [vmem:[#allocation6 + $0x80c] ss:$16 sps:$4 sm:$0xff]   ;;  %v5681_v24 = vld [vmem:[#allocation6 + $0x800] ss:$16 sps:$4 sm:$0xff]  }
 0x301   : > { %2653 = vmatmul.mubr.bf16.gmra.mrb[20].mxu0 %v1814_v36  ;;  %2759 = vmatmul.mubr.bf16.gmra.mrb[20].mxu1 %v1814_v36  ;;  %v5678_v36 = vld [vmem:[#allocation6 + $0x7e8] ss:$16 sps:$4 sm:$0xff]   ;;  %v5683_v37 = vld [vmem:[#allocation6 + $0x804] ss:$16 sps:$4 sm:$0xff]  }
 0x302   : > { %2668 = vmatpush1.bf16.msra.mxu0 %v5597_v42  ;;  %2774 = vmatpush1.bf16.msra.mxu1 %v5600_v43  ;;  %v5684_v42 = vld [vmem:[#allocation6 + $0x808] ss:$16 sps:$4 sm:$0xff]   ;;  %v5689_v43 = vld [vmem:[#allocation6 + $0x824] ss:$16 sps:$4 sm:$0xff]  }
 0x303   : > { %2695 = vmatprep.mubr.bf16.mxu0 %v1813_v26  ;;  %2801 = vmatprep.mubr.bf16.mxu1 %v1813_v26  ;;  %v5668_v26 = vld [vmem:[#allocation6 + $0x7ac] ss:$16 sps:$4 sm:$0xff]  }
 0x304   : > { %2669 = vmatprep.subr.bf16.mxu0 %v5605_v46  ;;  %2775 = vmatprep.subr.bf16.mxu1 %v5608_v47  ;;  %v5692_v46 = vld [vmem:[#allocation6 + $0x82c] ss:$16 sps:$4 sm:$0xff]   ;;  %v5687_v47 = vld [vmem:[#allocation6 + $0x820] ss:$16 sps:$4 sm:$0xff]  }
 0x306   : > { %2670 = vmatpush1.bf16.msra.mxu0 %v5603_v48  ;;  %2776 = vmatpush1.bf16.msra.mxu1 %v5606_v49  ;;  %v5690_v48 = vld [vmem:[#allocation6 + $0x828] ss:$16 sps:$4 sm:$0xff]   ;;  %v5695_v49 = vld [vmem:[#allocation6 + $0x844] ss:$16 sps:$4 sm:$0xff]  }
 0x307   : > { %2671 = vmatprep.subr.bf16.mxu0 %v5611_v50  ;;  %2777 = vmatprep.subr.bf16.mxu1 %v5614_v51  ;;  %v5698_v50 = vld [vmem:[#allocation6 + $0x84c] ss:$16 sps:$4 sm:$0xff]   ;;  %v5693_v51 = vld [vmem:[#allocation6 + $0x840] ss:$16 sps:$4 sm:$0xff]  }
 0x30a   : > { %2672 = vmatpush1.bf16.msra.mxu0 %v5609_v44  ;;  %2778 = vmatpush1.bf16.msra.mxu1 %v5612_v52  ;;  %v5696_v44 = vld [vmem:[#allocation6 + $0x848] ss:$16 sps:$4 sm:$0xff]   ;;  %v5701_v52 = vld [vmem:[#allocation6 + $0x864] ss:$16 sps:$4 sm:$0xff]  }
 0x30b   : > { %2673 = vmatprep.subr.bf16.mxu0 %v5617_v54  ;;  %2779 = vmatprep.subr.bf16.mxu1 %v5620_v55  ;;  %v5702_v54 = vld [vmem:[#allocation6 + $0x868] ss:$16 sps:$4 sm:$0xff]   ;;  %v5707_v55 = vld [vmem:[#allocation6 + $0x884] ss:$16 sps:$4 sm:$0xff]  }
 0x30e   : > { %2674 = vmatpush1.bf16.msra.mxu0 %v5615_v56  ;;  %2780 = vmatpush1.bf16.msra.mxu1 %v5618_v58  ;;  %v5710_v56 = vld [vmem:[#allocation6 + $0x88c] ss:$16 sps:$4 sm:$0xff]   ;;  %v5705_v58 = vld [vmem:[#allocation6 + $0x880] ss:$16 sps:$4 sm:$0xff]  }
 0x30f   : > { %2675 = vmatprep.subr.bf16.mxu0 %v5623_v59  ;;  %2781 = vmatprep.subr.bf16.mxu1 %v5626_v60  ;;  %v5708_v59 = vld [vmem:[#allocation6 + $0x888] ss:$16 sps:$4 sm:$0xff]   ;;  %v5713_v60 = vld [vmem:[#allocation6 + $0x8a4] ss:$16 sps:$4 sm:$0xff]  }
 0x312   : > { %2676 = vmatpush1.bf16.msra.mxu0 %v5621_v61  ;;  %2782 = vmatpush1.bf16.msra.mxu1 %v5624_v62  ;;  %v5716_v61 = vld [vmem:[#allocation6 + $0x8ac] ss:$16 sps:$4 sm:$0xff]   ;;  %v5711_v62 = vld [vmem:[#allocation6 + $0x8a0] ss:$16 sps:$4 sm:$0xff]  }
 0x313   : > { %2677 = vmatprep.subr.bf16.mxu0 %v5629_v63  ;;  %2783 = vmatprep.subr.bf16.mxu1 %v5632_v0  ;;  %v5719_v63 = vld [vmem:[#allocation6 + $0x8c4] ss:$16 sps:$4 sm:$0xff]   ;;  %v5722_v0 = vld [vmem:[#allocation6 + $0x8cc] ss:$16 sps:$4 sm:$0xff]  }
 0x316   : > { %2678 = vmatpush1.bf16.msra.mxu0 %v5627_v1  ;;  %2784 = vmatpush1.bf16.msra.mxu1 %v5630_v2  ;;  %v5717_v1 = vld [vmem:[#allocation6 + $0x8c0] ss:$16 sps:$4 sm:$0xff]   ;;  %v5720_v2 = vld [vmem:[#allocation6 + $0x8c8] ss:$16 sps:$4 sm:$0xff]  }
 0x317   : > { %2679 = vmatprep.subr.bf16.mxu0 %v5635_v3  ;;  %2785 = vmatprep.subr.bf16.mxu1 %v5638_v4  ;;  %v5725_v3 = vld [vmem:[#allocation6 + $0x8e4] ss:$16 sps:$4 sm:$0xff]   ;;  %v5728_v4 = vld [vmem:[#allocation6 + $0x8ec] ss:$16 sps:$4 sm:$0xff]  }
 0x31a   : > { %2680 = vmatpush1.bf16.msra.mxu0 %v5633_v5  ;;  %2786 = vmatpush1.bf16.msra.mxu1 %v5636_v6  ;;  %v5723_v5 = vld [vmem:[#allocation6 + $0x8e0] ss:$16 sps:$4 sm:$0xff]   ;;  %v5726_v6 = vld [vmem:[#allocation6 + $0x8e8] ss:$16 sps:$4 sm:$0xff]  }
 0x31b   : > { %2681 = vmatprep.subr.bf16.mxu0 %v5641_v7  ;;  %2787 = vmatprep.subr.bf16.mxu1 %v5644_v8  ;;  %v5731_v7 = vld [vmem:[#allocation6 + $0x904] ss:$16 sps:$4 sm:$0xff]   ;;  %v5734_v8 = vld [vmem:[#allocation6 + $0x90c] ss:$16 sps:$4 sm:$0xff]  }
 0x31e   : > { %2682 = vmatpush1.bf16.msra.mxu0 %v5639_v9  ;;  %2788 = vmatpush1.bf16.msra.mxu1 %v5642_v10  ;;  %v5729_v9 = vld [vmem:[#allocation6 + $0x900] ss:$16 sps:$4 sm:$0xff]   ;;  %v5732_v10 = vld [vmem:[#allocation6 + $0x908] ss:$16 sps:$4 sm:$0xff]  }
 0x31f   : > { %2683 = vmatprep.subr.bf16.mxu0 %v5647_v11  ;;  %2789 = vmatprep.subr.bf16.mxu1 %v5650_v12  ;;  %v5737_v11 = vld [vmem:[#allocation6 + $0x924] ss:$16 sps:$4 sm:$0xff]   ;;  %v5740_v12 = vld [vmem:[#allocation6 + $0x92c] ss:$16 sps:$4 sm:$0xff]  }
 0x322   : > { %2684 = vmatpush1.bf16.msra.mxu0 %v5645_v13  ;;  %2790 = vmatpush1.bf16.msra.mxu1 %v5648_v14  ;;  %v5735_v13 = vld [vmem:[#allocation6 + $0x920] ss:$16 sps:$4 sm:$0xff]   ;;  %v5738_v14 = vld [vmem:[#allocation6 + $0x928] ss:$16 sps:$4 sm:$0xff]  }
 0x323   : > { %2685 = vmatprep.subr.bf16.mxu0 %v5653_v15  ;;  %2791 = vmatprep.subr.bf16.mxu1 %v5656_v16  ;;  %v5743_v15 = vld [vmem:[#allocation6 + $0x944] ss:$16 sps:$4 sm:$0xff]   ;;  %v5746_v16 = vld [vmem:[#allocation6 + $0x94c] ss:$16 sps:$4 sm:$0xff]  }
 0x326   : > { %2686 = vmatpush1.bf16.msra.mxu0 %v5651_v18  ;;  %2792 = vmatpush1.bf16.msra.mxu1 %v5654_v19  ;;  %v5741_v18 = vld [vmem:[#allocation6 + $0x940] ss:$16 sps:$4 sm:$0xff]   ;;  %v5744_v19 = vld [vmem:[#allocation6 + $0x948] ss:$16 sps:$4 sm:$0xff]  }
 0x327   : > { %2687 = vmatprep.subr.bf16.mxu0 %v5659_v20  ;;  %2793 = vmatprep.subr.bf16.mxu1 %v5662_v21  ;;  %v5749_v20 = vld [vmem:[#allocation6 + $0x964] ss:$16 sps:$4 sm:$0xff]   ;;  %v5752_v21 = vld [vmem:[#allocation6 + $0x96c] ss:$16 sps:$4 sm:$0xff]  }
 0x32a   : > { %2688 = vmatpush1.bf16.msra.mxu0 %v5657_v22  ;;  %2794 = vmatpush1.bf16.msra.mxu1 %v5660_v23  ;;  %v5747_v22 = vld [vmem:[#allocation6 + $0x960] ss:$16 sps:$4 sm:$0xff]   ;;  %v5750_v23 = vld [vmem:[#allocation6 + $0x968] ss:$16 sps:$4 sm:$0xff]  }
 0x32b   : > { %2689 = vmatprep.subr.bf16.mxu0 %v5665_v25  ;;  %2795 = vmatprep.subr.bf16.mxu1 %v5668_v26  ;;  %v5755_v25 = vld [vmem:[#allocation6 + $0x984] ss:$16 sps:$4 sm:$0xff]   ;;  %v5758_v26 = vld [vmem:[#allocation6 + $0x98c] ss:$16 sps:$4 sm:$0xff]  }
 0x32e   : > { %2690 = vmatpush1.bf16.msra.mxu0 %v5663_v27  ;;  %2796 = vmatpush1.bf16.msra.mxu1 %v5666_v28  ;;  %v5753_v27 = vld [vmem:[#allocation6 + $0x980] ss:$16 sps:$4 sm:$0xff]   ;;  %v5756_v28 = vld [vmem:[#allocation6 + $0x988] ss:$16 sps:$4 sm:$0xff]  }
 0x32f   : > { %2691 = vmatprep.subr.bf16.mxu0 %v5671_v29  ;;  %2797 = vmatprep.subr.bf16.mxu1 %v5674_v30  ;;  %v5761_v29 = vld [vmem:[#allocation6 + $0x9a4] ss:$16 sps:$4 sm:$0xff]   ;;  %v5764_v30 = vld [vmem:[#allocation6 + $0x9ac] ss:$16 sps:$4 sm:$0xff]  }
 0x332   : > { %2692 = vmatpush1.bf16.msra.mxu0 %v5669_v31  ;;  %2798 = vmatpush1.bf16.msra.mxu1 %v5672_v32  ;;  %v5759_v31 = vld [vmem:[#allocation6 + $0x9a0] ss:$16 sps:$4 sm:$0xff]   ;;  %v5762_v32 = vld [vmem:[#allocation6 + $0x9a8] ss:$16 sps:$4 sm:$0xff]  }
 0x333   : > { %2693 = vmatprep.subr.bf16.mxu0 %v5677_v33  ;;  %2799 = vmatprep.subr.bf16.mxu1 %v5680_v34  ;;  %v5767_v33 = vld [vmem:[#allocation6 + $0x9c4] ss:$16 sps:$4 sm:$0xff]   ;;  %v5770_v34 = vld [vmem:[#allocation6 + $0x9cc] ss:$16 sps:$4 sm:$0xff]  }
 0x336   : > { %2694 = vmatpush1.bf16.msra.mxu0 %v5675_v35  ;;  %2800 = vmatpush1.bf16.msra.mxu1 %v5678_v36  ;;  %v5765_v35 = vld [vmem:[#allocation6 + $0x9c0] ss:$16 sps:$4 sm:$0xff]   ;;  %v5768_v36 = vld [vmem:[#allocation6 + $0x9c8] ss:$16 sps:$4 sm:$0xff]  }
 0x337   : > { %3638 = vmatprep.subr.bf16.mxu0 %v5683_v37  ;;  %3744 = vmatprep.subr.bf16.mxu1 %v5686_v40  ;;  %v5773_v37 = vld [vmem:[#allocation6 + $0x9e4] ss:$16 sps:$4 sm:$0xff]   ;;  %v5776_v40 = vld [vmem:[#allocation6 + $0x9ec] ss:$16 sps:$4 sm:$0xff]  }
 0x339   : > { %2696 = vmatmul.mubr.bf16.vlgmr.msra.gmra.mrb[16].mxu0 %v6576_v17  ;;  %2802 = vmatmul.mubr.bf16.vlgmr.msra.gmra.mrb[16].mxu1 %v6576_v17  ;;  %v5704_v17 = vld [vmem:[#allocation6 + $0x86c] ss:$16 sps:$4 sm:$0xff]  }
 0x33a   : > { %2705 = vmatprep.mubr.bf16.mxu0 %v6580_v45  ;;  %2811 = vmatprep.mubr.bf16.mxu1 %v6580_v45  ;;  %v5699_v45 = vld [vmem:[#allocation6 + $0x860] ss:$16 sps:$4 sm:$0xff]  }
 0x33b   : > { %3639 = vmatpush1.bf16.msra.mxu0 %v5681_v24  ;;  %3745 = vmatpush1.bf16.msra.mxu1 %v5684_v42  ;;  %v5771_v24 = vld [vmem:[#allocation6 + $0x9e0] ss:$16 sps:$4 sm:$0xff]   ;;  %v5774_v42 = vld [vmem:[#allocation6 + $0x9e8] ss:$16 sps:$4 sm:$0xff]  }
 0x33c   : > { %3640 = vmatprep.subr.bf16.mxu0 %v5689_v43  ;;  %3746 = vmatprep.subr.bf16.mxu1 %v5692_v46  ;;  %v5779_v43 = vld [vmem:[#allocation6 + $0xa04] ss:$16 sps:$4 sm:$0xff]   ;;  %v5782_v46 = vld [vmem:[#allocation6 + $0xa0c] ss:$16 sps:$4 sm:$0xff]  }
 0x33f   : > { %3641 = vmatpush1.bf16.msra.mxu0 %v5687_v47  ;;  %3747 = vmatpush1.bf16.msra.mxu1 %v5690_v48  ;;  %v1948_v47 = vld [vmem:[#allocation7 + $0x4] sm:$0xf] }
 0x340   : > { %3642 = vmatprep.subr.bf16.mxu0 %v5695_v49  ;;  %3748 = vmatprep.subr.bf16.mxu1 %v5698_v50  ;;  %v1953_v48 = vrot.slane %v1948_v47, %v6548_v39  ;;  %v1961_v49 = vrot.slane %v1948_v47, %v6554_v53  ;;  %v1957_v50 = vrot.slane %v1948_v47, %v6550_v41 }
 0x341   : > { %2706 = vmatmul.mubr.bf16.gmra.mrb[20].mxu0 %v6578_v38  ;;  %2812 = vmatmul.mubr.bf16.gmra.mrb[20].mxu1 %v6578_v38  ;;  %v5714_v38 = vld [vmem:[#allocation6 + $0x8a8] ss:$16 sps:$4 sm:$0xff]  }
 0x343   : > { %3643 = vmatpush1.bf16.msra.mxu0 %v5693_v51  ;;  %3749 = vmatpush1.bf16.msra.mxu1 %v5696_v44  ;;  %v1965_v51 = vrot.slane %v1948_v47, %v6556_v57  ;;  %v5791_v47 = vld [vmem:[#allocation6 + $0xa44] ss:$16 sps:$4 sm:$0xff]  }
 0x344   : > { %3644 = vmatprep.subr.bf16.mxu0 %v5701_v52  ;;  %3750 = vmatprep.subr.bf16.mxu1 %v5704_v17 }
 0x347   : > { %3645 = vmatpush1.bf16.msra.mxu0 %v5699_v45  ;;  %3751 = vmatpush1.bf16.msra.mxu1 %v5702_v54 }
 0x348   : > { %3646 = vmatprep.subr.bf16.mxu0 %v5707_v55  ;;  %3752 = vmatprep.subr.bf16.mxu1 %v5710_v56 }
 0x34b   : > { %3647 = vmatpush1.bf16.msra.mxu0 %v5705_v58  ;;  %3753 = vmatpush1.bf16.msra.mxu1 %v5708_v59 }
 0x34c   : > { %3648 = vmatprep.subr.bf16.mxu0 %v5713_v60  ;;  %3754 = vmatprep.subr.bf16.mxu1 %v5716_v61 }
 0x34f   : > { %3649 = vmatpush1.bf16.msra.mxu0 %v5711_v62  ;;  %3755 = vmatpush1.bf16.msra.mxu1 %v5714_v38 }
 0x350   : > { %3650 = vmatprep.subr.bf16.mxu0 %v5719_v63  ;;  %3756 = vmatprep.subr.bf16.mxu1 %v5722_v0 }
 0x353   : > { %3651 = vmatpush1.bf16.msra.mxu0 %v5717_v1  ;;  %3757 = vmatpush1.bf16.msra.mxu1 %v5720_v2 }
 0x354   : > { %3652 = vmatprep.subr.bf16.mxu0 %v5725_v3  ;;  %3758 = vmatprep.subr.bf16.mxu1 %v5728_v4 }
 0x357   : > { %3653 = vmatpush1.bf16.msra.mxu0 %v5723_v5  ;;  %3759 = vmatpush1.bf16.msra.mxu1 %v5726_v6 }
 0x358   : > { %3654 = vmatprep.subr.bf16.mxu0 %v5731_v7  ;;  %3760 = vmatprep.subr.bf16.mxu1 %v5734_v8 }
 0x35b   : > { %3655 = vmatpush1.bf16.msra.mxu0 %v5729_v9  ;;  %3761 = vmatpush1.bf16.msra.mxu1 %v5732_v10 }
 0x35c   : > { %3656 = vmatprep.subr.bf16.mxu0 %v5737_v11  ;;  %3762 = vmatprep.subr.bf16.mxu1 %v5740_v12 }
 0x35f   : > { %3657 = vmatpush1.bf16.msra.mxu0 %v5735_v13  ;;  %3763 = vmatpush1.bf16.msra.mxu1 %v5738_v14 }
 0x360   : > { %3658 = vmatprep.subr.bf16.mxu0 %v5743_v15  ;;  %3764 = vmatprep.subr.bf16.mxu1 %v5746_v16 }
 0x363   : > { %3659 = vmatpush1.bf16.msra.mxu0 %v5741_v18  ;;  %3765 = vmatpush1.bf16.msra.mxu1 %v5744_v19 }
 0x364   : > { %3660 = vmatprep.subr.bf16.mxu0 %v5749_v20  ;;  %3766 = vmatprep.subr.bf16.mxu1 %v5752_v21 }
 0x367   : > { %3661 = vmatpush1.bf16.msra.mxu0 %v5747_v22  ;;  %3767 = vmatpush1.bf16.msra.mxu1 %v5750_v23 }
 0x368   : > { %3662 = vmatprep.subr.bf16.mxu0 %v5755_v25  ;;  %3768 = vmatprep.subr.bf16.mxu1 %v5758_v26 }
 0x36b   : > { %3663 = vmatpush1.bf16.msra.mxu0 %v5753_v27  ;;  %3769 = vmatpush1.bf16.msra.mxu1 %v5756_v28 }
 0x36c   : > { %3664 = vmatprep.subr.bf16.mxu0 %v5761_v29  ;;  %3770 = vmatprep.subr.bf16.mxu1 %v5764_v30 }
 0x36f   : > { %3665 = vmatpush1.bf16.msra.mxu0 %v5759_v31  ;;  %3771 = vmatpush1.bf16.msra.mxu1 %v5762_v32  ;;  %v5777_v31 = vld [vmem:[#allocation6 + $0xa00] ss:$16 sps:$4 sm:$0xff]   ;;  %v5780_v32 = vld [vmem:[#allocation6 + $0xa08] ss:$16 sps:$4 sm:$0xff]  }
 0x370   : > { %3666 = vmatprep.subr.bf16.mxu0 %v5767_v33  ;;  %3772 = vmatprep.subr.bf16.mxu1 %v5770_v34  ;;  %v5785_v34 = vld [vmem:[#allocation6 + $0xa24] ss:$16 sps:$4 sm:$0xff]  }
 0x373   : > { %3667 = vmatpush1.bf16.msra.mxu0 %v5765_v35  ;;  %3773 = vmatpush1.bf16.msra.mxu1 %v5768_v36  ;;  %v5788_v35 = vld [vmem:[#allocation6 + $0xa2c] ss:$16 sps:$4 sm:$0xff]  }
 0x374   : > { %3668 = vmatprep.subr.bf16.mxu0 %v5773_v37  ;;  %3774 = vmatprep.subr.bf16.mxu1 %v5776_v40 }
 0x377   : > { %3669 = vmatpush1.bf16.msra.mxu0 %v5771_v24  ;;  %3775 = vmatpush1.bf16.msra.mxu1 %v5774_v42  ;;  %v5783_v42 = vld [vmem:[#allocation6 + $0xa20] ss:$16 sps:$4 sm:$0xff]  }
 0x378   : > { %3691 = vmatprep.subr.bf16.mxu0 %v5779_v43  ;;  %3797 = vmatprep.subr.bf16.mxu1 %v5782_v46  ;;  %v5786_v43 = vld [vmem:[#allocation6 + $0xa28] ss:$16 sps:$4 sm:$0xff]  }
 0x40c   : > { %v2697_v44 = vpop.f32.mrb[16].mxu0  ;;  %v2803_v52 = vpop.f32.mrb[16].mxu1 }
 0x40d   : > { %v5073_v17 = vadd.f32 %v2697_v44, %v1953_v48  ;;  %v5081_v45 = vadd.f32 %v2803_v52, %v1961_v49  ;;  %v2699_v54 = vpop.f32.mrb[17].mxu0  ;;  %v2805_v55 = vpop.f32.mrb[17].mxu1 }
 0x40e   : > { %v5074_v56 = vadd.f32 %v2699_v54, %v1957_v50  ;;  %v5082_v58 = vadd.f32 %v2805_v55, %v1965_v51  ;;  %v2701_v59 = vpop.f32.mrb[18].mxu0  ;;  %v2807_v60 = vpop.f32.mrb[18].mxu1  ;;  %v5792_v54 = vld [vmem:[#allocation6 + $0xa48] ss:$16 sps:$4 sm:$0xff]  }
 0x40f   : > { %5945 = vtanh.f32 %v5073_v17  ;;  %v5075_v61 = vadd.f32 %v2701_v59, %v1953_v48  ;;  %v2703_v62 = vpop.f32.mrb[19].mxu0  ;;  %v2809_v38 = vpop.f32.mrb[19].mxu1  ;;  %v5083_v63 = vadd.f32 %v2807_v60, %v1961_v49  ;;  %v5795_v59 = vld [vmem:[#allocation6 + $0xa60] ss:$16 sps:$4 sm:$0xff]   ;;  %v5798_v60 = vld [vmem:[#allocation6 + $0xa68] ss:$16 sps:$4 sm:$0xff]  }
 0x410   : > { %5947 = vtanh.f32 %v5081_v45  ;;  %v5076_v0 = vadd.f32 %v2703_v62, %v1957_v50  ;;  %v5084_v1 = vadd.f32 %v2809_v38, %v1965_v51  ;;  %v5789_v45 = vld [vmem:[#allocation6 + $0xa40] ss:$16 sps:$4 sm:$0xff]   ;;  %v5806_v62 = vld [vmem:[#allocation6 + $0xa8c] ss:$16 sps:$4 sm:$0xff]  }
 0x411   : > { %5949 = vtanh.f32 %v5074_v56  ;;  %v5797_v56 = vld [vmem:[#allocation6 + $0xa64] ss:$16 sps:$4 sm:$0xff]   ;;  %v5801_v38 = vld [vmem:[#allocation6 + $0xa80] ss:$16 sps:$4 sm:$0xff]  }
 0x412   : > { %5951 = vtanh.f32 %v5082_v58  ;;  %v5800_v58 = vld [vmem:[#allocation6 + $0xa6c] ss:$16 sps:$4 sm:$0xff]  }
 0x413   : > { %5953 = vtanh.f32 %v5075_v61  ;;  %v5803_v61 = vld [vmem:[#allocation6 + $0xa84] ss:$16 sps:$4 sm:$0xff]  }
 0x414   : > { %5955 = vtanh.f32 %v5083_v63  ;;  %v2707_v2 = vpop.f32.mrb[20].mxu0  ;;  %v2813_v3 = vpop.f32.mrb[20].mxu1  ;;  %v5804_v63 = vld [vmem:[#allocation6 + $0xa88] ss:$16 sps:$4 sm:$0xff]  }
 0x415   : > { %5957 = vtanh.f32 %v5076_v0  ;;  %v5077_v4 = vadd.f32 %v2707_v2, %v1953_v48  ;;  %v5085_v5 = vadd.f32 %v2813_v3, %v1961_v49  ;;  %v2709_v6 = vpop.f32.mrb[21].mxu0  ;;  %v2815_v7 = vpop.f32.mrb[21].mxu1  ;;  %v5809_v0 = vld [vmem:[#allocation6 + $0xaa4] ss:$16 sps:$4 sm:$0xff]   ;;  %v5807_v2 = vld [vmem:[#allocation6 + $0xaa0] ss:$16 sps:$4 sm:$0xff]  }
 0x416   : > { %5959 = vtanh.f32 %v5084_v1  ;;  %v5078_v8 = vadd.f32 %v2709_v6, %v1957_v50  ;;  %v5086_v9 = vadd.f32 %v2815_v7, %v1965_v51  ;;  %v2711_v10 = vpop.f32.mrb[22].mxu0  ;;  %v2817_v11 = vpop.f32.mrb[22].mxu1  ;;  %v5812_v1 = vld [vmem:[#allocation6 + $0xaac] ss:$16 sps:$4 sm:$0xff]   ;;  %v5810_v3 = vld [vmem:[#allocation6 + $0xaa8] ss:$16 sps:$4 sm:$0xff]  }
 0x417   : > { %5961 = vtanh.f32 %v5077_v4  ;;  %v5079_v12 = vadd.f32 %v2711_v10, %v1953_v48  ;;  %v2713_v13 = vpop.f32.mrb[23].mxu0  ;;  %v2819_v14 = vpop.f32.mrb[23].mxu1  ;;  %v5087_v15 = vadd.f32 %v2817_v11, %v1961_v49  ;;  %v5794_v48 = vld [vmem:[#allocation6 + $0xa4c] ss:$16 sps:$4 sm:$0xff]   ;;  %v5815_v4 = vld [vmem:[#allocation6 + $0xac4] ss:$16 sps:$4 sm:$0xff]  }
 0x418   : > { %5963 = vtanh.f32 %v5085_v5  ;;  %v5080_v18 = vadd.f32 %v2713_v13, %v1957_v50  ;;  %v5088_v20 = vadd.f32 %v2819_v14, %v1965_v51  ;;  %v5818_v5 = vld [vmem:[#allocation6 + $0xacc] ss:$16 sps:$4 sm:$0xff]   ;;  %v5813_v6 = vld [vmem:[#allocation6 + $0xac0] ss:$16 sps:$4 sm:$0xff]   ;;  %v5816_v7 = vld [vmem:[#allocation6 + $0xac8] ss:$16 sps:$4 sm:$0xff]  }
 0x419   : > { %v5946_v16 = vpop.eup %5945  ;;  %5965 = vtanh.f32 %v5078_v8  ;;  %v5821_v8 = vld [vmem:[#allocation6 + $0xae4] ss:$16 sps:$4 sm:$0xff]   ;;  %v5819_v10 = vld [vmem:[#allocation6 + $0xae0] ss:$16 sps:$4 sm:$0xff]   ;;  %v5822_v11 = vld [vmem:[#allocation6 + $0xae8] ss:$16 sps:$4 sm:$0xff]  }
 0x41a   : > { %v5948_v19 = vpop.eup %5947  ;;  %5967 = vtanh.f32 %v5086_v9  ;;  %v5824_v9 = vld [vmem:[#allocation6 + $0xaec] ss:$16 sps:$4 sm:$0xff]   ;;  %v5825_v14 = vld [vmem:[#allocation6 + $0xb00] ss:$16 sps:$4 sm:$0xff]  }
 0x41b   : > { %v5950_v21 = vpop.eup %5949  ;;  %5969 = vtanh.f32 %v5079_v12  ;;  %v5827_v12 = vld [vmem:[#allocation6 + $0xb04] ss:$16 sps:$4 sm:$0xff]   ;;  %v5830_v13 = vld [vmem:[#allocation6 + $0xb0c] ss:$16 sps:$4 sm:$0xff]  }
 0x41c   : > { %v5952_v22 = vpop.eup %5951  ;;  %5971 = vtanh.f32 %v5087_v15  ;;  %v5828_v15 = vld [vmem:[#allocation6 + $0xb08] ss:$16 sps:$4 sm:$0xff]  }
 0x41d   : > { %v5954_v23 = vpop.eup %5953  ;;  %5973 = vtanh.f32 %v5080_v18  ;;  %v5836_v18 = vld [vmem:[#allocation6 + $0xb2c] ss:$16 sps:$4 sm:$0xff]  }
 0x41e   : > { %v5956_v25 = vpop.eup %5955  ;;  %5975 = vtanh.f32 %v5088_v20  ;;  %v2838_v26 = vpack.c.bf16 %v5954_v23, %v5946_v16  ;;  %v5833_v16 = vld [vmem:[#allocation6 + $0xb24] ss:$16 sps:$4 sm:$0xff]   ;;  %v5834_v20 = vld [vmem:[#allocation6 + $0xb28] ss:$16 sps:$4 sm:$0xff]   ;;  %v5837_v23 = vld [vmem:[#allocation6 + $0xb40] ss:$16 sps:$4 sm:$0xff]  }
 0x41f   : > { %v5958_v27 = vpop.eup %5957  ;;  %v6592_v28 = vpack.c.bf16 %v5956_v25, %v5948_v19  ;;  %v5831_v19 = vld [vmem:[#allocation6 + $0xb20] ss:$16 sps:$4 sm:$0xff]   ;;  %v5840_v25 = vld [vmem:[#allocation6 + $0xb48] ss:$16 sps:$4 sm:$0xff]  }
 0x420   : > { %v5960_v29 = vpop.eup %5959  ;;  %v2839_v30 = vpack.c.bf16 %v5958_v27, %v5950_v21  ;;  %v5839_v21 = vld [vmem:[#allocation6 + $0xb44] ss:$16 sps:$4 sm:$0xff]   ;;  %v5848_v27 = vld [vmem:[#allocation6 + $0xb6c] ss:$16 sps:$4 sm:$0xff]  }
 0x421   : > { %v5962_v33 = vpop.eup %5961  ;;  %v2841_v36 = vpack.c.bf16 %v5960_v29, %v5952_v22  ;;  %v5842_v22 = vld [vmem:[#allocation6 + $0xb4c] ss:$16 sps:$4 sm:$0xff]   ;;  %v5843_v29 = vld [vmem:[#allocation6 + $0xb60] ss:$16 sps:$4 sm:$0xff]  }
 0x422   : > { %v5964_v37 = vpop.eup %5963  ;;  %3670 = vmatprep.mubr.bf16.mxu0 %v2839_v30  ;;  %3776 = vmatprep.mubr.bf16.mxu1 %v2839_v30  ;;  %v5846_v30 = vld [vmem:[#allocation6 + $0xb68] ss:$16 sps:$4 sm:$0xff]  }
 0x423   : > { %v5966_v40 = vpop.eup %5965  ;;  %3671 = vmatmul.mubr.bf16.vlgmr.msra.gmra.mrb[24].mxu0 %v2838_v26  ;;  %3777 = vmatmul.mubr.bf16.vlgmr.msra.gmra.mrb[24].mxu1 %v2838_v26  ;;  %v5845_v26 = vld [vmem:[#allocation6 + $0xb64] ss:$16 sps:$4 sm:$0xff]  }
 0x424   : > { %v5968_v24 = vpop.eup %5967  ;;  %3692 = vmatpush1.bf16.msra.mxu0 %v5777_v31  ;;  %3798 = vmatpush1.bf16.msra.mxu1 %v5780_v32  ;;  %v5851_v31 = vld [vmem:[#allocation6 + $0xb84] ss:$16 sps:$4 sm:$0xff]   ;;  %v5854_v32 = vld [vmem:[#allocation6 + $0xb8c] ss:$16 sps:$4 sm:$0xff]  }
 0x425   : > { %v5970_v46 = vpop.eup %5969  ;;  %3693 = vmatprep.subr.bf16.mxu0 %v5785_v34  ;;  %3799 = vmatprep.subr.bf16.mxu1 %v5788_v35  ;;  %v5852_v34 = vld [vmem:[#allocation6 + $0xb88] ss:$16 sps:$4 sm:$0xff]   ;;  %v5857_v35 = vld [vmem:[#allocation6 + $0xba4] ss:$16 sps:$4 sm:$0xff]  }
 0x426   : > { %v5972_v49 = vpop.eup %5971  ;;  %v2842_v50 = vpack.c.bf16 %v5970_v46, %v5962_v33  ;;  %v5849_v33 = vld [vmem:[#allocation6 + $0xb80] ss:$16 sps:$4 sm:$0xff]   ;;  %v5864_v46 = vld [vmem:[#allocation6 + $0xbc8] ss:$16 sps:$4 sm:$0xff]  }
 0x427   : > { %v5974_v51 = vpop.eup %5973  ;;  %v6594_v44 = vpack.c.bf16 %v5972_v49, %v5964_v37  ;;  %v5855_v37 = vld [vmem:[#allocation6 + $0xba0] ss:$16 sps:$4 sm:$0xff]  }
 0x428   : > { %v5976_v52 = vpop.eup %5975  ;;  %3694 = vmatpush1.bf16.msra.mxu0 %v5783_v42  ;;  %3800 = vmatpush1.bf16.msra.mxu1 %v5786_v43  ;;  %v2843_v17 = vpack.c.bf16 %v5974_v51, %v5966_v40  ;;  %v5858_v40 = vld [vmem:[#allocation6 + $0xba8] ss:$16 sps:$4 sm:$0xff]   ;;  %v5866_v42 = vld [vmem:[#allocation6 + $0xbcc] ss:$16 sps:$4 sm:$0xff]   ;;  %v5861_v43 = vld [vmem:[#allocation6 + $0xbc0] ss:$16 sps:$4 sm:$0xff]  }
 0x429   : > { %3695 = vmatprep.subr.bf16.mxu0 %v5791_v47  ;;  %3801 = vmatprep.subr.bf16.mxu1 %v5794_v48  ;;  %v6596_v55 = vpack.c.bf16 %v5976_v52, %v5968_v24  ;;  %v5863_v24 = vld [vmem:[#allocation6 + $0xbc4] ss:$16 sps:$4 sm:$0xff]   ;;  %v5872_v48 = vld [vmem:[#allocation6 + $0xbec] ss:$16 sps:$4 sm:$0xff]   ;;  %v5867_v49 = vld [vmem:[#allocation6 + $0xbe0] ss:$16 sps:$4 sm:$0xff]  }
 0x42a   : > { %3680 = vmatprep.mubr.bf16.mxu0 %v2843_v17  ;;  %3786 = vmatprep.mubr.bf16.mxu1 %v2843_v17  ;;  %v5869_v47 = vld [vmem:[#allocation6 + $0xbe4] ss:$16 sps:$4 sm:$0xff]   ;;  %v5873_v51 = vld [vmem:[#allocation9 + $0x40] sm:$0xff]  }
 0x42b   : > { %3681 = vmatmul.mubr.bf16.gmra.mrb[28].mxu0 %v2842_v50  ;;  %3787 = vmatmul.mubr.bf16.gmra.mrb[28].mxu1 %v2842_v50  ;;  %v5870_v50 = vld [vmem:[#allocation6 + $0xbe8] ss:$16 sps:$4 sm:$0xff]   ;;  %v5874_v52 = vld [vmem:[#allocation9 + $0xc0] sm:$0xff]  }
 0x42c   : > { %3696 = vmatpush1.bf16.msra.mxu0 %v5789_v45  ;;  %3802 = vmatpush1.bf16.msra.mxu1 %v5792_v54  ;;  %v5875_v17 = vld [vmem:[#allocation9] sm:$0xff]   ;;  %v5877_v54 = vld [vmem:[#allocation9 + $0x48] sm:$0xff]  }
 0x42d   : > { %3723 = vmatprep.mubr.bf16.mxu0 %v2841_v36  ;;  %3829 = vmatprep.mubr.bf16.mxu1 %v2841_v36  ;;  %v5860_v36 = vld [vmem:[#allocation6 + $0xbac] ss:$16 sps:$4 sm:$0xff]  }
 0x42e   : > { %3697 = vmatprep.subr.bf16.mxu0 %v5797_v56  ;;  %3803 = vmatprep.subr.bf16.mxu1 %v5800_v58  ;;  %v5876_v45 = vld [vmem:[#allocation9 + $0x80] sm:$0xff]   ;;  %v5878_v56 = vld [vmem:[#allocation9 + $0xc8] sm:$0xff]  }
 0x42f   : > { %v5879_v58 = vld [vmem:[#allocation9 + $0x8] sm:$0xff]  }
 0x430   : > { %3698 = vmatpush1.bf16.msra.mxu0 %v5795_v59  ;;  %3804 = vmatpush1.bf16.msra.mxu1 %v5798_v60  ;;  %v5880_v59 = vld [vmem:[#allocation9 + $0x88] sm:$0xff]   ;;  %v5881_v60 = vld [vmem:[#allocation9 + $0x50] sm:$0xff]  }
 0x431   : > { %3699 = vmatprep.subr.bf16.mxu0 %v5803_v61  ;;  %3805 = vmatprep.subr.bf16.mxu1 %v5806_v62  ;;  %v5882_v61 = vld [vmem:[#allocation9 + $0xd0] sm:$0xff]  }
 0x432   : > { %v5883_v62 = vld [vmem:[#allocation9 + $0x10] sm:$0xff]  }
 0x434   : > { %3700 = vmatpush1.bf16.msra.mxu0 %v5801_v38  ;;  %3806 = vmatpush1.bf16.msra.mxu1 %v5804_v63  ;;  %v5884_v38 = vld [vmem:[#allocation9 + $0x90] sm:$0xff]   ;;  %v5885_v63 = vld [vmem:[#allocation9 + $0x58] sm:$0xff]  }
 0x435   : > { %3701 = vmatprep.subr.bf16.mxu0 %v5809_v0  ;;  %3807 = vmatprep.subr.bf16.mxu1 %v5812_v1  ;;  %v5888_v0 = vld [vmem:[#allocation9 + $0x98] sm:$0xff]   ;;  %v5889_v1 = vld [vmem:[#allocation9 + $0x60] sm:$0xff]  }
 0x438   : > { %3702 = vmatpush1.bf16.msra.mxu0 %v5807_v2  ;;  %3808 = vmatpush1.bf16.msra.mxu1 %v5810_v3  ;;  %v5890_v2 = vld [vmem:[#allocation9 + $0xe0] sm:$0xff]  }
 0x439   : > { %3703 = vmatprep.subr.bf16.mxu0 %v5815_v4  ;;  %3809 = vmatprep.subr.bf16.mxu1 %v5818_v5  ;;  %v5891_v3 = vld [vmem:[#allocation9 + $0x20] sm:$0xff]   ;;  %v5893_v5 = vld [vmem:[#allocation9 + $0x68] sm:$0xff]  }
 0x43a   : > { %v5892_v4 = vld [vmem:[#allocation9 + $0xa0] sm:$0xff]  }
 0x43c   : > { %3704 = vmatpush1.bf16.msra.mxu0 %v5813_v6  ;;  %3810 = vmatpush1.bf16.msra.mxu1 %v5816_v7  ;;  %v5894_v6 = vld [vmem:[#allocation9 + $0xe8] sm:$0xff]  }
 0x43d   : > { %3705 = vmatprep.subr.bf16.mxu0 %v5821_v8  ;;  %3811 = vmatprep.subr.bf16.mxu1 %v5824_v9  ;;  %v5895_v7 = vld [vmem:[#allocation9 + $0x28] sm:$0xff]   ;;  %v5897_v8 = vld [vmem:[#allocation9 + $0x70] sm:$0xff]  }
 0x43e   : > { %v5898_v9 = vld [vmem:[#allocation9 + $0xf0] sm:$0xff]  }
 0x440   : > { %3706 = vmatpush1.bf16.msra.mxu0 %v5819_v10  ;;  %3812 = vmatpush1.bf16.msra.mxu1 %v5822_v11  ;;  %v5899_v10 = vld [vmem:[#allocation9 + $0x30] sm:$0xff]  }
 0x441   : > { %3707 = vmatprep.subr.bf16.mxu0 %v5827_v12  ;;  %3813 = vmatprep.subr.bf16.mxu1 %v5830_v13  ;;  %v5900_v11 = vld [vmem:[#allocation9 + $0xb0] sm:$0xff]   ;;  %v5901_v12 = vld [vmem:[#allocation9 + $0x78] sm:$0xff]  }
 0x442   : > { %v5902_v13 = vld [vmem:[#allocation9 + $0xf8] sm:$0xff]  }
 0x444   : > { %3708 = vmatpush1.bf16.msra.mxu0 %v5825_v14  ;;  %3814 = vmatpush1.bf16.msra.mxu1 %v5828_v15  ;;  %v5903_v14 = vld [vmem:[#allocation9 + $0x38] sm:$0xff]  }
 0x445   : > { %3709 = vmatprep.subr.bf16.mxu0 %v5833_v16  ;;  %3815 = vmatprep.subr.bf16.mxu1 %v5836_v18  ;;  %v5904_v15 = vld [vmem:[#allocation9 + $0xb8] sm:$0xff]   ;;  %v5905_v16 = vld [vmem:[#allocation12] sm:$0xff]  }
 0x446   : > { %v2976_v18 = vld [vmem:[#allocation7 + $0x8] sm:$0xf] }
 0x448   : > { %3710 = vmatpush1.bf16.msra.mxu0 %v5831_v19  ;;  %3816 = vmatpush1.bf16.msra.mxu1 %v5834_v20  ;;  %v2981_v19 = vrot.slane %v2976_v18, %v6548_v39  ;;  %v2989_v20 = vrot.slane %v2976_v18, %v6554_v53 }
 0x449   : > { %3711 = vmatprep.subr.bf16.mxu0 %v5839_v21  ;;  %3817 = vmatprep.subr.bf16.mxu1 %v5842_v22 }
 0x44c   : > { %3712 = vmatpush1.bf16.msra.mxu0 %v5837_v23  ;;  %3818 = vmatpush1.bf16.msra.mxu1 %v5840_v25  ;;  %v2985_v23 = vrot.slane %v2976_v18, %v6550_v41  ;;  %v2993_v25 = vrot.slane %v2976_v18, %v6556_v57 }
 0x44d   : > { %3713 = vmatprep.subr.bf16.mxu0 %v5845_v26  ;;  %3819 = vmatprep.subr.bf16.mxu1 %v5848_v27 }
 0x450   : > { %3714 = vmatpush1.bf16.msra.mxu0 %v5843_v29  ;;  %3820 = vmatpush1.bf16.msra.mxu1 %v5846_v30 }
 0x451   : > { %3715 = vmatprep.subr.bf16.mxu0 %v5851_v31  ;;  %3821 = vmatprep.subr.bf16.mxu1 %v5854_v32 }
 0x454   : > { %3716 = vmatpush1.bf16.msra.mxu0 %v5849_v33  ;;  %3822 = vmatpush1.bf16.msra.mxu1 %v5852_v34 }
 0x455   : > { %3717 = vmatprep.subr.bf16.mxu0 %v5857_v35  ;;  %3823 = vmatprep.subr.bf16.mxu1 %v5860_v36 }
 0x458   : > { %3718 = vmatpush1.bf16.msra.mxu0 %v5855_v37  ;;  %3824 = vmatpush1.bf16.msra.mxu1 %v5858_v40 }
 0x459   : > { %3719 = vmatprep.subr.bf16.mxu0 %v5863_v24  ;;  %3825 = vmatprep.subr.bf16.mxu1 %v5866_v42 }
 0x45c   : > { %3720 = vmatpush1.bf16.msra.mxu0 %v5861_v43  ;;  %3826 = vmatpush1.bf16.msra.mxu1 %v5864_v46 }
 0x45d   : > { %3721 = vmatprep.subr.bf16.mxu0 %v5869_v47  ;;  %3827 = vmatprep.subr.bf16.mxu1 %v5872_v48 }
 0x460   : > { %3722 = vmatpush1.bf16.msra.mxu0 %v5867_v49  ;;  %3828 = vmatpush1.bf16.msra.mxu1 %v5870_v50 }
 0x461   : > { %4971 = vmatprep.subr.bf16.mxu0 %v5873_v51  ;;  %4999 = vmatprep.subr.bf16.mxu1 %v5874_v52 }
 0x463   : > { %3724 = vmatmul.mubr.bf16.vlgmr.msra.gmra.mrb[24].mxu0 %v6592_v28  ;;  %3830 = vmatmul.mubr.bf16.vlgmr.msra.gmra.mrb[24].mxu1 %v6592_v28  ;;  %v5886_v28 = vld [vmem:[#allocation9 + $0xd8] sm:$0xff]  }
 0x464   : > { %3733 = vmatprep.mubr.bf16.mxu0 %v6596_v55  ;;  %3839 = vmatprep.mubr.bf16.mxu1 %v6596_v55  ;;  %v5887_v55 = vld [vmem:[#allocation9 + $0x18] sm:$0xff]  }
 0x465   : > { %4972 = vmatpush3.bf16.msra.mxu0 %v5875_v17  ;;  %5000 = vmatpush3.bf16.msra.mxu1 %v5876_v45 }
 0x466   : > { %4973 = vmatprep.subr.bf16.mxu0 %v5877_v54  ;;  %5001 = vmatprep.subr.bf16.mxu1 %v5878_v56 }
 0x469   : > { %4974 = vmatpush3.bf16.msra.mxu0 %v5879_v58  ;;  %5002 = vmatpush3.bf16.msra.mxu1 %v5880_v59 }
 0x46a   : > { %4975 = vmatprep.subr.bf16.mxu0 %v5881_v60  ;;  %5003 = vmatprep.subr.bf16.mxu1 %v5882_v61 }
 0x46b   : > { %3734 = vmatmul.mubr.bf16.gmra.mrb[28].mxu0 %v6594_v44  ;;  %3840 = vmatmul.mubr.bf16.gmra.mrb[28].mxu1 %v6594_v44  ;;  %v5896_v44 = vld [vmem:[#allocation9 + $0xa8] sm:$0xff]  }
 0x46d   : > { %4976 = vmatpush3.bf16.msra.mxu0 %v5883_v62  ;;  %5004 = vmatpush3.bf16.msra.mxu1 %v5884_v38 }
 0x46e   : > { %4977 = vmatprep.subr.bf16.mxu0 %v5885_v63  ;;  %5005 = vmatprep.subr.bf16.mxu1 %v5886_v28 }
 0x471   : > { %4978 = vmatpush3.bf16.msra.mxu0 %v5887_v55  ;;  %5006 = vmatpush3.bf16.msra.mxu1 %v5888_v0  ;;  %v5906_v55 = vld [vmem:[#allocation12 + $0x8] sm:$0xff]   ;;  %v5907_v0 = vld [vmem:[#allocation12 + $0x10] sm:$0xff]  }
 0x472   : > { %4979 = vmatprep.subr.bf16.mxu0 %v5889_v1  ;;  %5007 = vmatprep.subr.bf16.mxu1 %v5890_v2  ;;  %v5908_v1 = vld [vmem:[#allocation12 + $0x18] sm:$0xff]   ;;  %v5909_v2 = vld [vmem:[#allocation12 + $0x20] sm:$0xff]  }
 0x475   : > { %4980 = vmatpush3.bf16.msra.mxu0 %v5891_v3  ;;  %5008 = vmatpush3.bf16.msra.mxu1 %v5892_v4  ;;  %v5910_v3 = vld [vmem:[#allocation12 + $0x28] sm:$0xff]   ;;  %v5911_v4 = vld [vmem:[#allocation12 + $0x30] sm:$0xff]  }
 0x476   : > { %4981 = vmatprep.subr.bf16.mxu0 %v5893_v5  ;;  %5009 = vmatprep.subr.bf16.mxu1 %v5894_v6  ;;  %v5912_v5 = vld [vmem:[#allocation12 + $0x38] sm:$0xff]  }
 0x479   : > { %4982 = vmatpush3.bf16.msra.mxu0 %v5895_v7  ;;  %5010 = vmatpush3.bf16.msra.mxu1 %v5896_v44  ;;  %v4927_v44 = vld [vmem:[#allocation10] ss:$0 sm:$0xff] }
 0x47a   : > { %4983 = vmatprep.subr.bf16.mxu0 %v5897_v8  ;;  %5011 = vmatprep.subr.bf16.mxu1 %v5898_v9 }
 0x47d   : > { %4984 = vmatpush3.bf16.msra.mxu0 %v5899_v10  ;;  %5012 = vmatpush3.bf16.msra.mxu1 %v5900_v11 }
 0x47e   : > { %4985 = vmatprep.subr.bf16.mxu0 %v5901_v12  ;;  %5013 = vmatprep.subr.bf16.mxu1 %v5902_v13 }
 0x481   : > { %4986 = vmatpush3.bf16.msra.mxu0 %v5903_v14  ;;  %5014 = vmatpush3.bf16.msra.mxu1 %v5904_v15 }
 0x482   : > { %5037 = vmatprep.subr.bf16.mxu0 %v5905_v16 }
 0x536   : > { %v3725_v21 = vpop.f32.mrb[24].mxu0  ;;  %v3831_v22 = vpop.f32.mrb[24].mxu1 }
 0x537   : > { %v3727_v26 = vpop.f32.mrb[25].mxu0  ;;  %v3833_v27 = vpop.f32.mrb[25].mxu1  ;;  %v5089_v31 = vadd.f32 %v3725_v21, %v2981_v19  ;;  %v5097_v32 = vadd.f32 %v3831_v22, %v2989_v20 }
 0x538   : > { %v3729_v29 = vpop.f32.mrb[26].mxu0  ;;  %v3835_v30 = vpop.f32.mrb[26].mxu1  ;;  %v5090_v37 = vadd.f32 %v3727_v26, %v2985_v23  ;;  %v5098_v39 = vadd.f32 %v3833_v27, %v2993_v25 }
 0x539   : > { %v5091_v33 = vadd.f32 %v3729_v29, %v2981_v19  ;;  %v5099_v34 = vadd.f32 %v3835_v30, %v2989_v20  ;;  %v3731_v35 = vpop.f32.mrb[27].mxu0  ;;  %v3837_v36 = vpop.f32.mrb[27].mxu1 }
 0x53a   : > { %v5092_v40 = vadd.f32 %v3731_v35, %v2985_v23  ;;  %v5100_v53 = vadd.f32 %v3837_v36, %v2993_v25 }
 0x53b   : > { %v3850_v24 = vpack.c.bf16 %v5091_v33, %v5089_v31  ;;  %v3852_v42 = vpack.c.bf16 %v5099_v34, %v5097_v32 }
 0x53c   : > { %v3851_v43 = vpack.c.bf16 %v5092_v40, %v5090_v37  ;;  %v3853_v41 = vpack.c.bf16 %v5100_v53, %v5098_v39 }
 0x53e   : > { %v3735_v46 = vpop.f32.mrb[28].mxu0  ;;  %v3841_v57 = vpop.f32.mrb[28].mxu1  ;;  %4153 = vmatprep.mubr.bf16.mxu0 %v3851_v43  ;;  %4202 = vmatprep.mubr.bf16.mxu1 %v3853_v41 }
 0x53f   : > { %v3737_v47 = vpop.f32.mrb[29].mxu0  ;;  %v3843_v48 = vpop.f32.mrb[29].mxu1  ;;  %4154 = vmatmul.mubr.bf16.vlgmr.msra.gmra.mrb[32].mxu0 %v3850_v24  ;;  %4203 = vmatmul.mubr.bf16.vlgmr.msra.gmra.mrb[32].mxu1 %v3852_v42  ;;  %v5093_v51 = vadd.f32 %v3735_v46, %v2981_v19  ;;  %v5101_v52 = vadd.f32 %v3841_v57, %v2989_v20 }
 0x540   : > { %v3739_v49 = vpop.f32.mrb[30].mxu0  ;;  %v3845_v50 = vpop.f32.mrb[30].mxu1  ;;  %5038 = vmatpush3.bf16.msra.mxu0 %v5905_v16  ;;  %v5094_v58 = vadd.f32 %v3737_v47, %v2985_v23  ;;  %v5102_v59 = vadd.f32 %v3843_v48, %v2993_v25  ;;  %v4960_v47 = vld [vmem:[#allocation13] ss:$0 sm:$0xff] }
 0x541   : > { %v5095_v17 = vadd.f32 %v3739_v49, %v2981_v19  ;;  %v5103_v45 = vadd.f32 %v3845_v50, %v2989_v20  ;;  %v3741_v54 = vpop.f32.mrb[31].mxu0  ;;  %v3847_v56 = vpop.f32.mrb[31].mxu1  ;;  %5039 = vmatprep.subr.bf16.mxu0 %v5906_v55 }
 0x542   : > { %v5096_v60 = vadd.f32 %v3741_v54, %v2985_v23  ;;  %v5104_v61 = vadd.f32 %v3847_v56, %v2993_v25 }
 0x543   : > { %v3854_v62 = vpack.c.bf16 %v5095_v17, %v5093_v51  ;;  %v3856_v38 = vpack.c.bf16 %v5103_v45, %v5101_v52 }
 0x544   : > { %v3855_v63 = vpack.c.bf16 %v5096_v60, %v5094_v58  ;;  %v3857_v28 = vpack.c.bf16 %v5104_v61, %v5102_v59  ;;  %5040 = vmatpush3.bf16.msra.mxu0 %v5906_v55 }
 0x545   : > { %5041 = vmatprep.subr.bf16.mxu0 %v5907_v0 }
 0x546   : > { %4161 = vmatprep.mubr.bf16.mxu0 %v3855_v63  ;;  %4210 = vmatprep.mubr.bf16.mxu1 %v3857_v28 }
 0x547   : > { %4162 = vmatmul.mubr.bf16.gmra.mrb[36].mxu0 %v3854_v62  ;;  %4211 = vmatmul.mubr.bf16.gmra.mrb[36].mxu1 %v3856_v38 }
 0x548   : > { %5042 = vmatpush3.bf16.msra.mxu0 %v5907_v0 }
 0x549   : > { %5043 = vmatprep.subr.bf16.mxu0 %v5908_v1 }
 0x54c   : > { %5044 = vmatpush3.bf16.msra.mxu0 %v5908_v1 }
 0x54d   : > { %5045 = vmatprep.subr.bf16.mxu0 %v5909_v2 }
 0x550   : > { %5046 = vmatpush3.bf16.msra.mxu0 %v5909_v2 }
 0x551   : > { %5047 = vmatprep.subr.bf16.mxu0 %v5910_v3 }
 0x554   : > { %5048 = vmatpush3.bf16.msra.mxu0 %v5910_v3 }
 0x555   : > { %5049 = vmatprep.subr.bf16.mxu0 %v5911_v4 }
 0x558   : > { %5050 = vmatpush3.bf16.msra.mxu0 %v5911_v4 }
 0x559   : > { %5051 = vmatprep.subr.bf16.mxu0 %v5912_v5 }
 0x55c   : > { %5052 = vmatpush3.bf16.msra.mxu0 %v5912_v5 }
 0x612   : > { %v4987_v6 = vpop.f32.mrb[32].mxu0  ;;  %v5015_v7 = vpop.f32.mrb[32].mxu1 }
 0x613   : > { %v4988_v8 = vpop.f32.mrb[33].mxu0  ;;  %v5016_v9 = vpop.f32.mrb[33].mxu1 }
 0x614   : > { %v4989_v10 = vadd.f32 %v4988_v8, %v4987_v6  ;;  %v5017_v11 = vadd.f32 %v5016_v9, %v5015_v7  ;;  %v4990_v12 = vpop.f32.mrb[34].mxu0  ;;  %v5018_v13 = vpop.f32.mrb[34].mxu1 }
 0x615   : > { %v4991_v14 = vpop.f32.mrb[35].mxu0  ;;  %v5019_v15 = vpop.f32.mrb[35].mxu1 }
 0x616   : > { %v4156_v16 = vadd.f32 %v4989_v10, %v4927_v44  ;;  %v4992_v18 = vadd.f32 %v4991_v14, %v4990_v12  ;;  %v5020_v19 = vadd.f32 %v5019_v15, %v5018_v13 }
 0x618   : > { %v4205_v20 = vadd.f32 %v5017_v11, %v4156_v16  ;;  %v4159_v21 = vadd.f32 %v4992_v18, %v4927_v44 }
 0x61a   : > { %v4208_v22 = vadd.f32 %v5020_v19, %v4159_v21  ;;  %v4993_v23 = vpop.f32.mrb[36].mxu0  ;;  %v5021_v25 = vpop.f32.mrb[36].mxu1  ;;  %5977 = vtanh.f32 %v4205_v20 }
 0x61b   : > { %v4994_v26 = vpop.f32.mrb[37].mxu0  ;;  %v5022_v27 = vpop.f32.mrb[37].mxu1 }
 0x61c   : > { %5979 = vtanh.f32 %v4208_v22  ;;  %v4995_v29 = vadd.f32 %v4994_v26, %v4993_v23  ;;  %v5023_v30 = vadd.f32 %v5022_v27, %v5021_v25  ;;  %v4996_v31 = vpop.f32.mrb[38].mxu0  ;;  %v5024_v32 = vpop.f32.mrb[38].mxu1 }
 0x61d   : > { %v4997_v33 = vpop.f32.mrb[39].mxu0  ;;  %v5025_v34 = vpop.f32.mrb[39].mxu1 }
 0x61e   : > { %v4164_v35 = vadd.f32 %v4995_v29, %v4927_v44  ;;  %v4998_v36 = vadd.f32 %v4997_v33, %v4996_v31  ;;  %v5026_v37 = vadd.f32 %v5025_v34, %v5024_v32 }
 0x620   : > { %v4213_v39 = vadd.f32 %v5023_v30, %v4164_v35  ;;  %v4167_v40 = vadd.f32 %v4998_v36, %v4927_v44 }
 0x622   : > { %v4216_v53 = vadd.f32 %v5026_v37, %v4167_v40  ;;  %5981 = vtanh.f32 %v4213_v39 }
 0x624   : > { %5983 = vtanh.f32 %v4216_v53  ;;  %v5978_v24 = vpop.eup %5977 }
 0x626   : > { %v5980_v42 = vpop.eup %5979 }
 0x627   : > { %v4223_v43 = vpack.c.bf16 %v5980_v42, %v5978_v24 }
 0x629   : > { %5053 = vmatprep.mubr.bf16.mxu0 %v4223_v43 }
 0x62c   : > { %v5982_v41 = vpop.eup %5981 }
 0x62e   : > { %v5984_v46 = vpop.eup %5983 }
 0x62f   : > { %v4224_v57 = vpack.c.bf16 %v5984_v46, %v5982_v41 }
 0x631   : > { %5054 = vmatmul.mubr.bf16.vlgmr.msra.gmra.mrb[40].mxu0 %v4224_v57 }
 0x704   : > { %v5055_v48 = vpop.f32.mrb[40].mxu0 }
 0x705   : > { %v4330_v49 = vpop.f32.mrb[41].mxu0  ;;  %v4339_v45 = vadd.f32 %v5055_v48, %v4960_v47 }
 0x706   : > { %v4331_v50 = vadd.f32 %v4960_v47, %v4330_v49  ;;  %v5056_v51 = vpop.f32.mrb[42].mxu0 }
 0x707   : > { %v4333_v52 = vpop.f32.mrb[43].mxu0  ;;  %v4342_v54 = vadd.f32 %v5056_v51, %v4960_v47  ;;  %4347 = vst [vmem:[%s445_s21 + $0x10] sm:$0xff] %v4339_v45 }
 0x708   : > { %4345 = vst [vmem:[%s445_s21] sm:$0xff] %v4331_v50  ;;  %v4334_v17 = vadd.f32 %v4960_v47, %v4333_v52 }
 0x709   : > { %4348 = vst [vmem:[%s445_s21 + $0x18] sm:$0xff] %v4342_v54 }
 0x70a   : > { %4346 = vst [vmem:[%s445_s21 + $0x8] sm:$0xff] %v4334_v17 }
 0x70b PF: > { %s24_s30 = sadd.s32 1, %s6235_s30  }
 0x70c   : > { %p21_p7 = scmp.ge.s32.totalorder %s24_s30, 4  }
 0x70e   :  { %23 = sbr.rel (!%p21_p7) target bundleno = 5 (0x5), region = 123 }
 0x715   :  { %4371 = vsyncpa [#allocation3], 1 }
 0x716   :  { %4373 = vsyncpa [#allocation3 + $0x1], 1 }
 0x717   :  { %4374 = vsyncpa [#allocation5], 1 }
 0x718   :  { %4375 = vsyncpa [#allocation8], 1 }
 0x719   :  { %4376 = vsyncpa [#allocation11], 1 }
 0x71a   :  { %4377 = vsyncpa [#allocation14], 1 }

// kernel: fno_apply.1
= control target key start
LH: loop header
LB: loop body
LE: loop exit
PB: predicated region body
PF: predicated region fallthrough
CT: control target
= control target key end

     0   :  { %14 = vsyncpa [#allocation3], 0  ;;  %s6615_s0 = inlined_call_operand.vmem [shape: bf16[64,128], index: 0, kind: input, shape index: {}]   ;;  %s6616_s1 = inlined_call_operand.hbm [shape: bf16[128,512], index: 1, kind: input, shape index: {}]   ;;  %s6617_s2 = inlined_call_operand.hbm [shape: f32[1,512], index: 2, kind: input, shape index: {}]   ;;  %s6618_s3 = inlined_call_operand.hbm [shape: bf16[3,512,512], index: 3, kind: input, shape index: {}]   ;;  %s6619_s4 = inlined_call_operand.hbm [shape: f32[3,1,512], index: 4, kind: input, shape index: {}]   ;;  %s6620_s5 = inlined_call_operand.hbm [shape: bf16[512,128], index: 5, kind: input, shape index: {}]   ;;  %s6621_s6 = inlined_call_operand.hbm [shape: f32[1,128], index: 6, kind: input, shape index: {}]   ;;  %s6622_s7 = inlined_call_operand.hbm [shape: bf16[128,128], index: 7, kind: input, shape index: {}]   ;;  %s6623_s8 = inlined_call_operand.hbm [shape: f32[1,128], index: 8, kind: input, shape index: {}]   ;;  %s6624_s9 = inlined_call_operand.vmem [shape: f32[64,128], index: 9, kind: output, shape index: {}]  }
   0x1   :  { %15 = vsyncpa [#allocation5], 0 }
   0x2   :  { %16 = vsyncpa [#allocation8], 0 }
   0x3   :  { %17 = vsyncpa [#allocation11], 0 }
   0x4   :  { %18 = vsyncpa [#allocation14], 0  ;;  %s6300_s30 = smov 0  }
   0x5 LB: > { %s6237_s10 = smov [#allocation4]   ;;  %s6628_s12 = sadd.s32 4294967295, %s6235_s30   ;;  %s6235_s30 = sphi %s6300_s30, %s24_s30  }
   0x6   : > { %s275_s11 = sshll.u32 %s6237_s10, 4  ;;  %p4486_p0 = scmp.ge.s32.totalorder %s6235_s30, 1  ;;  %s6314_s11 = int_to_ptr.vmem [resolvable:$true] %s275_s11 }
   0x7   : > { %p249_p1 = scmp.lt.s32.totalorder %s6235_s30, 3  ;;  %p6310_p2 = scmp.eq.s32.totalorder %s6628_s12, 0 }
   0x8   : > { %s6238_s15 = smov [#allocation7]   ;;  %s6239_s18 = smov [#allocation10]  }
   0x9   : > { %s6633_s13 = scalar_select %p6310_p2, 1, 0 }
   0xa   : > { %p6316_p3 = pnand %p4486_p0, %p249_p1  ;;  %s298_s16 = sshll.u32 %s6238_s15, 4  ;;  %s6322_s16 = int_to_ptr.vmem [resolvable:$true] %s298_s16 }
   0xb   : > { %s325_s19 = sshll.u32 %s6239_s18, 4  ;;  %s6240_s20 = smov [#allocation2]   ;;  %s6330_s19 = int_to_ptr.vmem [resolvable:$true] %s325_s19 }
   0xc   : > { %s6634_s14 = scalar_select %p6316_p3, 1, 0 }
   0xd   : > { %p5185_p4 = pneg %p6316_p3  ;;  %s6332_s21 = sshll.u32 %s6240_s20, 4  ;;  %s262_s21 = int_to_ptr.vmem [resolvable:$true] %s6332_s21 }
   0xe   : > { %s5985_s24 = scalar_lea.hbm %s6617_s2, 64 }
   0xf   : > { %p6326_p5 = pnand %p6310_p2, %p5185_p4  ;;  %p5986_p6 = scmp.ne.s32.totalorder %s6617_s2, %s5985_s24 }
  0x10   : > { %p5992_p10 = scmp.lt.u32.totalorder %s5985_s24, %s6617_s2 }
  0x11   : > { %p6342_p7 = pneg %p6326_p5 }
  0x13   : > { %p5988_p8 = pnand %p6342_p7, %p5986_p6 }
  0x15   : > { %p5989_p9 = pneg %p5988_p8 }
  0x17   : > { %p5994_p11 = pnand %p5992_p10, %p5989_p9 }
  0x19   : > { %5997 = shalt.err (!%p5994_p11)
}
  0x1a   : > { %s5998_s10 = scalar_lea.vmem %s6314_s11, 64  ;;  %p6006_p1 = scmp.lt.s32.totalorder %s6314_s11, %s6314_s11 }
  0x1b   : > { %p5999_p12 = scmp.ne.s32.totalorder %s6314_s11, %s5998_s10  ;;  %p6007_p4 = scmp.lt.s32.totalorder %s5998_s10, %s5998_s10 }
  0x1d   : > { %p6001_p13 = pnand %p5999_p12, %p6342_p7  ;;  %p6008_p6 = por %p6007_p4, %p6006_p1 }
  0x1f   : > { %p6002_p0 = pneg %p6001_p13 }
  0x21   : > { %p6009_p8 = pnand %p6008_p6, %p6002_p0 }
  0x23   : > { %6012 = shalt.err (!%p6009_p8)
}
  0x24   : > { %5191 = dma.hbm_to_vmem [thread:$0]  (!%p6326_p5), %s6617_s2, 64, %s6314_s11, [#allocation5]  }
  0x25   : > { %s6013_s23 = scalar_lea.hbm %s6619_s4, 192 }
  0x26   : > { %p6014_p9 = scmp.ne.s32.totalorder %s6619_s4, %s6013_s23  ;;  %p6020_p12 = scmp.lt.u32.totalorder %s6013_s23, %s6619_s4 }
  0x28   : > { %p6016_p10 = pnand %p6014_p9, %p6342_p7 }
  0x2a   : > { %p6017_p11 = pneg %p6016_p10 }
  0x2c   : > { %p6022_p13 = pnand %p6020_p12, %p6017_p11 }
  0x2e   : > { %6025 = shalt.err (!%p6022_p13)
}
  0x2f   : > { %s6026_s11 = scalar_lea.vmem %s6322_s16, 192  ;;  %p6034_p6 = scmp.lt.s32.totalorder %s6322_s16, %s6322_s16 }
  0x30   : > { %p6027_p0 = scmp.ne.s32.totalorder %s6322_s16, %s6026_s11  ;;  %p6035_p8 = scmp.lt.s32.totalorder %s6026_s11, %s6026_s11 }
  0x32   : > { %p6029_p1 = pnand %p6027_p0, %p6342_p7  ;;  %p6036_p9 = por %p6035_p8, %p6034_p6 }
  0x34   : > { %p6030_p4 = pneg %p6029_p1 }
  0x36   : > { %p6037_p10 = pnand %p6036_p9, %p6030_p4 }
  0x38   : > { %6040 = shalt.err (!%p6037_p10)
}
  0x39   : > { %s6629_s29 = smov 64   ;;  %s6631_s10 = smov 4  }
  0x3a   : > { %5197 = dma.hbm_to_vmem [thread:$0]  (!%p6326_p5), %s6619_s4, 192, %s6322_s16, [#allocation8], %s6629_s29, %s6629_s29, %s6631_s10  }
  0x3b   : > { %s6041_s23 = scalar_lea.hbm %s6621_s6, 16 }
  0x3c   : > { %p6042_p11 = scmp.ne.s32.totalorder %s6621_s6, %s6041_s23  ;;  %p6048_p0 = scmp.lt.u32.totalorder %s6041_s23, %s6621_s6 }
  0x3e   : > { %p6044_p12 = pnand %p6042_p11, %p6342_p7 }
  0x40   : > { %p6045_p13 = pneg %p6044_p12 }
  0x42   : > { %p6050_p1 = pnand %p6048_p0, %p6045_p13 }
  0x44   : > { %6053 = shalt.err (!%p6050_p1)
}
  0x45   : > { %s6054_s16 = scalar_lea.vmem %s6330_s19, 16  ;;  %s6061_s11 = scalar_lea.vmem %s6330_s19, 32 }
  0x46   : > { %p6055_p4 = scmp.ne.s32.totalorder %s6330_s19, %s6054_s16  ;;  %p6062_p9 = scmp.lt.s32.totalorder %s6330_s19, %s6330_s19 }
  0x47   : > { %p6063_p10 = scmp.lt.s32.totalorder %s6061_s11, %s6054_s16 }
  0x48   : > { %p6057_p6 = pnand %p6055_p4, %p6342_p7 }
  0x49   : > { %p6064_p11 = por %p6063_p10, %p6062_p9 }
  0x4a   : > { %p6058_p8 = pneg %p6057_p6 }
  0x4c   : > { %p6065_p12 = pnand %p6064_p11, %p6058_p8 }
  0x4e   : > { %6068 = shalt.err (!%p6065_p12)
}
  0x4f   : > { %5203 = dma.hbm_to_vmem [thread:$0]  (!%p6326_p5), %s6621_s6, 16, %s6330_s19, [#allocation11]  }
  0x50   : > { %s6069_s23 = scalar_lea.hbm %s6616_s1, 4096 }
  0x51   : > { %p6070_p13 = scmp.ne.s32.totalorder %s6616_s1, %s6069_s23  ;;  %p6076_p4 = scmp.lt.u32.totalorder %s6069_s23, %s6616_s1 }
  0x53   : > { %p6072_p0 = pnand %p6070_p13, %p6342_p7 }
  0x55   : > { %p6073_p1 = pneg %p6072_p0 }
  0x57   : > { %p6078_p6 = pnand %p6076_p4, %p6073_p1 }
  0x59   : > { %6081 = shalt.err (!%p6078_p6)
}
  0x5a   : > { %s6082_s16 = scalar_lea.vmem %s262_s21, 4096  ;;  %p6090_p11 = scmp.lt.s32.totalorder %s262_s21, %s262_s21 }
  0x5b   : > { %p6083_p8 = scmp.ne.s32.totalorder %s262_s21, %s6082_s16  ;;  %p6091_p12 = scmp.lt.s32.totalorder %s6082_s16, %s6082_s16 }
  0x5d   : > { %p6085_p9 = pnand %p6083_p8, %p6342_p7  ;;  %p6092_p2 = por %p6091_p12, %p6090_p11 }
  0x5f   : > { %p6086_p10 = pneg %p6085_p9 }
  0x61   : > { %p6093_p3 = pnand %p6092_p2, %p6086_p10 }
  0x63   : > { %6096 = shalt.err (!%p6093_p3)
}
  0x64   : > { %s6243_s19 = smov 256   ;;  %s6244_s11 = smov 16  }
  0x65   : > { %5188 = dma.hbm_to_vmem [thread:$0]  (!%p6326_p5), %s6616_s1, 4096, %s262_s21, [#allocation3], %s6243_s19, %s6243_s19, %s6244_s11  }
  0x66   : > { %s6245_s20 = smov [#allocation6]   ;;  %s6246_s23 = smov [#allocation9]  }
  0x67   : > { %s285_s22 = sshll.u32 %s6245_s20, 4  ;;  %s311_s24 = sshll.u32 %s6246_s23, 4  ;;  %s286_s22 = int_to_ptr.vmem [resolvable:$true] %s285_s22  ;;  %s312_s24 = int_to_ptr.vmem [resolvable:$true] %s311_s24 }
  0x68   : > { %s6097_s28 = scalar_lea.hbm %s6618_s3, 49152 }
  0x69   : > { %p6098_p2 = scmp.ne.s32.totalorder %s6618_s3, %s6097_s28  ;;  %p6104_p0 = scmp.lt.u32.totalorder %s6097_s28, %s6618_s3 }
  0x6b   : > { %p6100_p3 = pnand %p6098_p2, %p6342_p7 }
  0x6d   : > { %p6101_p13 = pneg %p6100_p3 }
  0x6f   : > { %p6106_p1 = pnand %p6104_p0, %p6101_p13 }
  0x71   : > { %6109 = shalt.err (!%p6106_p1)
}
  0x72   : > { %s6110_s21 = scalar_lea.vmem %s286_s22, 49152  ;;  %p6118_p9 = scmp.lt.s32.totalorder %s286_s22, %s286_s22 }
  0x73   : > { %p6111_p4 = scmp.ne.s32.totalorder %s286_s22, %s6110_s21  ;;  %p6119_p10 = scmp.lt.s32.totalorder %s6110_s21, %s6110_s21 }
  0x75   : > { %p6113_p6 = pnand %p6111_p4, %p6342_p7  ;;  %p6120_p11 = por %p6119_p10, %p6118_p9 }
  0x77   : > { %p6114_p8 = pneg %p6113_p6 }
  0x79   : > { %p6121_p12 = pnand %p6120_p11, %p6114_p8 }
  0x7b   : > { %6124 = shalt.err (!%p6121_p12)
}
  0x7c   : > { %5194 = dma.hbm_to_vmem [thread:$0]  (!%p6326_p5), %s6618_s3, 49152, %s286_s22, [#allocation5], %s6243_s19, %s6243_s19, %s6244_s11  }
  0x7d   : > { %s6125_s18 = scalar_lea.hbm %s6620_s5, 4096 }
  0x7e   : > { %p6126_p2 = scmp.ne.s32.totalorder %s6620_s5, %s6125_s18  ;;  %p6132_p0 = scmp.lt.u32.totalorder %s6125_s18, %s6620_s5 }
  0x80   : > { %p6128_p3 = pnand %p6126_p2, %p6342_p7 }
  0x82   : > { %p6129_p13 = pneg %p6128_p3 }
  0x84   : > { %p6134_p1 = pnand %p6132_p0, %p6129_p13 }
  0x86   : > { %6137 = shalt.err (!%p6134_p1)
}
  0x87   : > { %s6138_s28 = scalar_lea.vmem %s312_s24, 4096  ;;  %p6146_p9 = scmp.lt.s32.totalorder %s312_s24, %s312_s24 }
  0x88   : > { %p6139_p4 = scmp.ne.s32.totalorder %s312_s24, %s6138_s28  ;;  %p6147_p10 = scmp.lt.s32.totalorder %s6138_s28, %s6138_s28 }
  0x8a   : > { %p6141_p6 = pnand %p6139_p4, %p6342_p7  ;;  %p6148_p11 = por %p6147_p10, %p6146_p9 }
  0x8c   : > { %p6142_p8 = pneg %p6141_p6 }
  0x8e   : > { %p6149_p12 = pnand %p6148_p11, %p6142_p8 }
  0x90   : > { %6152 = shalt.err (!%p6149_p12)
}
  0x91   : > { %s6637_s19 = smov 4   ;;  %s6638_s11 = smov 64  }
  0x92   : > { %5200 = dma.hbm_to_vmem [thread:$0]  (!%p6326_p5), %s6620_s5, 4096, %s312_s24, [#allocation8], %s6638_s11, %s6638_s11, %s6637_s19  }
  0x93   : > { %s6247_s21 = smov [#allocation12]   ;;  %s6248_s15 = smov [#allocation13]  }
  0x94   : > { %s335_s12 = sshll.u32 %s6247_s21, 4  ;;  %s349_s29 = sshll.u32 %s6248_s15, 4  ;;  %s336_s12 = int_to_ptr.vmem [resolvable:$true] %s335_s12  ;;  %s350_s29 = int_to_ptr.vmem [resolvable:$true] %s349_s29 }
  0x95   : > { %s6153_s20 = scalar_lea.hbm %s6622_s7, 1024 }
  0x96   : > { %p6154_p2 = scmp.ne.s32.totalorder %s6622_s7, %s6153_s20  ;;  %p6160_p0 = scmp.lt.u32.totalorder %s6153_s20, %s6622_s7 }
  0x98   : > { %p6156_p3 = pnand %p6154_p2, %p6342_p7 }
  0x9a   : > { %p6157_p13 = pneg %p6156_p3 }
  0x9c   : > { %p6162_p1 = pnand %p6160_p0, %p6157_p13 }
  0x9e   : > { %6165 = shalt.err (!%p6162_p1)
}
  0x9f   : > { %s6166_s24 = scalar_lea.vmem %s336_s12, 1024  ;;  %p6174_p9 = scmp.lt.s32.totalorder %s336_s12, %s336_s12 }
  0xa0   : > { %p6167_p4 = scmp.ne.s32.totalorder %s336_s12, %s6166_s24  ;;  %p6175_p10 = scmp.lt.s32.totalorder %s6166_s24, %s6166_s24 }
  0xa2   : > { %p6169_p6 = pnand %p6167_p4, %p6342_p7  ;;  %p6176_p11 = por %p6175_p10, %p6174_p9 }
  0xa4   : > { %p6170_p8 = pneg %p6169_p6 }
  0xa6   : > { %p6177_p12 = pnand %p6176_p11, %p6170_p8 }
  0xa8   : > { %6180 = shalt.err (!%p6177_p12)
}
  0xa9   : > { %5206 = dma.hbm_to_vmem [thread:$0]  (!%p6326_p5), %s6622_s7, 1024, %s336_s12, [#allocation11], %s6638_s11, %s6638_s11, %s6637_s19  }
  0xaa   : > { %s6181_s10 = scalar_lea.hbm %s6623_s8, 16 }
  0xab   : > { %p6182_p2 = scmp.ne.s32.totalorder %s6623_s8, %s6181_s10  ;;  %p6188_p0 = scmp.lt.u32.totalorder %s6181_s10, %s6623_s8 }
  0xad   : > { %p6184_p3 = pnand %p6182_p2, %p6342_p7 }
  0xaf   : > { %p6185_p13 = pneg %p6184_p3 }
  0xb1   : > { %p6190_p1 = pnand %p6188_p0, %p6185_p13 }
  0xb3   : > { %6193 = shalt.err (!%p6190_p1)
}
  0xb4   : > { %s6194_s26 = scalar_lea.vmem %s350_s29, 16  ;;  %s6201_s19 = scalar_lea.vmem %s350_s29, 32 }
  0xb5   : > { %p6195_p4 = scmp.ne.s32.totalorder %s350_s29, %s6194_s26  ;;  %p6202_p9 = scmp.lt.s32.totalorder %s350_s29, %s350_s29 }
  0xb6   : > { %p6203_p10 = scmp.lt.s32.totalorder %s6201_s19, %s6194_s26 }
  0xb7   : > { %p6197_p6 = pnand %p6195_p4, %p6342_p7 }
  0xb8   : > { %p6204_p11 = por %p6203_p10, %p6202_p9 }
  0xb9   : > { %p6198_p8 = pneg %p6197_p6 }
  0xbb   : > { %p6205_p12 = pnand %p6204_p11, %p6198_p8 }
  0xbd   : > { %6208 = shalt.err (!%p6205_p12)
}
  0xbe   : > { %5209 = dma.hbm_to_vmem [thread:$0]  (!%p6326_p5), %s6623_s8, 16, %s350_s29, [#allocation14]  }
  0xbf   : > { %p6639_p2 = scmp.ne.s32.totalorder %s6634_s14, 0 }
  0xc0   : > { %p6640_p3 = scmp.ne.s32.totalorder (!%p6639_p2), %s6633_s13, 0 }
  0xc1   : > { %371 = sbr.rel (%p6639_p2) target bundleno = 1803 (0x70b), region = 56 }
  0xc8   : > { %6214 = dma.done.wait (%p6640_p3), [#allocation3], 4096  }
  0xc9   : > { %6216 = vsyncadd (%p6640_p3), [#allocation3], 4294963200 }
  0xca   : > { %6218 = dma.done.wait (%p6640_p3), [#allocation5], 49216  }
  0xcb   : > { %6220 = vsyncadd (%p6640_p3), [#allocation5], 4294918080 }
  0xcc   : > { %6222 = dma.done.wait (%p6640_p3), [#allocation8], 4288  }
  0xcd   : > { %6224 = vsyncadd (%p6640_p3), [#allocation8], 4294963008 }
  0xce   : > { %6226 = dma.done.wait (%p6640_p3), [#allocation11], 1040  }
  0xcf   : > { %6228 = vsyncadd (%p6640_p3), [#allocation11], 4294966256 }
  0xd0   : > { %6230 = dma.done.wait (%p6640_p3), [#allocation14], 16  }
  0xd1   : > { %6232 = vsyncadd (%p6640_p3), [#allocation14], 4294967280  ;;  %v6249_v0 = vmov 0   ;;  %s6641_s14 = sadd.s32 4294967295, %s6235_s30   ;;  %v5247_v1 = vld [vmem:[#allocation2 + $0x4] ss:$16 sps:$4 sm:$0xff]  }
  0xd2   : > { %710 = vmatprep.mubr.bf16.mxu0 %v6249_v0  ;;  %763 = vmatprep.mubr.bf16.mxu1 %v6249_v0  ;;  %s4505_s17 = sshll.u32 %s6641_s14, 2  ;;  %v5249_v2 = vld [vmem:[#allocation2] ss:$16 sps:$4 sm:$0xff]   ;;  %v5250_v3 = vld [vmem:[#allocation2 + $0x24] ss:$16 sps:$4 sm:$0xff]  }
  0xd3   : > { %p436_p5 = scmp.lt.s32.totalorder %s4505_s17, 7  ;;  %678 = vmatprep.subr.bf16.mxu0 %v5247_v1  ;;  %v5252_v4 = vld [vmem:[#allocation2 + $0x20] ss:$16 sps:$4 sm:$0xff]   ;;  %v5253_v5 = vld [vmem:[#allocation2 + $0x44] ss:$16 sps:$4 sm:$0xff]  }
  0xd4   : > { %679 = vmatpush1.bf16.msra.mxu0 %v5249_v2  ;;  %v5255_v6 = vld [vmem:[#allocation2 + $0x40] ss:$16 sps:$4 sm:$0xff]   ;;  %v5256_v7 = vld [vmem:[#allocation2 + $0x64] ss:$16 sps:$4 sm:$0xff]   ;;  %v5272_v10 = vld [vmem:[#allocation2 + $0xc] ss:$16 sps:$4 sm:$0xff]  }
  0xd5   : > { %s6643_s17 = smov (!%p436_p5, %s4505_s17), 7  ;;  %680 = vmatprep.subr.bf16.mxu0 %v5250_v3  ;;  %v5258_v8 = vld [vmem:[#allocation2 + $0x60] ss:$16 sps:$4 sm:$0xff]   ;;  %v5259_v9 = vld [vmem:[#allocation2 + $0x84] ss:$16 sps:$4 sm:$0xff]   ;;  %731 = vmatprep.subr.bf16.mxu1 %v5272_v10 }
  0xd6   : > { %s4506_s13 = sshll.u32 %s6643_s17, 2  ;;  %v5274_v11 = vld [vmem:[#allocation2 + $0x8] ss:$16 sps:$4 sm:$0xff]   ;;  %v5275_v12 = vld [vmem:[#allocation2 + $0x2c] ss:$16 sps:$4 sm:$0xff]   ;;  %s4508_s24 = sshll.u32 %s6643_s17, 3 }
  0xd7   : > { %s6542_s28 = scalar_lea.vmem %s6615_s0, %s4506_s13  ;;  %v5261_v13 = vld [vmem:[#allocation2 + $0x80] ss:$16 sps:$4 sm:$0xff]   ;;  %732 = vmatpush1.bf16.msra.mxu1 %v5274_v11  ;;  %v5277_v14 = vld [vmem:[#allocation2 + $0x28] ss:$16 sps:$4 sm:$0xff]   ;;  %v5262_v15 = vld [vmem:[#allocation2 + $0xa4] ss:$16 sps:$4 sm:$0xff]   ;;  %s445_s21 = scalar_lea.vmem %s6624_s9, %s4508_s24 }
  0xd8   : > { %681 = vmatpush1.bf16.msra.mxu0 %v5252_v4  ;;  %733 = vmatprep.subr.bf16.mxu1 %v5275_v12  ;;  %v5278_v16 = vld [vmem:[#allocation2 + $0x4c] ss:$16 sps:$4 sm:$0xff]   ;;  %v5264_v17 = vld [vmem:[#allocation2 + $0xa0] ss:$16 sps:$4 sm:$0xff]   ;;  %v5265_v18 = vld [vmem:[#allocation2 + $0xc4] ss:$16 sps:$4 sm:$0xff]  }
  0xd9   : > { %682 = vmatprep.subr.bf16.mxu0 %v5253_v5  ;;  %v5280_v19 = vld [vmem:[#allocation2 + $0x48] ss:$16 sps:$4 sm:$0xff]   ;;  %v5281_v20 = vld [vmem:[#allocation2 + $0x6c] ss:$16 sps:$4 sm:$0xff]   ;;  %v5267_v21 = vld [vmem:[#allocation2 + $0xc0] ss:$16 sps:$4 sm:$0xff]  }
  0xda   : > { %v5283_v22 = vld [vmem:[#allocation2 + $0x68] ss:$16 sps:$4 sm:$0xff]   ;;  %v5268_v23 = vld [vmem:[#allocation2 + $0xe4] ss:$16 sps:$4 sm:$0xff]   ;;  %v5284_v24 = vld [vmem:[#allocation2 + $0x8c] ss:$16 sps:$4 sm:$0xff]  }
  0xdb   : > { %734 = vmatpush1.bf16.msra.mxu1 %v5277_v14  ;;  %v5270_v25 = vld [vmem:[#allocation2 + $0xe0] ss:$16 sps:$4 sm:$0xff]   ;;  %v5286_v26 = vld [vmem:[#allocation2 + $0x88] ss:$16 sps:$4 sm:$0xff]   ;;  %v5287_v27 = vld [vmem:[#allocation2 + $0xac] ss:$16 sps:$4 sm:$0xff]  }
  0xdc   : > { %683 = vmatpush1.bf16.msra.mxu0 %v5255_v6  ;;  %735 = vmatprep.subr.bf16.mxu1 %v5278_v16  ;;  %v5299_v28 = vld [vmem:[#allocation6 + $0x4] ss:$16 sps:$4 sm:$0xff]   ;;  %v5271_v29 = vld [vmem:[%s6542_s28] sm:$0xff]   ;;  %v5291_v31 = vld [vmem:[#allocation2 + $0xcc] ss:$16 sps:$4 sm:$0xff]  }
  0xdd   : > { %684 = vmatprep.subr.bf16.mxu0 %v5256_v7  ;;  %v5289_v30 = vld [vmem:[#allocation2 + $0xa8] ss:$16 sps:$4 sm:$0xff]   ;;  %v5297_v32 = vld [vmem:[#allocation6] ss:$16 sps:$4 sm:$0xff]   ;;  %v5294_v35 = vld [vmem:[#allocation2 + $0xec] ss:$16 sps:$4 sm:$0xff]  }
  0xde   : > { %v5305_v33 = vld [vmem:[#allocation6 + $0x24] ss:$16 sps:$4 sm:$0xff]   ;;  %v5303_v36 = vld [vmem:[#allocation6 + $0x20] ss:$16 sps:$4 sm:$0xff]   ;;  %v5302_v40 = vld [vmem:[#allocation6 + $0xc] ss:$16 sps:$4 sm:$0xff]  }
  0xdf   : > { %736 = vmatpush1.bf16.msra.mxu1 %v5280_v19  ;;  %v5293_v34 = vld [vmem:[#allocation2 + $0xc8] ss:$16 sps:$4 sm:$0xff]   ;;  %v5309_v41 = vld [vmem:[#allocation6 + $0x40] ss:$16 sps:$4 sm:$0xff]   ;;  %v5300_v43 = vld [vmem:[#allocation6 + $0x8] ss:$16 sps:$4 sm:$0xff]  }
  0xe0   : > { %685 = vmatpush1.bf16.msra.mxu0 %v5258_v8  ;;  %737 = vmatprep.subr.bf16.mxu1 %v5281_v20  ;;  %v5311_v37 = vld [vmem:[#allocation6 + $0x44] ss:$16 sps:$4 sm:$0xff]   ;;  %v5308_v44 = vld [vmem:[#allocation6 + $0x2c] ss:$16 sps:$4 sm:$0xff]   ;;  %v5315_v45 = vld [vmem:[#allocation6 + $0x60] ss:$16 sps:$4 sm:$0xff]  }
  0xe1   : > { %686 = vmatprep.subr.bf16.mxu0 %v5259_v9  ;;  %v5290_v38 = vld [vmem:[%s6542_s28 + $0x8] sm:$0xff]   ;;  %v5314_v48 = vld [vmem:[#allocation6 + $0x4c] ss:$16 sps:$4 sm:$0xff]   ;;  %v5321_v49 = vld [vmem:[#allocation6 + $0x80] ss:$16 sps:$4 sm:$0xff]  }
  0xe2   : > { %v5296_v39 = vld [vmem:[#allocation2 + $0xe8] ss:$16 sps:$4 sm:$0xff]   ;;  %v5306_v47 = vld [vmem:[#allocation6 + $0x28] ss:$16 sps:$4 sm:$0xff]   ;;  %v5320_v52 = vld [vmem:[#allocation6 + $0x6c] ss:$16 sps:$4 sm:$0xff]  }
  0xe3   : > { %738 = vmatpush1.bf16.msra.mxu1 %v5283_v22  ;;  %v5317_v42 = vld [vmem:[#allocation6 + $0x64] ss:$16 sps:$4 sm:$0xff]   ;;  %v5312_v51 = vld [vmem:[#allocation6 + $0x48] ss:$16 sps:$4 sm:$0xff]   ;;  %v5327_v53 = vld [vmem:[#allocation6 + $0xa0] ss:$16 sps:$4 sm:$0xff]  }
  0xe4   : > { %687 = vmatpush1.bf16.msra.mxu0 %v5261_v13  ;;  %739 = vmatprep.subr.bf16.mxu1 %v5284_v24  ;;  %v5323_v46 = vld [vmem:[#allocation6 + $0x84] ss:$16 sps:$4 sm:$0xff]   ;;  %v5318_v55 = vld [vmem:[#allocation6 + $0x68] ss:$16 sps:$4 sm:$0xff]   ;;  %v5326_v56 = vld [vmem:[#allocation6 + $0x8c] ss:$16 sps:$4 sm:$0xff]  }
  0xe5   : > { %688 = vmatprep.subr.bf16.mxu0 %v5262_v15  ;;  %v5329_v50 = vld [vmem:[#allocation6 + $0xa4] ss:$16 sps:$4 sm:$0xff]   ;;  %v5333_v57 = vld [vmem:[#allocation6 + $0xc0] ss:$16 sps:$4 sm:$0xff]   ;;  %v5324_v59 = vld [vmem:[#allocation6 + $0x88] ss:$16 sps:$4 sm:$0xff]  }
  0xe6   : > { %v5335_v54 = vld [vmem:[#allocation6 + $0xc4] ss:$16 sps:$4 sm:$0xff]   ;;  %v5332_v60 = vld [vmem:[#allocation6 + $0xac] ss:$16 sps:$4 sm:$0xff]   ;;  %v5339_v61 = vld [vmem:[#allocation6 + $0xe0] ss:$16 sps:$4 sm:$0xff]  }
  0xe7   : > { %740 = vmatpush1.bf16.msra.mxu1 %v5286_v26  ;;  %v5341_v58 = vld [vmem:[#allocation6 + $0xe4] ss:$16 sps:$4 sm:$0xff]   ;;  %v5330_v63 = vld [vmem:[#allocation6 + $0xa8] ss:$16 sps:$4 sm:$0xff]   ;;  %v5345_v1 = vld [vmem:[#allocation6 + $0x100] ss:$16 sps:$4 sm:$0xff]  }
  0xe8   : > { %689 = vmatpush1.bf16.msra.mxu0 %v5264_v17  ;;  %741 = vmatprep.subr.bf16.mxu1 %v5287_v27  ;;  %v5347_v62 = vld [vmem:[#allocation6 + $0x104] ss:$16 sps:$4 sm:$0xff]   ;;  %v5336_v3 = vld [vmem:[#allocation6 + $0xc8] ss:$16 sps:$4 sm:$0xff]   ;;  %v5344_v4 = vld [vmem:[#allocation6 + $0xec] ss:$16 sps:$4 sm:$0xff]  }
  0xe9   : > { %690 = vmatprep.subr.bf16.mxu0 %v5265_v18  ;;  %v5353_v2 = vld [vmem:[#allocation6 + $0x124] ss:$16 sps:$4 sm:$0xff]   ;;  %v5351_v5 = vld [vmem:[#allocation6 + $0x120] ss:$16 sps:$4 sm:$0xff]   ;;  %v5342_v7 = vld [vmem:[#allocation6 + $0xe8] ss:$16 sps:$4 sm:$0xff]  }
  0xea   : > { %v5359_v6 = vld [vmem:[#allocation6 + $0x144] ss:$16 sps:$4 sm:$0xff]   ;;  %v5350_v8 = vld [vmem:[#allocation6 + $0x10c] ss:$16 sps:$4 sm:$0xff]   ;;  %v5357_v9 = vld [vmem:[#allocation6 + $0x140] ss:$16 sps:$4 sm:$0xff]  }
  0xeb   : > { %742 = vmatpush1.bf16.msra.mxu1 %v5289_v30  ;;  %v5365_v10 = vld [vmem:[#allocation6 + $0x164] ss:$16 sps:$4 sm:$0xff]   ;;  %v5348_v11 = vld [vmem:[#allocation6 + $0x108] ss:$16 sps:$4 sm:$0xff]   ;;  %v5356_v12 = vld [vmem:[#allocation6 + $0x12c] ss:$16 sps:$4 sm:$0xff]  }
  0xec   : > { %691 = vmatpush1.bf16.msra.mxu0 %v5267_v21  ;;  %743 = vmatprep.subr.bf16.mxu1 %v5291_v31  ;;  %v5363_v13 = vld [vmem:[#allocation6 + $0x160] ss:$16 sps:$4 sm:$0xff]   ;;  %v5371_v14 = vld [vmem:[#allocation6 + $0x184] ss:$16 sps:$4 sm:$0xff]   ;;  %v5354_v15 = vld [vmem:[#allocation6 + $0x128] ss:$16 sps:$4 sm:$0xff]  }
  0xed   : > { %692 = vmatprep.subr.bf16.mxu0 %v5268_v23  ;;  %v5362_v16 = vld [vmem:[#allocation6 + $0x14c] ss:$16 sps:$4 sm:$0xff]   ;;  %v5369_v17 = vld [vmem:[#allocation6 + $0x180] ss:$16 sps:$4 sm:$0xff]   ;;  %v5377_v18 = vld [vmem:[#allocation6 + $0x1a4] ss:$16 sps:$4 sm:$0xff]  }
  0xee   : > { %v5360_v19 = vld [vmem:[#allocation6 + $0x148] ss:$16 sps:$4 sm:$0xff]   ;;  %v5368_v20 = vld [vmem:[#allocation6 + $0x16c] ss:$16 sps:$4 sm:$0xff]   ;;  %v5375_v21 = vld [vmem:[#allocation6 + $0x1a0] ss:$16 sps:$4 sm:$0xff]  }
  0xef   : > { %744 = vmatpush1.bf16.msra.mxu1 %v5293_v34  ;;  %v5366_v22 = vld [vmem:[#allocation6 + $0x168] ss:$16 sps:$4 sm:$0xff]   ;;  %v5374_v23 = vld [vmem:[#allocation6 + $0x18c] ss:$16 sps:$4 sm:$0xff]   ;;  %v5383_v27 = vld [vmem:[#allocation6 + $0x1c4] ss:$16 sps:$4 sm:$0xff]  }
  0xf0   : > { %693 = vmatpush1.bf16.msra.mxu0 %v5270_v25  ;;  %745 = vmatprep.subr.bf16.mxu1 %v5294_v35  ;;  %v5372_v24 = vld [vmem:[#allocation6 + $0x188] ss:$16 sps:$4 sm:$0xff]   ;;  %v5380_v25 = vld [vmem:[#allocation6 + $0x1ac] ss:$16 sps:$4 sm:$0xff]   ;;  %v5389_v31 = vld [vmem:[#allocation6 + $0x1e4] ss:$16 sps:$4 sm:$0xff]  }
  0xf1   : > { %1582 = vmatprep.subr.bf16.mxu0 %v5299_v28  ;;  %v5378_v26 = vld [vmem:[#allocation6 + $0x1a8] ss:$16 sps:$4 sm:$0xff]   ;;  %v5386_v28 = vld [vmem:[#allocation6 + $0x1cc] ss:$16 sps:$4 sm:$0xff]   ;;  %v5395_v35 = vld [vmem:[#allocation6 + $0x204] ss:$16 sps:$4 sm:$0xff]  }
  0xf2   : > { %v5384_v30 = vld [vmem:[#allocation6 + $0x1c8] ss:$16 sps:$4 sm:$0xff]  }
  0xf3   : > { %711 = vmatmul.mubr.bf16.vlgmr.msra.gmra.mrb[0].mxu0 %v5271_v29  ;;  %746 = vmatpush1.bf16.msra.mxu1 %v5296_v39  ;;  %v5390_v34 = vld [vmem:[#allocation6 + $0x1e8] ss:$16 sps:$4 sm:$0xff]  }
  0xf4   : > { %720 = vmatprep.mubr.bf16.mxu0 %v6249_v0  ;;  %1583 = vmatpush1.bf16.msra.mxu0 %v5297_v32  ;;  %v5392_v32 = vld [vmem:[#allocation6 + $0x1ec] ss:$16 sps:$4 sm:$0xff]  }
  0xf5   : > { %1584 = vmatprep.subr.bf16.mxu0 %v5305_v33  ;;  %1688 = vmatprep.subr.bf16.mxu1 %v5302_v40  ;;  %v5387_v33 = vld [vmem:[#allocation6 + $0x1e0] ss:$16 sps:$4 sm:$0xff]   ;;  %v484_v40 = vld [vmem:[#allocation4] sm:$0xf] }
  0xf6   : > { %764 = vmatmul.mubr.bf16.vlgmr.msra.gmra.mrb[0].mxu1 %v5271_v29  ;;  %v5381_v29 = vld [vmem:[#allocation6 + $0x1c0] ss:$16 sps:$4 sm:$0xff]  }
  0xf7   : > { %773 = vmatprep.mubr.bf16.mxu1 %v6249_v0  ;;  %1689 = vmatpush1.bf16.msra.mxu1 %v5300_v43  ;;  %v5338_v0 = vld [vmem:[#allocation6 + $0xcc] ss:$16 sps:$4 sm:$0xff]  }
  0xf8   : > { %1585 = vmatpush1.bf16.msra.mxu0 %v5303_v36  ;;  %1690 = vmatprep.subr.bf16.mxu1 %v5308_v44  ;;  %v5398_v36 = vld [vmem:[#allocation6 + $0x20c] ss:$16 sps:$4 sm:$0xff]  }
  0xf9   : > { %1586 = vmatprep.subr.bf16.mxu0 %v5311_v37  ;;  %v486_v37 = vlaneseq }
  0xfb   : > { %721 = vmatmul.mubr.bf16.gmra.mrb[4].mxu0 %v5290_v38  ;;  %1691 = vmatpush1.bf16.msra.mxu1 %v5306_v47 }
  0xfc   : > { %1587 = vmatpush1.bf16.msra.mxu0 %v5309_v41  ;;  %1692 = vmatprep.subr.bf16.mxu1 %v5314_v48 }
  0xfd   : > { %1588 = vmatprep.subr.bf16.mxu0 %v5317_v42 }
  0xfe   : > { %774 = vmatmul.mubr.bf16.gmra.mrb[4].mxu1 %v5290_v38  ;;  %v487_v38 = vshrl.u32 %v486_v37, 7  ;;  %v5425_v37 = vld [vmem:[#allocation6 + $0x2a4] ss:$16 sps:$4 sm:$0xff]  }
  0xff   : > { %1693 = vmatpush1.bf16.msra.mxu1 %v5312_v51 }
 0x100   : > { %1589 = vmatpush1.bf16.msra.mxu0 %v5315_v45  ;;  %1694 = vmatprep.subr.bf16.mxu1 %v5320_v52  ;;  %v6548_v39 = vsub.s32 0, %v487_v38  ;;  %v6550_v41 = vsub.s32 1, %v487_v38 }
 0x101   : > { %1590 = vmatprep.subr.bf16.mxu0 %v5323_v46 }
 0x102   : > { %v489_v42 = vrot.slane %v484_v40, %v6548_v39  ;;  %v493_v44 = vrot.slane %v484_v40, %v6550_v41 }
 0x103   : > { %1695 = vmatpush1.bf16.msra.mxu1 %v5318_v55  ;;  %v5393_v55 = vld [vmem:[#allocation6 + $0x200] ss:$16 sps:$4 sm:$0xff]  }
 0x104   : > { %1591 = vmatpush1.bf16.msra.mxu0 %v5321_v49  ;;  %1696 = vmatprep.subr.bf16.mxu1 %v5326_v56  ;;  %v5396_v56 = vld [vmem:[#allocation6 + $0x208] ss:$16 sps:$4 sm:$0xff]  }
 0x105   : > { %1592 = vmatprep.subr.bf16.mxu0 %v5329_v50 }
 0x107   : > { %1697 = vmatpush1.bf16.msra.mxu1 %v5324_v59  ;;  %v5404_v59 = vld [vmem:[#allocation6 + $0x22c] ss:$16 sps:$4 sm:$0xff]  }
 0x108   : > { %1593 = vmatpush1.bf16.msra.mxu0 %v5327_v53  ;;  %1698 = vmatprep.subr.bf16.mxu1 %v5332_v60  ;;  %v6554_v53 = vsub.s32 2, %v487_v38 }
 0x109   : > { %1594 = vmatprep.subr.bf16.mxu0 %v5335_v54 }
 0x10b   : > { %1699 = vmatpush1.bf16.msra.mxu1 %v5330_v63  ;;  %v497_v63 = vrot.slane %v484_v40, %v6554_v53 }
 0x10c   : > { %1595 = vmatpush1.bf16.msra.mxu0 %v5333_v57  ;;  %1700 = vmatprep.subr.bf16.mxu1 %v5338_v0  ;;  %v6556_v57 = vsub.s32 3, %v487_v38  ;;  %v5399_v0 = vld [vmem:[#allocation6 + $0x220] ss:$16 sps:$4 sm:$0xff]   ;;  %v5428_v38 = vld [vmem:[#allocation6 + $0x2ac] ss:$16 sps:$4 sm:$0xff]  }
 0x10d   : > { %1596 = vmatprep.subr.bf16.mxu0 %v5341_v58  ;;  %v5401_v58 = vld [vmem:[#allocation6 + $0x224] ss:$16 sps:$4 sm:$0xff]  }
 0x10f   : > { %1701 = vmatpush1.bf16.msra.mxu1 %v5336_v3 }
 0x110   : > { %1597 = vmatpush1.bf16.msra.mxu0 %v5339_v61  ;;  %1702 = vmatprep.subr.bf16.mxu1 %v5344_v4  ;;  %v501_v4 = vrot.slane %v484_v40, %v6556_v57 }
 0x111   : > { %1598 = vmatprep.subr.bf16.mxu0 %v5347_v62 }
 0x113   : > { %1703 = vmatpush1.bf16.msra.mxu1 %v5342_v7 }
 0x114   : > { %1599 = vmatpush1.bf16.msra.mxu0 %v5345_v1  ;;  %1704 = vmatprep.subr.bf16.mxu1 %v5350_v8  ;;  %v5402_v1 = vld [vmem:[#allocation6 + $0x228] ss:$16 sps:$4 sm:$0xff]  }
 0x115   : > { %1600 = vmatprep.subr.bf16.mxu0 %v5353_v2 }
 0x117   : > { %1705 = vmatpush1.bf16.msra.mxu1 %v5348_v11 }
 0x118   : > { %1601 = vmatpush1.bf16.msra.mxu0 %v5351_v5  ;;  %1706 = vmatprep.subr.bf16.mxu1 %v5356_v12  ;;  %v5407_v5 = vld [vmem:[#allocation6 + $0x244] ss:$16 sps:$4 sm:$0xff]  }
 0x119   : > { %1602 = vmatprep.subr.bf16.mxu0 %v5359_v6  ;;  %v5410_v6 = vld [vmem:[#allocation6 + $0x24c] ss:$16 sps:$4 sm:$0xff]  }
 0x11b   : > { %1707 = vmatpush1.bf16.msra.mxu1 %v5354_v15  ;;  %v5408_v15 = vld [vmem:[#allocation6 + $0x248] ss:$16 sps:$4 sm:$0xff]  }
 0x11c   : > { %1603 = vmatpush1.bf16.msra.mxu0 %v5357_v9  ;;  %1708 = vmatprep.subr.bf16.mxu1 %v5362_v16 }
 0x11d   : > { %1604 = vmatprep.subr.bf16.mxu0 %v5365_v10 }
 0x11f   : > { %1709 = vmatpush1.bf16.msra.mxu1 %v5360_v19  ;;  %v5413_v19 = vld [vmem:[#allocation6 + $0x264] ss:$16 sps:$4 sm:$0xff]  }
 0x120   : > { %1605 = vmatpush1.bf16.msra.mxu0 %v5363_v13  ;;  %1710 = vmatprep.subr.bf16.mxu1 %v5368_v20  ;;  %v5416_v20 = vld [vmem:[#allocation6 + $0x26c] ss:$16 sps:$4 sm:$0xff]  }
 0x121   : > { %1606 = vmatprep.subr.bf16.mxu0 %v5371_v14  ;;  %v5405_v14 = vld [vmem:[#allocation6 + $0x240] ss:$16 sps:$4 sm:$0xff]  }
 0x123   : > { %1711 = vmatpush1.bf16.msra.mxu1 %v5366_v22 }
 0x124   : > { %1607 = vmatpush1.bf16.msra.mxu0 %v5369_v17  ;;  %1712 = vmatprep.subr.bf16.mxu1 %v5374_v23 }
 0x125   : > { %1608 = vmatprep.subr.bf16.mxu0 %v5377_v18 }
 0x127   : > { %1713 = vmatpush1.bf16.msra.mxu1 %v5372_v24 }
 0x128   : > { %1609 = vmatpush1.bf16.msra.mxu0 %v5375_v21  ;;  %1714 = vmatprep.subr.bf16.mxu1 %v5380_v25  ;;  %v5411_v25 = vld [vmem:[#allocation6 + $0x260] ss:$16 sps:$4 sm:$0xff]  }
 0x129   : > { %1610 = vmatprep.subr.bf16.mxu0 %v5383_v27 }
 0x12b   : > { %1715 = vmatpush1.bf16.msra.mxu1 %v5378_v26  ;;  %v5414_v26 = vld [vmem:[#allocation6 + $0x268] ss:$16 sps:$4 sm:$0xff]  }
 0x12c   : > { %1716 = vmatprep.subr.bf16.mxu1 %v5386_v28  ;;  %1611 = vmatpush1.bf16.msra.mxu0 %v5381_v29  ;;  %v5419_v28 = vld [vmem:[#allocation6 + $0x284] ss:$16 sps:$4 sm:$0xff]   ;;  %v5422_v29 = vld [vmem:[#allocation6 + $0x28c] ss:$16 sps:$4 sm:$0xff]  }
 0x12d   : > { %1612 = vmatprep.subr.bf16.mxu0 %v5389_v31 }
 0x12f   : > { %1717 = vmatpush1.bf16.msra.mxu1 %v5384_v30 }
 0x130   : > { %1718 = vmatprep.subr.bf16.mxu1 %v5392_v32  ;;  %1613 = vmatpush1.bf16.msra.mxu0 %v5387_v33  ;;  %v5417_v33 = vld [vmem:[#allocation6 + $0x280] ss:$16 sps:$4 sm:$0xff]  }
 0x131   : > { %1635 = vmatprep.subr.bf16.mxu0 %v5395_v35 }
 0x133   : > { %1719 = vmatpush1.bf16.msra.mxu1 %v5390_v34  ;;  %v5420_v34 = vld [vmem:[#allocation6 + $0x288] ss:$16 sps:$4 sm:$0xff]  }
 0x134   : > { %1741 = vmatprep.subr.bf16.mxu1 %v5398_v36 }
 0x1c6   : > { %v712_v43 = vpop.f32.mrb[0].mxu0 }
 0x1c7   : > { %v714_v45 = vpop.f32.mrb[1].mxu0  ;;  %v713_v47 = vadd.f32 %v712_v43, %v489_v42 }
 0x1c8   : > { %v716_v46 = vpop.f32.mrb[2].mxu0  ;;  %v715_v50 = vadd.f32 %v714_v45, %v493_v44  ;;  %v5423_v45 = vld [vmem:[#allocation6 + $0x2a0] ss:$16 sps:$4 sm:$0xff]  }
 0x1c9   : > { %v717_v48 = vadd.f32 %v716_v46, %v489_v42  ;;  %v718_v49 = vpop.f32.mrb[3].mxu0  ;;  %v765_v10 = vpop.f32.mrb[0].mxu1  ;;  %v5426_v46 = vld [vmem:[#allocation6 + $0x2a8] ss:$16 sps:$4 sm:$0xff]  }
 0x1ca   : > { %v719_v51 = vadd.f32 %v718_v49, %v493_v44  ;;  %v766_v12 = vadd.f32 %v765_v10, %v497_v63  ;;  %v767_v13 = vpop.f32.mrb[1].mxu1  ;;  %v5434_v49 = vld [vmem:[#allocation6 + $0x2cc] ss:$16 sps:$4 sm:$0xff]   ;;  %v5467_v10 = vld [vmem:[#allocation6 + $0x384] ss:$16 sps:$4 sm:$0xff]  }
 0x1cb   : > { %v784_v52 = vpack.c.bf16 %v717_v48, %v713_v47  ;;  %v768_v17 = vadd.f32 %v767_v13, %v501_v4  ;;  %v769_v18 = vpop.f32.mrb[2].mxu1  ;;  %v5431_v48 = vld [vmem:[#allocation6 + $0x2c4] ss:$16 sps:$4 sm:$0xff]   ;;  %v5468_v13 = vld [vmem:[#allocation6 + $0x388] ss:$16 sps:$4 sm:$0xff]  }
 0x1cc   : > { %v785_v54 = vpack.c.bf16 %v719_v51, %v715_v50  ;;  %v770_v21 = vadd.f32 %v769_v18, %v497_v63  ;;  %v771_v22 = vpop.f32.mrb[3].mxu1  ;;  %v5429_v50 = vld [vmem:[#allocation6 + $0x2c0] ss:$16 sps:$4 sm:$0xff]   ;;  %v5432_v51 = vld [vmem:[#allocation6 + $0x2c8] ss:$16 sps:$4 sm:$0xff]  }
 0x1cd   : > { %v772_v23 = vadd.f32 %v771_v22, %v501_v4  ;;  %v5479_v18 = vld [vmem:[#allocation6 + $0x3c4] ss:$16 sps:$4 sm:$0xff]  }
 0x1ce   : > { %1614 = vmatprep.mubr.bf16.mxu0 %v785_v54  ;;  %1720 = vmatprep.mubr.bf16.mxu1 %v785_v54  ;;  %v722_v60 = vpop.f32.mrb[4].mxu0  ;;  %v6560_v24 = vpack.c.bf16 %v770_v21, %v766_v12  ;;  %v5440_v54 = vld [vmem:[#allocation6 + $0x2ec] ss:$16 sps:$4 sm:$0xff]   ;;  %v5465_v12 = vld [vmem:[#allocation6 + $0x380] ss:$16 sps:$4 sm:$0xff]  }
 0x1cf   : > { %1615 = vmatmul.mubr.bf16.vlgmr.msra.gmra.mrb[8].mxu0 %v784_v52  ;;  %1721 = vmatmul.mubr.bf16.vlgmr.msra.gmra.mrb[8].mxu1 %v784_v52  ;;  %v723_v61 = vadd.f32 %v722_v60, %v489_v42  ;;  %v724_v62 = vpop.f32.mrb[5].mxu0  ;;  %v787_v27 = vpack.c.bf16 %v772_v23, %v768_v17  ;;  %v5437_v52 = vld [vmem:[#allocation6 + $0x2e4] ss:$16 sps:$4 sm:$0xff]   ;;  %v5441_v60 = vld [vmem:[#allocation6 + $0x300] ss:$16 sps:$4 sm:$0xff]  }
 0x1d0   : > { %1636 = vmatpush1.bf16.msra.mxu0 %v5393_v55  ;;  %1742 = vmatpush1.bf16.msra.mxu1 %v5396_v56  ;;  %v725_v2 = vadd.f32 %v724_v62, %v493_v44  ;;  %v726_v3 = vpop.f32.mrb[6].mxu0  ;;  %v5435_v55 = vld [vmem:[#allocation6 + $0x2e0] ss:$16 sps:$4 sm:$0xff]   ;;  %v5438_v56 = vld [vmem:[#allocation6 + $0x2e8] ss:$16 sps:$4 sm:$0xff]  }
 0x1d1   : > { %1637 = vmatprep.subr.bf16.mxu0 %v5401_v58  ;;  %1743 = vmatprep.subr.bf16.mxu1 %v5404_v59  ;;  %v727_v7 = vadd.f32 %v726_v3, %v489_v42  ;;  %v728_v8 = vpop.f32.mrb[7].mxu0  ;;  %v775_v30 = vpop.f32.mrb[4].mxu1  ;;  %v5443_v58 = vld [vmem:[#allocation6 + $0x304] ss:$16 sps:$4 sm:$0xff]   ;;  %v5446_v59 = vld [vmem:[#allocation6 + $0x30c] ss:$16 sps:$4 sm:$0xff]  }
 0x1d2   : > { %v729_v9 = vadd.f32 %v728_v8, %v493_v44  ;;  %v776_v31 = vadd.f32 %v775_v30, %v497_v63  ;;  %v777_v32 = vpop.f32.mrb[5].mxu1  ;;  %v5449_v62 = vld [vmem:[#allocation6 + $0x324] ss:$16 sps:$4 sm:$0xff]   ;;  %v5458_v3 = vld [vmem:[#allocation6 + $0x34c] ss:$16 sps:$4 sm:$0xff]  }
 0x1d3   : > { %v788_v11 = vpack.c.bf16 %v727_v7, %v723_v61  ;;  %v778_v35 = vadd.f32 %v777_v32, %v501_v4  ;;  %v779_v36 = vpop.f32.mrb[6].mxu1  ;;  %v5444_v61 = vld [vmem:[#allocation6 + $0x308] ss:$16 sps:$4 sm:$0xff]   ;;  %v5464_v7 = vld [vmem:[#allocation6 + $0x36c] ss:$16 sps:$4 sm:$0xff]  }
 0x1d4   : > { %1638 = vmatpush1.bf16.msra.mxu0 %v5399_v0  ;;  %1744 = vmatpush1.bf16.msra.mxu1 %v5402_v1  ;;  %v789_v16 = vpack.c.bf16 %v729_v9, %v725_v2  ;;  %v780_v40 = vadd.f32 %v779_v36, %v497_v63  ;;  %v781_v42 = vpop.f32.mrb[7].mxu1  ;;  %v5452_v63 = vld [vmem:[#allocation6 + $0x32c] ss:$16 sps:$4 sm:$0xff]   ;;  %v5447_v0 = vld [vmem:[#allocation6 + $0x320] ss:$16 sps:$4 sm:$0xff]  }
 0x1d5   : > { %1639 = vmatprep.subr.bf16.mxu0 %v5407_v5  ;;  %1745 = vmatprep.subr.bf16.mxu1 %v5410_v6  ;;  %v782_v43 = vadd.f32 %v781_v42, %v501_v4  ;;  %v5450_v1 = vld [vmem:[#allocation6 + $0x328] ss:$16 sps:$4 sm:$0xff]   ;;  %v5455_v2 = vld [vmem:[#allocation6 + $0x344] ss:$16 sps:$4 sm:$0xff]   ;;  %v5453_v4 = vld [vmem:[#allocation6 + $0x340] ss:$16 sps:$4 sm:$0xff]  }
 0x1d6   : > { %1624 = vmatprep.mubr.bf16.mxu0 %v789_v16  ;;  %1730 = vmatprep.mubr.bf16.mxu1 %v789_v16  ;;  %v6562_v44 = vpack.c.bf16 %v780_v40, %v776_v31  ;;  %v5456_v5 = vld [vmem:[#allocation6 + $0x348] ss:$16 sps:$4 sm:$0xff]   ;;  %v5461_v6 = vld [vmem:[#allocation6 + $0x364] ss:$16 sps:$4 sm:$0xff]   ;;  %v5459_v8 = vld [vmem:[#allocation6 + $0x360] ss:$16 sps:$4 sm:$0xff]  }
 0x1d7   : > { %1625 = vmatmul.mubr.bf16.gmra.mrb[12].mxu0 %v788_v11  ;;  %1731 = vmatmul.mubr.bf16.gmra.mrb[12].mxu1 %v788_v11  ;;  %v6564_v47 = vpack.c.bf16 %v782_v43, %v778_v35  ;;  %v5462_v9 = vld [vmem:[#allocation6 + $0x368] ss:$16 sps:$4 sm:$0xff]   ;;  %v5470_v11 = vld [vmem:[#allocation6 + $0x38c] ss:$16 sps:$4 sm:$0xff]   ;;  %v5471_v16 = vld [vmem:[#allocation6 + $0x3a0] ss:$16 sps:$4 sm:$0xff]  }
 0x1d8   : > { %1640 = vmatpush1.bf16.msra.mxu0 %v5405_v14  ;;  %1746 = vmatpush1.bf16.msra.mxu1 %v5408_v15  ;;  %v5473_v14 = vld [vmem:[#allocation6 + $0x3a4] ss:$16 sps:$4 sm:$0xff]   ;;  %v5476_v15 = vld [vmem:[#allocation6 + $0x3ac] ss:$16 sps:$4 sm:$0xff]   ;;  %v5474_v17 = vld [vmem:[#allocation6 + $0x3a8] ss:$16 sps:$4 sm:$0xff]  }
 0x1d9   : > { %1641 = vmatprep.subr.bf16.mxu0 %v5413_v19  ;;  %1747 = vmatprep.subr.bf16.mxu1 %v5416_v20  ;;  %v5482_v19 = vld [vmem:[#allocation6 + $0x3cc] ss:$16 sps:$4 sm:$0xff]   ;;  %v5477_v20 = vld [vmem:[#allocation6 + $0x3c0] ss:$16 sps:$4 sm:$0xff]   ;;  %v5480_v21 = vld [vmem:[#allocation6 + $0x3c8] ss:$16 sps:$4 sm:$0xff]  }
 0x1da   : > { %1667 = vmatprep.mubr.bf16.mxu0 %v787_v27  ;;  %1773 = vmatprep.mubr.bf16.mxu1 %v787_v27  ;;  %v5485_v22 = vld [vmem:[#allocation6 + $0x3e4] ss:$16 sps:$4 sm:$0xff]   ;;  %v5488_v23 = vld [vmem:[#allocation6 + $0x3ec] ss:$16 sps:$4 sm:$0xff]   ;;  %v5492_v30 = vld [vmem:[#allocation6 + $0x408] ss:$16 sps:$4 sm:$0xff]  }
 0x1db   : > { %v5491_v27 = vld [vmem:[#allocation6 + $0x404] ss:$16 sps:$4 sm:$0xff]   ;;  %v5500_v32 = vld [vmem:[#allocation6 + $0x42c] ss:$16 sps:$4 sm:$0xff]   ;;  %v5507_v42 = vld [vmem:[#allocation6 + $0x460] ss:$16 sps:$4 sm:$0xff]  }
 0x1dc   : > { %1642 = vmatpush1.bf16.msra.mxu0 %v5411_v25  ;;  %1748 = vmatpush1.bf16.msra.mxu1 %v5414_v26  ;;  %v5483_v25 = vld [vmem:[#allocation6 + $0x3e0] ss:$16 sps:$4 sm:$0xff]   ;;  %v5486_v26 = vld [vmem:[#allocation6 + $0x3e8] ss:$16 sps:$4 sm:$0xff]   ;;  %v5497_v31 = vld [vmem:[#allocation6 + $0x424] ss:$16 sps:$4 sm:$0xff]  }
 0x1dd   : > { %1643 = vmatprep.subr.bf16.mxu0 %v5419_v28  ;;  %1749 = vmatprep.subr.bf16.mxu1 %v5422_v29  ;;  %v5494_v28 = vld [vmem:[#allocation6 + $0x40c] ss:$16 sps:$4 sm:$0xff]   ;;  %v5489_v29 = vld [vmem:[#allocation6 + $0x400] ss:$16 sps:$4 sm:$0xff]   ;;  %v5503_v35 = vld [vmem:[#allocation6 + $0x444] ss:$16 sps:$4 sm:$0xff]  }
 0x1de   : > { %v5506_v36 = vld [vmem:[#allocation6 + $0x44c] ss:$16 sps:$4 sm:$0xff]   ;;  %v5509_v40 = vld [vmem:[#allocation6 + $0x464] ss:$16 sps:$4 sm:$0xff]   ;;  %v5510_v43 = vld [vmem:[#allocation6 + $0x468] ss:$16 sps:$4 sm:$0xff]  }
 0x1e0   : > { %1644 = vmatpush1.bf16.msra.mxu0 %v5417_v33  ;;  %1750 = vmatpush1.bf16.msra.mxu1 %v5420_v34  ;;  %v5495_v33 = vld [vmem:[#allocation6 + $0x420] ss:$16 sps:$4 sm:$0xff]   ;;  %v5498_v34 = vld [vmem:[#allocation6 + $0x428] ss:$16 sps:$4 sm:$0xff]  }
 0x1e1   : > { %1645 = vmatprep.subr.bf16.mxu0 %v5425_v37  ;;  %1751 = vmatprep.subr.bf16.mxu1 %v5428_v38  ;;  %v5501_v37 = vld [vmem:[#allocation6 + $0x440] ss:$16 sps:$4 sm:$0xff]   ;;  %v5504_v38 = vld [vmem:[#allocation6 + $0x448] ss:$16 sps:$4 sm:$0xff]  }
 0x1e4   : > { %1646 = vmatpush1.bf16.msra.mxu0 %v5423_v45  ;;  %1752 = vmatpush1.bf16.msra.mxu1 %v5426_v46  ;;  %v5515_v45 = vld [vmem:[#allocation6 + $0x484] ss:$16 sps:$4 sm:$0xff]   ;;  %v5518_v46 = vld [vmem:[#allocation6 + $0x48c] ss:$16 sps:$4 sm:$0xff]  }
 0x1e5   : > { %1647 = vmatprep.subr.bf16.mxu0 %v5431_v48  ;;  %1753 = vmatprep.subr.bf16.mxu1 %v5434_v49  ;;  %v5516_v48 = vld [vmem:[#allocation6 + $0x488] ss:$16 sps:$4 sm:$0xff]   ;;  %v5521_v49 = vld [vmem:[#allocation6 + $0x4a4] ss:$16 sps:$4 sm:$0xff]  }
 0x1e8   : > { %1648 = vmatpush1.bf16.msra.mxu0 %v5429_v50  ;;  %1754 = vmatpush1.bf16.msra.mxu1 %v5432_v51  ;;  %v5524_v50 = vld [vmem:[#allocation6 + $0x4ac] ss:$16 sps:$4 sm:$0xff]   ;;  %v5519_v51 = vld [vmem:[#allocation6 + $0x4a0] ss:$16 sps:$4 sm:$0xff]  }
 0x1e9   : > { %1649 = vmatprep.subr.bf16.mxu0 %v5437_v52  ;;  %1755 = vmatprep.subr.bf16.mxu1 %v5440_v54  ;;  %v5527_v52 = vld [vmem:[#allocation6 + $0x4c4] ss:$16 sps:$4 sm:$0xff]   ;;  %v5530_v54 = vld [vmem:[#allocation6 + $0x4cc] ss:$16 sps:$4 sm:$0xff]  }
 0x1ec   : > { %1650 = vmatpush1.bf16.msra.mxu0 %v5435_v55  ;;  %1756 = vmatpush1.bf16.msra.mxu1 %v5438_v56  ;;  %v5525_v55 = vld [vmem:[#allocation6 + $0x4c0] ss:$16 sps:$4 sm:$0xff]   ;;  %v5528_v56 = vld [vmem:[#allocation6 + $0x4c8] ss:$16 sps:$4 sm:$0xff]  }
 0x1ed   : > { %1651 = vmatprep.subr.bf16.mxu0 %v5443_v58  ;;  %1757 = vmatprep.subr.bf16.mxu1 %v5446_v59  ;;  %v5533_v58 = vld [vmem:[#allocation6 + $0x4e4] ss:$16 sps:$4 sm:$0xff]   ;;  %v5536_v59 = vld [vmem:[#allocation6 + $0x4ec] ss:$16 sps:$4 sm:$0xff]  }
 0x1f0   : > { %1652 = vmatpush1.bf16.msra.mxu0 %v5441_v60  ;;  %1758 = vmatpush1.bf16.msra.mxu1 %v5444_v61  ;;  %v5531_v60 = vld [vmem:[#allocation6 + $0x4e0] ss:$16 sps:$4 sm:$0xff]   ;;  %v5534_v61 = vld [vmem:[#allocation6 + $0x4e8] ss:$16 sps:$4 sm:$0xff]  }
 0x1f1   : > { %1653 = vmatprep.subr.bf16.mxu0 %v5449_v62  ;;  %1759 = vmatprep.subr.bf16.mxu1 %v5452_v63  ;;  %v5539_v62 = vld [vmem:[#allocation6 + $0x504] ss:$16 sps:$4 sm:$0xff]   ;;  %v5542_v63 = vld [vmem:[#allocation6 + $0x50c] ss:$16 sps:$4 sm:$0xff]  }
 0x1f4   : > { %1654 = vmatpush1.bf16.msra.mxu0 %v5447_v0  ;;  %1760 = vmatpush1.bf16.msra.mxu1 %v5450_v1  ;;  %v5537_v0 = vld [vmem:[#allocation6 + $0x500] ss:$16 sps:$4 sm:$0xff]   ;;  %v5540_v1 = vld [vmem:[#allocation6 + $0x508] ss:$16 sps:$4 sm:$0xff]  }
 0x1f5   : > { %1655 = vmatprep.subr.bf16.mxu0 %v5455_v2  ;;  %1761 = vmatprep.subr.bf16.mxu1 %v5458_v3  ;;  %v5545_v2 = vld [vmem:[#allocation6 + $0x524] ss:$16 sps:$4 sm:$0xff]   ;;  %v5548_v3 = vld [vmem:[#allocation6 + $0x52c] ss:$16 sps:$4 sm:$0xff]  }
 0x1f8   : > { %1656 = vmatpush1.bf16.msra.mxu0 %v5453_v4  ;;  %1762 = vmatpush1.bf16.msra.mxu1 %v5456_v5  ;;  %v5543_v4 = vld [vmem:[#allocation6 + $0x520] ss:$16 sps:$4 sm:$0xff]   ;;  %v5546_v5 = vld [vmem:[#allocation6 + $0x528] ss:$16 sps:$4 sm:$0xff]  }
 0x1f9   : > { %1657 = vmatprep.subr.bf16.mxu0 %v5461_v6  ;;  %1763 = vmatprep.subr.bf16.mxu1 %v5464_v7  ;;  %v5551_v6 = vld [vmem:[#allocation6 + $0x544] ss:$16 sps:$4 sm:$0xff]   ;;  %v5554_v7 = vld [vmem:[#allocation6 + $0x54c] ss:$16 sps:$4 sm:$0xff]  }
 0x1fc   : > { %1658 = vmatpush1.bf16.msra.mxu0 %v5459_v8  ;;  %1764 = vmatpush1.bf16.msra.mxu1 %v5462_v9  ;;  %v5549_v8 = vld [vmem:[#allocation6 + $0x540] ss:$16 sps:$4 sm:$0xff]   ;;  %v5552_v9 = vld [vmem:[#allocation6 + $0x548] ss:$16 sps:$4 sm:$0xff]  }
 0x1fd   : > { %1659 = vmatprep.subr.bf16.mxu0 %v5467_v10  ;;  %1765 = vmatprep.subr.bf16.mxu1 %v5470_v11  ;;  %v5557_v10 = vld [vmem:[#allocation6 + $0x564] ss:$16 sps:$4 sm:$0xff]   ;;  %v5560_v11 = vld [vmem:[#allocation6 + $0x56c] ss:$16 sps:$4 sm:$0xff]  }
 0x200   : > { %1660 = vmatpush1.bf16.msra.mxu0 %v5465_v12  ;;  %1766 = vmatpush1.bf16.msra.mxu1 %v5468_v13  ;;  %v5555_v12 = vld [vmem:[#allocation6 + $0x560] ss:$16 sps:$4 sm:$0xff]   ;;  %v5558_v13 = vld [vmem:[#allocation6 + $0x568] ss:$16 sps:$4 sm:$0xff]  }
 0x201   : > { %1661 = vmatprep.subr.bf16.mxu0 %v5473_v14  ;;  %1767 = vmatprep.subr.bf16.mxu1 %v5476_v15  ;;  %v5563_v14 = vld [vmem:[#allocation6 + $0x584] ss:$16 sps:$4 sm:$0xff]   ;;  %v5566_v15 = vld [vmem:[#allocation6 + $0x58c] ss:$16 sps:$4 sm:$0xff]  }
 0x204   : > { %1662 = vmatpush1.bf16.msra.mxu0 %v5471_v16  ;;  %1768 = vmatpush1.bf16.msra.mxu1 %v5474_v17  ;;  %v5561_v16 = vld [vmem:[#allocation6 + $0x580] ss:$16 sps:$4 sm:$0xff]   ;;  %v5564_v17 = vld [vmem:[#allocation6 + $0x588] ss:$16 sps:$4 sm:$0xff]  }
 0x205   : > { %1663 = vmatprep.subr.bf16.mxu0 %v5479_v18  ;;  %1769 = vmatprep.subr.bf16.mxu1 %v5482_v19  ;;  %v5569_v18 = vld [vmem:[#allocation6 + $0x5a4] ss:$16 sps:$4 sm:$0xff]   ;;  %v5572_v19 = vld [vmem:[#allocation6 + $0x5ac] ss:$16 sps:$4 sm:$0xff]  }
 0x208   : > { %1664 = vmatpush1.bf16.msra.mxu0 %v5477_v20  ;;  %1770 = vmatpush1.bf16.msra.mxu1 %v5480_v21  ;;  %v5567_v20 = vld [vmem:[#allocation6 + $0x5a0] ss:$16 sps:$4 sm:$0xff]   ;;  %v5570_v21 = vld [vmem:[#allocation6 + $0x5a8] ss:$16 sps:$4 sm:$0xff]  }
 0x209   : > { %1665 = vmatprep.subr.bf16.mxu0 %v5485_v22  ;;  %1771 = vmatprep.subr.bf16.mxu1 %v5488_v23  ;;  %v5575_v22 = vld [vmem:[#allocation6 + $0x5c4] ss:$16 sps:$4 sm:$0xff]   ;;  %v5578_v23 = vld [vmem:[#allocation6 + $0x5cc] ss:$16 sps:$4 sm:$0xff]  }
 0x20c   : > { %1666 = vmatpush1.bf16.msra.mxu0 %v5483_v25  ;;  %1772 = vmatpush1.bf16.msra.mxu1 %v5486_v26  ;;  %v5573_v25 = vld [vmem:[#allocation6 + $0x5c0] ss:$16 sps:$4 sm:$0xff]   ;;  %v5576_v26 = vld [vmem:[#allocation6 + $0x5c8] ss:$16 sps:$4 sm:$0xff]  }
 0x20d   : > { %2610 = vmatprep.subr.bf16.mxu0 %v5491_v27  ;;  %2716 = vmatprep.subr.bf16.mxu1 %v5494_v28  ;;  %v5581_v27 = vld [vmem:[#allocation6 + $0x5e4] ss:$16 sps:$4 sm:$0xff]   ;;  %v5584_v28 = vld [vmem:[#allocation6 + $0x5ec] ss:$16 sps:$4 sm:$0xff]  }
 0x20f   : > { %1668 = vmatmul.mubr.bf16.vlgmr.msra.gmra.mrb[8].mxu0 %v6560_v24  ;;  %1774 = vmatmul.mubr.bf16.vlgmr.msra.gmra.mrb[8].mxu1 %v6560_v24  ;;  %v5512_v24 = vld [vmem:[#allocation6 + $0x46c] ss:$16 sps:$4 sm:$0xff]  }
 0x210   : > { %1677 = vmatprep.mubr.bf16.mxu0 %v6564_v47  ;;  %1783 = vmatprep.mubr.bf16.mxu1 %v6564_v47  ;;  %v5513_v47 = vld [vmem:[#allocation6 + $0x480] ss:$16 sps:$4 sm:$0xff]  }
 0x211   : > { %2611 = vmatpush1.bf16.msra.mxu0 %v5489_v29  ;;  %2717 = vmatpush1.bf16.msra.mxu1 %v5492_v30  ;;  %v5579_v29 = vld [vmem:[#allocation6 + $0x5e0] ss:$16 sps:$4 sm:$0xff]   ;;  %v5582_v30 = vld [vmem:[#allocation6 + $0x5e8] ss:$16 sps:$4 sm:$0xff]  }
 0x212   : > { %2612 = vmatprep.subr.bf16.mxu0 %v5497_v31  ;;  %2718 = vmatprep.subr.bf16.mxu1 %v5500_v32  ;;  %v5587_v31 = vld [vmem:[#allocation6 + $0x604] ss:$16 sps:$4 sm:$0xff]   ;;  %v5590_v32 = vld [vmem:[#allocation6 + $0x60c] ss:$16 sps:$4 sm:$0xff]  }
 0x215   : > { %2613 = vmatpush1.bf16.msra.mxu0 %v5495_v33  ;;  %2719 = vmatpush1.bf16.msra.mxu1 %v5498_v34  ;;  %v920_v33 = vld [vmem:[#allocation7] sm:$0xf] }
 0x216   : > { %2614 = vmatprep.subr.bf16.mxu0 %v5503_v35  ;;  %2720 = vmatprep.subr.bf16.mxu1 %v5506_v36  ;;  %v925_v34 = vrot.slane %v920_v33, %v6548_v39  ;;  %v933_v35 = vrot.slane %v920_v33, %v6554_v53  ;;  %v929_v36 = vrot.slane %v920_v33, %v6550_v41 }
 0x217   : > { %1678 = vmatmul.mubr.bf16.gmra.mrb[12].mxu0 %v6562_v44  ;;  %1784 = vmatmul.mubr.bf16.gmra.mrb[12].mxu1 %v6562_v44  ;;  %v5522_v44 = vld [vmem:[#allocation6 + $0x4a8] ss:$16 sps:$4 sm:$0xff]  }
 0x219   : > { %2615 = vmatpush1.bf16.msra.mxu0 %v5501_v37  ;;  %2721 = vmatpush1.bf16.msra.mxu1 %v5504_v38  ;;  %v937_v37 = vrot.slane %v920_v33, %v6556_v57  ;;  %v5599_v33 = vld [vmem:[#allocation6 + $0x644] ss:$16 sps:$4 sm:$0xff]  }
 0x21a   : > { %2616 = vmatprep.subr.bf16.mxu0 %v5509_v40  ;;  %2722 = vmatprep.subr.bf16.mxu1 %v5512_v24 }
 0x21d   : > { %2617 = vmatpush1.bf16.msra.mxu0 %v5507_v42  ;;  %2723 = vmatpush1.bf16.msra.mxu1 %v5510_v43 }
 0x21e   : > { %2618 = vmatprep.subr.bf16.mxu0 %v5515_v45  ;;  %2724 = vmatprep.subr.bf16.mxu1 %v5518_v46 }
 0x221   : > { %2619 = vmatpush1.bf16.msra.mxu0 %v5513_v47  ;;  %2725 = vmatpush1.bf16.msra.mxu1 %v5516_v48 }
 0x222   : > { %2620 = vmatprep.subr.bf16.mxu0 %v5521_v49  ;;  %2726 = vmatprep.subr.bf16.mxu1 %v5524_v50 }
 0x225   : > { %2621 = vmatpush1.bf16.msra.mxu0 %v5519_v51  ;;  %2727 = vmatpush1.bf16.msra.mxu1 %v5522_v44 }
 0x226   : > { %2622 = vmatprep.subr.bf16.mxu0 %v5527_v52  ;;  %2728 = vmatprep.subr.bf16.mxu1 %v5530_v54 }
 0x229   : > { %2623 = vmatpush1.bf16.msra.mxu0 %v5525_v55  ;;  %2729 = vmatpush1.bf16.msra.mxu1 %v5528_v56 }
 0x22a   : > { %2624 = vmatprep.subr.bf16.mxu0 %v5533_v58  ;;  %2730 = vmatprep.subr.bf16.mxu1 %v5536_v59 }
 0x22d   : > { %2625 = vmatpush1.bf16.msra.mxu0 %v5531_v60  ;;  %2731 = vmatpush1.bf16.msra.mxu1 %v5534_v61 }
 0x22e   : > { %2626 = vmatprep.subr.bf16.mxu0 %v5539_v62  ;;  %2732 = vmatprep.subr.bf16.mxu1 %v5542_v63 }
 0x231   : > { %2627 = vmatpush1.bf16.msra.mxu0 %v5537_v0  ;;  %2733 = vmatpush1.bf16.msra.mxu1 %v5540_v1 }
 0x232   : > { %2628 = vmatprep.subr.bf16.mxu0 %v5545_v2  ;;  %2734 = vmatprep.subr.bf16.mxu1 %v5548_v3 }
 0x235   : > { %2629 = vmatpush1.bf16.msra.mxu0 %v5543_v4  ;;  %2735 = vmatpush1.bf16.msra.mxu1 %v5546_v5 }
 0x236   : > { %2630 = vmatprep.subr.bf16.mxu0 %v5551_v6  ;;  %2736 = vmatprep.subr.bf16.mxu1 %v5554_v7 }
 0x239   : > { %2631 = vmatpush1.bf16.msra.mxu0 %v5549_v8  ;;  %2737 = vmatpush1.bf16.msra.mxu1 %v5552_v9 }
 0x23a   : > { %2632 = vmatprep.subr.bf16.mxu0 %v5557_v10  ;;  %2738 = vmatprep.subr.bf16.mxu1 %v5560_v11 }
 0x23d   : > { %2633 = vmatpush1.bf16.msra.mxu0 %v5555_v12  ;;  %2739 = vmatpush1.bf16.msra.mxu1 %v5558_v13 }
 0x23e   : > { %2634 = vmatprep.subr.bf16.mxu0 %v5563_v14  ;;  %2740 = vmatprep.subr.bf16.mxu1 %v5566_v15 }
 0x241   : > { %2635 = vmatpush1.bf16.msra.mxu0 %v5561_v16  ;;  %2741 = vmatpush1.bf16.msra.mxu1 %v5564_v17 }
 0x242   : > { %2636 = vmatprep.subr.bf16.mxu0 %v5569_v18  ;;  %2742 = vmatprep.subr.bf16.mxu1 %v5572_v19 }
 0x245   : > { %2637 = vmatpush1.bf16.msra.mxu0 %v5567_v20  ;;  %2743 = vmatpush1.bf16.msra.mxu1 %v5570_v21  ;;  %v5585_v20 = vld [vmem:[#allocation6 + $0x600] ss:$16 sps:$4 sm:$0xff]   ;;  %v5588_v21 = vld [vmem:[#allocation6 + $0x608] ss:$16 sps:$4 sm:$0xff]  }
 0x246   : > { %2638 = vmatprep.subr.bf16.mxu0 %v5575_v22  ;;  %2744 = vmatprep.subr.bf16.mxu1 %v5578_v23  ;;  %v5593_v23 = vld [vmem:[#allocation6 + $0x624] ss:$16 sps:$4 sm:$0xff]  }
 0x249   : > { %2639 = vmatpush1.bf16.msra.mxu0 %v5573_v25  ;;  %2745 = vmatpush1.bf16.msra.mxu1 %v5576_v26  ;;  %v5596_v25 = vld [vmem:[#allocation6 + $0x62c] ss:$16 sps:$4 sm:$0xff]  }
 0x24a   : > { %2640 = vmatprep.subr.bf16.mxu0 %v5581_v27  ;;  %2746 = vmatprep.subr.bf16.mxu1 %v5584_v28 }
 0x24d   : > { %2641 = vmatpush1.bf16.msra.mxu0 %v5579_v29  ;;  %2747 = vmatpush1.bf16.msra.mxu1 %v5582_v30  ;;  %v5591_v30 = vld [vmem:[#allocation6 + $0x620] ss:$16 sps:$4 sm:$0xff]  }
 0x24e   : > { %2663 = vmatprep.subr.bf16.mxu0 %v5587_v31  ;;  %2769 = vmatprep.subr.bf16.mxu1 %v5590_v32  ;;  %v5594_v31 = vld [vmem:[#allocation6 + $0x628] ss:$16 sps:$4 sm:$0xff]  }
 0x2e2   : > { %v1669_v38 = vpop.f32.mrb[8].mxu0  ;;  %v1775_v40 = vpop.f32.mrb[8].mxu1 }
 0x2e3   : > { %v5057_v24 = vadd.f32 %v1669_v38, %v925_v34  ;;  %v5065_v42 = vadd.f32 %v1775_v40, %v933_v35  ;;  %v1671_v43 = vpop.f32.mrb[9].mxu0  ;;  %v1777_v45 = vpop.f32.mrb[9].mxu1 }
 0x2e4   : > { %v5058_v46 = vadd.f32 %v1671_v43, %v929_v36  ;;  %v5066_v47 = vadd.f32 %v1777_v45, %v937_v37  ;;  %v1673_v48 = vpop.f32.mrb[10].mxu0  ;;  %v1779_v49 = vpop.f32.mrb[10].mxu1  ;;  %v5600_v43 = vld [vmem:[#allocation6 + $0x648] ss:$16 sps:$4 sm:$0xff]  }
 0x2e5   : > { %5913 = vtanh.f32 %v5057_v24  ;;  %v5059_v50 = vadd.f32 %v1673_v48, %v925_v34  ;;  %v1675_v51 = vpop.f32.mrb[11].mxu0  ;;  %v1781_v44 = vpop.f32.mrb[11].mxu1  ;;  %v5067_v52 = vadd.f32 %v1779_v49, %v933_v35  ;;  %v5603_v48 = vld [vmem:[#allocation6 + $0x660] ss:$16 sps:$4 sm:$0xff]   ;;  %v5606_v49 = vld [vmem:[#allocation6 + $0x668] ss:$16 sps:$4 sm:$0xff]  }
 0x2e6   : > { %5915 = vtanh.f32 %v5065_v42  ;;  %v5060_v54 = vadd.f32 %v1675_v51, %v929_v36  ;;  %v5068_v55 = vadd.f32 %v1781_v44, %v937_v37  ;;  %v5597_v42 = vld [vmem:[#allocation6 + $0x640] ss:$16 sps:$4 sm:$0xff]   ;;  %v5614_v51 = vld [vmem:[#allocation6 + $0x68c] ss:$16 sps:$4 sm:$0xff]  }
 0x2e7   : > { %5917 = vtanh.f32 %v5058_v46  ;;  %v5605_v46 = vld [vmem:[#allocation6 + $0x664] ss:$16 sps:$4 sm:$0xff]   ;;  %v5609_v44 = vld [vmem:[#allocation6 + $0x680] ss:$16 sps:$4 sm:$0xff]  }
 0x2e8   : > { %5919 = vtanh.f32 %v5066_v47  ;;  %v5608_v47 = vld [vmem:[#allocation6 + $0x66c] ss:$16 sps:$4 sm:$0xff]  }
 0x2e9   : > { %5921 = vtanh.f32 %v5059_v50  ;;  %v5611_v50 = vld [vmem:[#allocation6 + $0x684] ss:$16 sps:$4 sm:$0xff]  }
 0x2ea   : > { %5923 = vtanh.f32 %v5067_v52  ;;  %v1679_v56 = vpop.f32.mrb[12].mxu0  ;;  %v1785_v58 = vpop.f32.mrb[12].mxu1  ;;  %v5612_v52 = vld [vmem:[#allocation6 + $0x688] ss:$16 sps:$4 sm:$0xff]  }
 0x2eb   : > { %5925 = vtanh.f32 %v5060_v54  ;;  %v5061_v59 = vadd.f32 %v1679_v56, %v925_v34  ;;  %v5069_v60 = vadd.f32 %v1785_v58, %v933_v35  ;;  %v1681_v61 = vpop.f32.mrb[13].mxu0  ;;  %v1787_v62 = vpop.f32.mrb[13].mxu1  ;;  %v5617_v54 = vld [vmem:[#allocation6 + $0x6a4] ss:$16 sps:$4 sm:$0xff]   ;;  %v5615_v56 = vld [vmem:[#allocation6 + $0x6a0] ss:$16 sps:$4 sm:$0xff]  }
 0x2ec   : > { %5927 = vtanh.f32 %v5068_v55  ;;  %v5062_v63 = vadd.f32 %v1681_v61, %v929_v36  ;;  %v5070_v0 = vadd.f32 %v1787_v62, %v937_v37  ;;  %v1683_v1 = vpop.f32.mrb[14].mxu0  ;;  %v1789_v2 = vpop.f32.mrb[14].mxu1  ;;  %v5620_v55 = vld [vmem:[#allocation6 + $0x6ac] ss:$16 sps:$4 sm:$0xff]   ;;  %v5618_v58 = vld [vmem:[#allocation6 + $0x6a8] ss:$16 sps:$4 sm:$0xff]  }
 0x2ed   : > { %5929 = vtanh.f32 %v5061_v59  ;;  %v5063_v3 = vadd.f32 %v1683_v1, %v925_v34  ;;  %v1685_v4 = vpop.f32.mrb[15].mxu0  ;;  %v1791_v5 = vpop.f32.mrb[15].mxu1  ;;  %v5071_v6 = vadd.f32 %v1789_v2, %v933_v35  ;;  %v5602_v34 = vld [vmem:[#allocation6 + $0x64c] ss:$16 sps:$4 sm:$0xff]   ;;  %v5623_v59 = vld [vmem:[#allocation6 + $0x6c4] ss:$16 sps:$4 sm:$0xff]  }
 0x2ee   : > { %5931 = vtanh.f32 %v5069_v60  ;;  %v5064_v8 = vadd.f32 %v1685_v4, %v929_v36  ;;  %v5072_v10 = vadd.f32 %v1791_v5, %v937_v37  ;;  %v5626_v60 = vld [vmem:[#allocation6 + $0x6cc] ss:$16 sps:$4 sm:$0xff]   ;;  %v5621_v61 = vld [vmem:[#allocation6 + $0x6c0] ss:$16 sps:$4 sm:$0xff]   ;;  %v5624_v62 = vld [vmem:[#allocation6 + $0x6c8] ss:$16 sps:$4 sm:$0xff]  }
 0x2ef   : > { %v5914_v7 = vpop.eup %5913  ;;  %5933 = vtanh.f32 %v5062_v63  ;;  %v5629_v63 = vld [vmem:[#allocation6 + $0x6e4] ss:$16 sps:$4 sm:$0xff]   ;;  %v5627_v1 = vld [vmem:[#allocation6 + $0x6e0] ss:$16 sps:$4 sm:$0xff]   ;;  %v5630_v2 = vld [vmem:[#allocation6 + $0x6e8] ss:$16 sps:$4 sm:$0xff]  }
 0x2f0   : > { %v5916_v9 = vpop.eup %5915  ;;  %5935 = vtanh.f32 %v5070_v0  ;;  %v5632_v0 = vld [vmem:[#allocation6 + $0x6ec] ss:$16 sps:$4 sm:$0xff]   ;;  %v5633_v5 = vld [vmem:[#allocation6 + $0x700] ss:$16 sps:$4 sm:$0xff]  }
 0x2f1   : > { %v5918_v11 = vpop.eup %5917  ;;  %5937 = vtanh.f32 %v5063_v3  ;;  %v5635_v3 = vld [vmem:[#allocation6 + $0x704] ss:$16 sps:$4 sm:$0xff]   ;;  %v5638_v4 = vld [vmem:[#allocation6 + $0x70c] ss:$16 sps:$4 sm:$0xff]  }
 0x2f2   : > { %v5920_v12 = vpop.eup %5919  ;;  %5939 = vtanh.f32 %v5071_v6  ;;  %v5636_v6 = vld [vmem:[#allocation6 + $0x708] ss:$16 sps:$4 sm:$0xff]  }
 0x2f3   : > { %v5922_v13 = vpop.eup %5921  ;;  %5941 = vtanh.f32 %v5064_v8  ;;  %v5644_v8 = vld [vmem:[#allocation6 + $0x72c] ss:$16 sps:$4 sm:$0xff]  }
 0x2f4   : > { %v5924_v14 = vpop.eup %5923  ;;  %5943 = vtanh.f32 %v5072_v10  ;;  %v1810_v15 = vpack.c.bf16 %v5922_v13, %v5914_v7  ;;  %v5641_v7 = vld [vmem:[#allocation6 + $0x724] ss:$16 sps:$4 sm:$0xff]   ;;  %v5642_v10 = vld [vmem:[#allocation6 + $0x728] ss:$16 sps:$4 sm:$0xff]   ;;  %v5645_v13 = vld [vmem:[#allocation6 + $0x740] ss:$16 sps:$4 sm:$0xff]  }
 0x2f5   : > { %v5926_v16 = vpop.eup %5925  ;;  %v6576_v17 = vpack.c.bf16 %v5924_v14, %v5916_v9  ;;  %v5639_v9 = vld [vmem:[#allocation6 + $0x720] ss:$16 sps:$4 sm:$0xff]   ;;  %v5648_v14 = vld [vmem:[#allocation6 + $0x748] ss:$16 sps:$4 sm:$0xff]  }
 0x2f6   : > { %v5928_v18 = vpop.eup %5927  ;;  %v1811_v19 = vpack.c.bf16 %v5926_v16, %v5918_v11  ;;  %v5647_v11 = vld [vmem:[#allocation6 + $0x744] ss:$16 sps:$4 sm:$0xff]   ;;  %v5656_v16 = vld [vmem:[#allocation6 + $0x76c] ss:$16 sps:$4 sm:$0xff]  }
 0x2f7   : > { %v5930_v22 = vpop.eup %5929  ;;  %v1813_v26 = vpack.c.bf16 %v5928_v18, %v5920_v12  ;;  %v5650_v12 = vld [vmem:[#allocation6 + $0x74c] ss:$16 sps:$4 sm:$0xff]   ;;  %v5651_v18 = vld [vmem:[#allocation6 + $0x760] ss:$16 sps:$4 sm:$0xff]  }
 0x2f8   : > { %v5932_v27 = vpop.eup %5931  ;;  %2642 = vmatprep.mubr.bf16.mxu0 %v1811_v19  ;;  %2748 = vmatprep.mubr.bf16.mxu1 %v1811_v19  ;;  %v5654_v19 = vld [vmem:[#allocation6 + $0x768] ss:$16 sps:$4 sm:$0xff]  }
 0x2f9   : > { %v5934_v28 = vpop.eup %5933  ;;  %2643 = vmatmul.mubr.bf16.vlgmr.msra.gmra.mrb[16].mxu0 %v1810_v15  ;;  %2749 = vmatmul.mubr.bf16.vlgmr.msra.gmra.mrb[16].mxu1 %v1810_v15  ;;  %v5653_v15 = vld [vmem:[#allocation6 + $0x764] ss:$16 sps:$4 sm:$0xff]  }
 0x2fa   : > { %v5936_v29 = vpop.eup %5935  ;;  %2664 = vmatpush1.bf16.msra.mxu0 %v5585_v20  ;;  %2770 = vmatpush1.bf16.msra.mxu1 %v5588_v21  ;;  %v5659_v20 = vld [vmem:[#allocation6 + $0x784] ss:$16 sps:$4 sm:$0xff]   ;;  %v5662_v21 = vld [vmem:[#allocation6 + $0x78c] ss:$16 sps:$4 sm:$0xff]  }
 0x2fb   : > { %v5938_v32 = vpop.eup %5937  ;;  %2665 = vmatprep.subr.bf16.mxu0 %v5593_v23  ;;  %2771 = vmatprep.subr.bf16.mxu1 %v5596_v25  ;;  %v5660_v23 = vld [vmem:[#allocation6 + $0x788] ss:$16 sps:$4 sm:$0xff]   ;;  %v5665_v25 = vld [vmem:[#allocation6 + $0x7a4] ss:$16 sps:$4 sm:$0xff]  }
 0x2fc   : > { %v5940_v35 = vpop.eup %5939  ;;  %v1814_v36 = vpack.c.bf16 %v5938_v32, %v5930_v22  ;;  %v5657_v22 = vld [vmem:[#allocation6 + $0x780] ss:$16 sps:$4 sm:$0xff]   ;;  %v5672_v32 = vld [vmem:[#allocation6 + $0x7c8] ss:$16 sps:$4 sm:$0xff]  }
 0x2fd   : > { %v5942_v37 = vpop.eup %5941  ;;  %v6578_v38 = vpack.c.bf16 %v5940_v35, %v5932_v27  ;;  %v5663_v27 = vld [vmem:[#allocation6 + $0x7a0] ss:$16 sps:$4 sm:$0xff]  }
 0x2fe   : > { %v5944_v40 = vpop.eup %5943  ;;  %2666 = vmatpush1.bf16.msra.mxu0 %v5591_v30  ;;  %2772 = vmatpush1.bf16.msra.mxu1 %v5594_v31  ;;  %v1815_v24 = vpack.c.bf16 %v5942_v37, %v5934_v28  ;;  %v5666_v28 = vld [vmem:[#allocation6 + $0x7a8] ss:$16 sps:$4 sm:$0xff]   ;;  %v5674_v30 = vld [vmem:[#allocation6 + $0x7cc] ss:$16 sps:$4 sm:$0xff]   ;;  %v5669_v31 = vld [vmem:[#allocation6 + $0x7c0] ss:$16 sps:$4 sm:$0xff]  }
 0x2ff   : > { %2667 = vmatprep.subr.bf16.mxu0 %v5599_v33  ;;  %2773 = vmatprep.subr.bf16.mxu1 %v5602_v34  ;;  %v6580_v45 = vpack.c.bf16 %v5944_v40, %v5936_v29  ;;  %v5671_v29 = vld [vmem:[#allocation6 + $0x7c4] ss:$16 sps:$4 sm:$0xff]   ;;  %v5680_v34 = vld [vmem:[#allocation6 + $0x7ec] ss:$16 sps:$4 sm:$0xff]   ;;  %v5675_v35 = vld [vmem:[#allocation6 + $0x7e0] ss:$16 sps:$4 sm:$0xff]  }
 0x300   : > { %2652 = vmatprep.mubr.bf16.mxu0 %v1815_v24  ;;  %2758 = vmatprep.mubr.bf16.mxu1 %v1815_v24  ;;  %v5677_v33 = vld [vmem:[#allocation6 + $0x7e4] ss:$16 sps:$4 sm:$0xff]   ;;  %v5686_v40 = vld [vmem:[#allocation6 + $0x80c] ss:$16 sps:$4 sm:$0xff]   ;;  %v5681_v24 = vld [vmem:[#allocation6 + $0x800] ss:$16 sps:$4 sm:$0xff]  }
 0x301   : > { %2653 = vmatmul.mubr.bf16.gmra.mrb[20].mxu0 %v1814_v36  ;;  %2759 = vmatmul.mubr.bf16.gmra.mrb[20].mxu1 %v1814_v36  ;;  %v5678_v36 = vld [vmem:[#allocation6 + $0x7e8] ss:$16 sps:$4 sm:$0xff]   ;;  %v5683_v37 = vld [vmem:[#allocation6 + $0x804] ss:$16 sps:$4 sm:$0xff]  }
 0x302   : > { %2668 = vmatpush1.bf16.msra.mxu0 %v5597_v42  ;;  %2774 = vmatpush1.bf16.msra.mxu1 %v5600_v43  ;;  %v5684_v42 = vld [vmem:[#allocation6 + $0x808] ss:$16 sps:$4 sm:$0xff]   ;;  %v5689_v43 = vld [vmem:[#allocation6 + $0x824] ss:$16 sps:$4 sm:$0xff]  }
 0x303   : > { %2695 = vmatprep.mubr.bf16.mxu0 %v1813_v26  ;;  %2801 = vmatprep.mubr.bf16.mxu1 %v1813_v26  ;;  %v5668_v26 = vld [vmem:[#allocation6 + $0x7ac] ss:$16 sps:$4 sm:$0xff]  }
 0x304   : > { %2669 = vmatprep.subr.bf16.mxu0 %v5605_v46  ;;  %2775 = vmatprep.subr.bf16.mxu1 %v5608_v47  ;;  %v5692_v46 = vld [vmem:[#allocation6 + $0x82c] ss:$16 sps:$4 sm:$0xff]   ;;  %v5687_v47 = vld [vmem:[#allocation6 + $0x820] ss:$16 sps:$4 sm:$0xff]  }
 0x306   : > { %2670 = vmatpush1.bf16.msra.mxu0 %v5603_v48  ;;  %2776 = vmatpush1.bf16.msra.mxu1 %v5606_v49  ;;  %v5690_v48 = vld [vmem:[#allocation6 + $0x828] ss:$16 sps:$4 sm:$0xff]   ;;  %v5695_v49 = vld [vmem:[#allocation6 + $0x844] ss:$16 sps:$4 sm:$0xff]  }
 0x307   : > { %2671 = vmatprep.subr.bf16.mxu0 %v5611_v50  ;;  %2777 = vmatprep.subr.bf16.mxu1 %v5614_v51  ;;  %v5698_v50 = vld [vmem:[#allocation6 + $0x84c] ss:$16 sps:$4 sm:$0xff]   ;;  %v5693_v51 = vld [vmem:[#allocation6 + $0x840] ss:$16 sps:$4 sm:$0xff]  }
 0x30a   : > { %2672 = vmatpush1.bf16.msra.mxu0 %v5609_v44  ;;  %2778 = vmatpush1.bf16.msra.mxu1 %v5612_v52  ;;  %v5696_v44 = vld [vmem:[#allocation6 + $0x848] ss:$16 sps:$4 sm:$0xff]   ;;  %v5701_v52 = vld [vmem:[#allocation6 + $0x864] ss:$16 sps:$4 sm:$0xff]  }
 0x30b   : > { %2673 = vmatprep.subr.bf16.mxu0 %v5617_v54  ;;  %2779 = vmatprep.subr.bf16.mxu1 %v5620_v55  ;;  %v5702_v54 = vld [vmem:[#allocation6 + $0x868] ss:$16 sps:$4 sm:$0xff]   ;;  %v5707_v55 = vld [vmem:[#allocation6 + $0x884] ss:$16 sps:$4 sm:$0xff]  }
 0x30e   : > { %2674 = vmatpush1.bf16.msra.mxu0 %v5615_v56  ;;  %2780 = vmatpush1.bf16.msra.mxu1 %v5618_v58  ;;  %v5710_v56 = vld [vmem:[#allocation6 + $0x88c] ss:$16 sps:$4 sm:$0xff]   ;;  %v5705_v58 = vld [vmem:[#allocation6 + $0x880] ss:$16 sps:$4 sm:$0xff]  }
 0x30f   : > { %2675 = vmatprep.subr.bf16.mxu0 %v5623_v59  ;;  %2781 = vmatprep.subr.bf16.mxu1 %v5626_v60  ;;  %v5708_v59 = vld [vmem:[#allocation6 + $0x888] ss:$16 sps:$4 sm:$0xff]   ;;  %v5713_v60 = vld [vmem:[#allocation6 + $0x8a4] ss:$16 sps:$4 sm:$0xff]  }
 0x312   : > { %2676 = vmatpush1.bf16.msra.mxu0 %v5621_v61  ;;  %2782 = vmatpush1.bf16.msra.mxu1 %v5624_v62  ;;  %v5716_v61 = vld [vmem:[#allocation6 + $0x8ac] ss:$16 sps:$4 sm:$0xff]   ;;  %v5711_v62 = vld [vmem:[#allocation6 + $0x8a0] ss:$16 sps:$4 sm:$0xff]  }
 0x313   : > { %2677 = vmatprep.subr.bf16.mxu0 %v5629_v63  ;;  %2783 = vmatprep.subr.bf16.mxu1 %v5632_v0  ;;  %v5719_v63 = vld [vmem:[#allocation6 + $0x8c4] ss:$16 sps:$4 sm:$0xff]   ;;  %v5722_v0 = vld [vmem:[#allocation6 + $0x8cc] ss:$16 sps:$4 sm:$0xff]  }
 0x316   : > { %2678 = vmatpush1.bf16.msra.mxu0 %v5627_v1  ;;  %2784 = vmatpush1.bf16.msra.mxu1 %v5630_v2  ;;  %v5717_v1 = vld [vmem:[#allocation6 + $0x8c0] ss:$16 sps:$4 sm:$0xff]   ;;  %v5720_v2 = vld [vmem:[#allocation6 + $0x8c8] ss:$16 sps:$4 sm:$0xff]  }
 0x317   : > { %2679 = vmatprep.subr.bf16.mxu0 %v5635_v3  ;;  %2785 = vmatprep.subr.bf16.mxu1 %v5638_v4  ;;  %v5725_v3 = vld [vmem:[#allocation6 + $0x8e4] ss:$16 sps:$4 sm:$0xff]   ;;  %v5728_v4 = vld [vmem:[#allocation6 + $0x8ec] ss:$16 sps:$4 sm:$0xff]  }
 0x31a   : > { %2680 = vmatpush1.bf16.msra.mxu0 %v5633_v5  ;;  %2786 = vmatpush1.bf16.msra.mxu1 %v5636_v6  ;;  %v5723_v5 = vld [vmem:[#allocation6 + $0x8e0] ss:$16 sps:$4 sm:$0xff]   ;;  %v5726_v6 = vld [vmem:[#allocation6 + $0x8e8] ss:$16 sps:$4 sm:$0xff]  }
 0x31b   : > { %2681 = vmatprep.subr.bf16.mxu0 %v5641_v7  ;;  %2787 = vmatprep.subr.bf16.mxu1 %v5644_v8  ;;  %v5731_v7 = vld [vmem:[#allocation6 + $0x904] ss:$16 sps:$4 sm:$0xff]   ;;  %v5734_v8 = vld [vmem:[#allocation6 + $0x90c] ss:$16 sps:$4 sm:$0xff]  }
 0x31e   : > { %2682 = vmatpush1.bf16.msra.mxu0 %v5639_v9  ;;  %2788 = vmatpush1.bf16.msra.mxu1 %v5642_v10  ;;  %v5729_v9 = vld [vmem:[#allocation6 + $0x900] ss:$16 sps:$4 sm:$0xff]   ;;  %v5732_v10 = vld [vmem:[#allocation6 + $0x908] ss:$16 sps:$4 sm:$0xff]  }
 0x31f   : > { %2683 = vmatprep.subr.bf16.mxu0 %v5647_v11  ;;  %2789 = vmatprep.subr.bf16.mxu1 %v5650_v12  ;;  %v5737_v11 = vld [vmem:[#allocation6 + $0x924] ss:$16 sps:$4 sm:$0xff]   ;;  %v5740_v12 = vld [vmem:[#allocation6 + $0x92c] ss:$16 sps:$4 sm:$0xff]  }
 0x322   : > { %2684 = vmatpush1.bf16.msra.mxu0 %v5645_v13  ;;  %2790 = vmatpush1.bf16.msra.mxu1 %v5648_v14  ;;  %v5735_v13 = vld [vmem:[#allocation6 + $0x920] ss:$16 sps:$4 sm:$0xff]   ;;  %v5738_v14 = vld [vmem:[#allocation6 + $0x928] ss:$16 sps:$4 sm:$0xff]  }
 0x323   : > { %2685 = vmatprep.subr.bf16.mxu0 %v5653_v15  ;;  %2791 = vmatprep.subr.bf16.mxu1 %v5656_v16  ;;  %v5743_v15 = vld [vmem:[#allocation6 + $0x944] ss:$16 sps:$4 sm:$0xff]   ;;  %v5746_v16 = vld [vmem:[#allocation6 + $0x94c] ss:$16 sps:$4 sm:$0xff]  }
 0x326   : > { %2686 = vmatpush1.bf16.msra.mxu0 %v5651_v18  ;;  %2792 = vmatpush1.bf16.msra.mxu1 %v5654_v19  ;;  %v5741_v18 = vld [vmem:[#allocation6 + $0x940] ss:$16 sps:$4 sm:$0xff]   ;;  %v5744_v19 = vld [vmem:[#allocation6 + $0x948] ss:$16 sps:$4 sm:$0xff]  }
 0x327   : > { %2687 = vmatprep.subr.bf16.mxu0 %v5659_v20  ;;  %2793 = vmatprep.subr.bf16.mxu1 %v5662_v21  ;;  %v5749_v20 = vld [vmem:[#allocation6 + $0x964] ss:$16 sps:$4 sm:$0xff]   ;;  %v5752_v21 = vld [vmem:[#allocation6 + $0x96c] ss:$16 sps:$4 sm:$0xff]  }
 0x32a   : > { %2688 = vmatpush1.bf16.msra.mxu0 %v5657_v22  ;;  %2794 = vmatpush1.bf16.msra.mxu1 %v5660_v23  ;;  %v5747_v22 = vld [vmem:[#allocation6 + $0x960] ss:$16 sps:$4 sm:$0xff]   ;;  %v5750_v23 = vld [vmem:[#allocation6 + $0x968] ss:$16 sps:$4 sm:$0xff]  }
 0x32b   : > { %2689 = vmatprep.subr.bf16.mxu0 %v5665_v25  ;;  %2795 = vmatprep.subr.bf16.mxu1 %v5668_v26  ;;  %v5755_v25 = vld [vmem:[#allocation6 + $0x984] ss:$16 sps:$4 sm:$0xff]   ;;  %v5758_v26 = vld [vmem:[#allocation6 + $0x98c] ss:$16 sps:$4 sm:$0xff]  }
 0x32e   : > { %2690 = vmatpush1.bf16.msra.mxu0 %v5663_v27  ;;  %2796 = vmatpush1.bf16.msra.mxu1 %v5666_v28  ;;  %v5753_v27 = vld [vmem:[#allocation6 + $0x980] ss:$16 sps:$4 sm:$0xff]   ;;  %v5756_v28 = vld [vmem:[#allocation6 + $0x988] ss:$16 sps:$4 sm:$0xff]  }
 0x32f   : > { %2691 = vmatprep.subr.bf16.mxu0 %v5671_v29  ;;  %2797 = vmatprep.subr.bf16.mxu1 %v5674_v30  ;;  %v5761_v29 = vld [vmem:[#allocation6 + $0x9a4] ss:$16 sps:$4 sm:$0xff]   ;;  %v5764_v30 = vld [vmem:[#allocation6 + $0x9ac] ss:$16 sps:$4 sm:$0xff]  }
 0x332   : > { %2692 = vmatpush1.bf16.msra.mxu0 %v5669_v31  ;;  %2798 = vmatpush1.bf16.msra.mxu1 %v5672_v32  ;;  %v5759_v31 = vld [vmem:[#allocation6 + $0x9a0] ss:$16 sps:$4 sm:$0xff]   ;;  %v5762_v32 = vld [vmem:[#allocation6 + $0x9a8] ss:$16 sps:$4 sm:$0xff]  }
 0x333   : > { %2693 = vmatprep.subr.bf16.mxu0 %v5677_v33  ;;  %2799 = vmatprep.subr.bf16.mxu1 %v5680_v34  ;;  %v5767_v33 = vld [vmem:[#allocation6 + $0x9c4] ss:$16 sps:$4 sm:$0xff]   ;;  %v5770_v34 = vld [vmem:[#allocation6 + $0x9cc] ss:$16 sps:$4 sm:$0xff]  }
 0x336   : > { %2694 = vmatpush1.bf16.msra.mxu0 %v5675_v35  ;;  %2800 = vmatpush1.bf16.msra.mxu1 %v5678_v36  ;;  %v5765_v35 = vld [vmem:[#allocation6 + $0x9c0] ss:$16 sps:$4 sm:$0xff]   ;;  %v5768_v36 = vld [vmem:[#allocation6 + $0x9c8] ss:$16 sps:$4 sm:$0xff]  }
 0x337   : > { %3638 = vmatprep.subr.bf16.mxu0 %v5683_v37  ;;  %3744 = vmatprep.subr.bf16.mxu1 %v5686_v40  ;;  %v5773_v37 = vld [vmem:[#allocation6 + $0x9e4] ss:$16 sps:$4 sm:$0xff]   ;;  %v5776_v40 = vld [vmem:[#allocation6 + $0x9ec] ss:$16 sps:$4 sm:$0xff]  }
 0x339   : > { %2696 = vmatmul.mubr.bf16.vlgmr.msra.gmra.mrb[16].mxu0 %v6576_v17  ;;  %2802 = vmatmul.mubr.bf16.vlgmr.msra.gmra.mrb[16].mxu1 %v6576_v17  ;;  %v5704_v17 = vld [vmem:[#allocation6 + $0x86c] ss:$16 sps:$4 sm:$0xff]  }
 0x33a   : > { %2705 = vmatprep.mubr.bf16.mxu0 %v6580_v45  ;;  %2811 = vmatprep.mubr.bf16.mxu1 %v6580_v45  ;;  %v5699_v45 = vld [vmem:[#allocation6 + $0x860] ss:$16 sps:$4 sm:$0xff]  }
 0x33b   : > { %3639 = vmatpush1.bf16.msra.mxu0 %v5681_v24  ;;  %3745 = vmatpush1.bf16.msra.mxu1 %v5684_v42  ;;  %v5771_v24 = vld [vmem:[#allocation6 + $0x9e0] ss:$16 sps:$4 sm:$0xff]   ;;  %v5774_v42 = vld [vmem:[#allocation6 + $0x9e8] ss:$16 sps:$4 sm:$0xff]  }
 0x33c   : > { %3640 = vmatprep.subr.bf16.mxu0 %v5689_v43  ;;  %3746 = vmatprep.subr.bf16.mxu1 %v5692_v46  ;;  %v5779_v43 = vld [vmem:[#allocation6 + $0xa04] ss:$16 sps:$4 sm:$0xff]   ;;  %v5782_v46 = vld [vmem:[#allocation6 + $0xa0c] ss:$16 sps:$4 sm:$0xff]  }
 0x33f   : > { %3641 = vmatpush1.bf16.msra.mxu0 %v5687_v47  ;;  %3747 = vmatpush1.bf16.msra.mxu1 %v5690_v48  ;;  %v1948_v47 = vld [vmem:[#allocation7 + $0x4] sm:$0xf] }
 0x340   : > { %3642 = vmatprep.subr.bf16.mxu0 %v5695_v49  ;;  %3748 = vmatprep.subr.bf16.mxu1 %v5698_v50  ;;  %v1953_v48 = vrot.slane %v1948_v47, %v6548_v39  ;;  %v1961_v49 = vrot.slane %v1948_v47, %v6554_v53  ;;  %v1957_v50 = vrot.slane %v1948_v47, %v6550_v41 }
 0x341   : > { %2706 = vmatmul.mubr.bf16.gmra.mrb[20].mxu0 %v6578_v38  ;;  %2812 = vmatmul.mubr.bf16.gmra.mrb[20].mxu1 %v6578_v38  ;;  %v5714_v38 = vld [vmem:[#allocation6 + $0x8a8] ss:$16 sps:$4 sm:$0xff]  }
 0x343   : > { %3643 = vmatpush1.bf16.msra.mxu0 %v5693_v51  ;;  %3749 = vmatpush1.bf16.msra.mxu1 %v5696_v44  ;;  %v1965_v51 = vrot.slane %v1948_v47, %v6556_v57  ;;  %v5791_v47 = vld [vmem:[#allocation6 + $0xa44] ss:$16 sps:$4 sm:$0xff]  }
 0x344   : > { %3644 = vmatprep.subr.bf16.mxu0 %v5701_v52  ;;  %3750 = vmatprep.subr.bf16.mxu1 %v5704_v17 }
 0x347   : > { %3645 = vmatpush1.bf16.msra.mxu0 %v5699_v45  ;;  %3751 = vmatpush1.bf16.msra.mxu1 %v5702_v54 }
 0x348   : > { %3646 = vmatprep.subr.bf16.mxu0 %v5707_v55  ;;  %3752 = vmatprep.subr.bf16.mxu1 %v5710_v56 }
 0x34b   : > { %3647 = vmatpush1.bf16.msra.mxu0 %v5705_v58  ;;  %3753 = vmatpush1.bf16.msra.mxu1 %v5708_v59 }
 0x34c   : > { %3648 = vmatprep.subr.bf16.mxu0 %v5713_v60  ;;  %3754 = vmatprep.subr.bf16.mxu1 %v5716_v61 }
 0x34f   : > { %3649 = vmatpush1.bf16.msra.mxu0 %v5711_v62  ;;  %3755 = vmatpush1.bf16.msra.mxu1 %v5714_v38 }
 0x350   : > { %3650 = vmatprep.subr.bf16.mxu0 %v5719_v63  ;;  %3756 = vmatprep.subr.bf16.mxu1 %v5722_v0 }
 0x353   : > { %3651 = vmatpush1.bf16.msra.mxu0 %v5717_v1  ;;  %3757 = vmatpush1.bf16.msra.mxu1 %v5720_v2 }
 0x354   : > { %3652 = vmatprep.subr.bf16.mxu0 %v5725_v3  ;;  %3758 = vmatprep.subr.bf16.mxu1 %v5728_v4 }
 0x357   : > { %3653 = vmatpush1.bf16.msra.mxu0 %v5723_v5  ;;  %3759 = vmatpush1.bf16.msra.mxu1 %v5726_v6 }
 0x358   : > { %3654 = vmatprep.subr.bf16.mxu0 %v5731_v7  ;;  %3760 = vmatprep.subr.bf16.mxu1 %v5734_v8 }
 0x35b   : > { %3655 = vmatpush1.bf16.msra.mxu0 %v5729_v9  ;;  %3761 = vmatpush1.bf16.msra.mxu1 %v5732_v10 }
 0x35c   : > { %3656 = vmatprep.subr.bf16.mxu0 %v5737_v11  ;;  %3762 = vmatprep.subr.bf16.mxu1 %v5740_v12 }
 0x35f   : > { %3657 = vmatpush1.bf16.msra.mxu0 %v5735_v13  ;;  %3763 = vmatpush1.bf16.msra.mxu1 %v5738_v14 }
 0x360   : > { %3658 = vmatprep.subr.bf16.mxu0 %v5743_v15  ;;  %3764 = vmatprep.subr.bf16.mxu1 %v5746_v16 }
 0x363   : > { %3659 = vmatpush1.bf16.msra.mxu0 %v5741_v18  ;;  %3765 = vmatpush1.bf16.msra.mxu1 %v5744_v19 }
 0x364   : > { %3660 = vmatprep.subr.bf16.mxu0 %v5749_v20  ;;  %3766 = vmatprep.subr.bf16.mxu1 %v5752_v21 }
 0x367   : > { %3661 = vmatpush1.bf16.msra.mxu0 %v5747_v22  ;;  %3767 = vmatpush1.bf16.msra.mxu1 %v5750_v23 }
 0x368   : > { %3662 = vmatprep.subr.bf16.mxu0 %v5755_v25  ;;  %3768 = vmatprep.subr.bf16.mxu1 %v5758_v26 }
 0x36b   : > { %3663 = vmatpush1.bf16.msra.mxu0 %v5753_v27  ;;  %3769 = vmatpush1.bf16.msra.mxu1 %v5756_v28 }
 0x36c   : > { %3664 = vmatprep.subr.bf16.mxu0 %v5761_v29  ;;  %3770 = vmatprep.subr.bf16.mxu1 %v5764_v30 }
 0x36f   : > { %3665 = vmatpush1.bf16.msra.mxu0 %v5759_v31  ;;  %3771 = vmatpush1.bf16.msra.mxu1 %v5762_v32  ;;  %v5777_v31 = vld [vmem:[#allocation6 + $0xa00] ss:$16 sps:$4 sm:$0xff]   ;;  %v5780_v32 = vld [vmem:[#allocation6 + $0xa08] ss:$16 sps:$4 sm:$0xff]  }
 0x370   : > { %3666 = vmatprep.subr.bf16.mxu0 %v5767_v33  ;;  %3772 = vmatprep.subr.bf16.mxu1 %v5770_v34  ;;  %v5785_v34 = vld [vmem:[#allocation6 + $0xa24] ss:$16 sps:$4 sm:$0xff]  }
 0x373   : > { %3667 = vmatpush1.bf16.msra.mxu0 %v5765_v35  ;;  %3773 = vmatpush1.bf16.msra.mxu1 %v5768_v36  ;;  %v5788_v35 = vld [vmem:[#allocation6 + $0xa2c] ss:$16 sps:$4 sm:$0xff]  }
 0x374   : > { %3668 = vmatprep.subr.bf16.mxu0 %v5773_v37  ;;  %3774 = vmatprep.subr.bf16.mxu1 %v5776_v40 }
 0x377   : > { %3669 = vmatpush1.bf16.msra.mxu0 %v5771_v24  ;;  %3775 = vmatpush1.bf16.msra.mxu1 %v5774_v42  ;;  %v5783_v42 = vld [vmem:[#allocation6 + $0xa20] ss:$16 sps:$4 sm:$0xff]  }
 0x378   : > { %3691 = vmatprep.subr.bf16.mxu0 %v5779_v43  ;;  %3797 = vmatprep.subr.bf16.mxu1 %v5782_v46  ;;  %v5786_v43 = vld [vmem:[#allocation6 + $0xa28] ss:$16 sps:$4 sm:$0xff]  }
 0x40c   : > { %v2697_v44 = vpop.f32.mrb[16].mxu0  ;;  %v2803_v52 = vpop.f32.mrb[16].mxu1 }
 0x40d   : > { %v5073_v17 = vadd.f32 %v2697_v44, %v1953_v48  ;;  %v5081_v45 = vadd.f32 %v2803_v52, %v1961_v49  ;;  %v2699_v54 = vpop.f32.mrb[17].mxu0  ;;  %v2805_v55 = vpop.f32.mrb[17].mxu1 }
 0x40e   : > { %v5074_v56 = vadd.f32 %v2699_v54, %v1957_v50  ;;  %v5082_v58 = vadd.f32 %v2805_v55, %v1965_v51  ;;  %v2701_v59 = vpop.f32.mrb[18].mxu0  ;;  %v2807_v60 = vpop.f32.mrb[18].mxu1  ;;  %v5792_v54 = vld [vmem:[#allocation6 + $0xa48] ss:$16 sps:$4 sm:$0xff]  }
 0x40f   : > { %5945 = vtanh.f32 %v5073_v17  ;;  %v5075_v61 = vadd.f32 %v2701_v59, %v1953_v48  ;;  %v2703_v62 = vpop.f32.mrb[19].mxu0  ;;  %v2809_v38 = vpop.f32.mrb[19].mxu1  ;;  %v5083_v63 = vadd.f32 %v2807_v60, %v1961_v49  ;;  %v5795_v59 = vld [vmem:[#allocation6 + $0xa60] ss:$16 sps:$4 sm:$0xff]   ;;  %v5798_v60 = vld [vmem:[#allocation6 + $0xa68] ss:$16 sps:$4 sm:$0xff]  }
 0x410   : > { %5947 = vtanh.f32 %v5081_v45  ;;  %v5076_v0 = vadd.f32 %v2703_v62, %v1957_v50  ;;  %v5084_v1 = vadd.f32 %v2809_v38, %v1965_v51  ;;  %v5789_v45 = vld [vmem:[#allocation6 + $0xa40] ss:$16 sps:$4 sm:$0xff]   ;;  %v5806_v62 = vld [vmem:[#allocation6 + $0xa8c] ss:$16 sps:$4 sm:$0xff]  }
 0x411   : > { %5949 = vtanh.f32 %v5074_v56  ;;  %v5797_v56 = vld [vmem:[#allocation6 + $0xa64] ss:$16 sps:$4 sm:$0xff]   ;;  %v5801_v38 = vld [vmem:[#allocation6 + $0xa80] ss:$16 sps:$4 sm:$0xff]  }
 0x412   : > { %5951 = vtanh.f32 %v5082_v58  ;;  %v5800_v58 = vld [vmem:[#allocation6 + $0xa6c] ss:$16 sps:$4 sm:$0xff]  }
 0x413   : > { %5953 = vtanh.f32 %v5075_v61  ;;  %v5803_v61 = vld [vmem:[#allocation6 + $0xa84] ss:$16 sps:$4 sm:$0xff]  }
 0x414   : > { %5955 = vtanh.f32 %v5083_v63  ;;  %v2707_v2 = vpop.f32.mrb[20].mxu0  ;;  %v2813_v3 = vpop.f32.mrb[20].mxu1  ;;  %v5804_v63 = vld [vmem:[#allocation6 + $0xa88] ss:$16 sps:$4 sm:$0xff]  }
 0x415   : > { %5957 = vtanh.f32 %v5076_v0  ;;  %v5077_v4 = vadd.f32 %v2707_v2, %v1953_v48  ;;  %v5085_v5 = vadd.f32 %v2813_v3, %v1961_v49  ;;  %v2709_v6 = vpop.f32.mrb[21].mxu0  ;;  %v2815_v7 = vpop.f32.mrb[21].mxu1  ;;  %v5809_v0 = vld [vmem:[#allocation6 + $0xaa4] ss:$16 sps:$4 sm:$0xff]   ;;  %v5807_v2 = vld [vmem:[#allocation6 + $0xaa0] ss:$16 sps:$4 sm:$0xff]  }
 0x416   : > { %5959 = vtanh.f32 %v5084_v1  ;;  %v5078_v8 = vadd.f32 %v2709_v6, %v1957_v50  ;;  %v5086_v9 = vadd.f32 %v2815_v7, %v1965_v51  ;;  %v2711_v10 = vpop.f32.mrb[22].mxu0  ;;  %v2817_v11 = vpop.f32.mrb[22].mxu1  ;;  %v5812_v1 = vld [vmem:[#allocation6 + $0xaac] ss:$16 sps:$4 sm:$0xff]   ;;  %v5810_v3 = vld [vmem:[#allocation6 + $0xaa8] ss:$16 sps:$4 sm:$0xff]  }
 0x417   : > { %5961 = vtanh.f32 %v5077_v4  ;;  %v5079_v12 = vadd.f32 %v2711_v10, %v1953_v48  ;;  %v2713_v13 = vpop.f32.mrb[23].mxu0  ;;  %v2819_v14 = vpop.f32.mrb[23].mxu1  ;;  %v5087_v15 = vadd.f32 %v2817_v11, %v1961_v49  ;;  %v5794_v48 = vld [vmem:[#allocation6 + $0xa4c] ss:$16 sps:$4 sm:$0xff]   ;;  %v5815_v4 = vld [vmem:[#allocation6 + $0xac4] ss:$16 sps:$4 sm:$0xff]  }
 0x418   : > { %5963 = vtanh.f32 %v5085_v5  ;;  %v5080_v18 = vadd.f32 %v2713_v13, %v1957_v50  ;;  %v5088_v20 = vadd.f32 %v2819_v14, %v1965_v51  ;;  %v5818_v5 = vld [vmem:[#allocation6 + $0xacc] ss:$16 sps:$4 sm:$0xff]   ;;  %v5813_v6 = vld [vmem:[#allocation6 + $0xac0] ss:$16 sps:$4 sm:$0xff]   ;;  %v5816_v7 = vld [vmem:[#allocation6 + $0xac8] ss:$16 sps:$4 sm:$0xff]  }
 0x419   : > { %v5946_v16 = vpop.eup %5945  ;;  %5965 = vtanh.f32 %v5078_v8  ;;  %v5821_v8 = vld [vmem:[#allocation6 + $0xae4] ss:$16 sps:$4 sm:$0xff]   ;;  %v5819_v10 = vld [vmem:[#allocation6 + $0xae0] ss:$16 sps:$4 sm:$0xff]   ;;  %v5822_v11 = vld [vmem:[#allocation6 + $0xae8] ss:$16 sps:$4 sm:$0xff]  }
 0x41a   : > { %v5948_v19 = vpop.eup %5947  ;;  %5967 = vtanh.f32 %v5086_v9  ;;  %v5824_v9 = vld [vmem:[#allocation6 + $0xaec] ss:$16 sps:$4 sm:$0xff]   ;;  %v5825_v14 = vld [vmem:[#allocation6 + $0xb00] ss:$16 sps:$4 sm:$0xff]  }
 0x41b   : > { %v5950_v21 = vpop.eup %5949  ;;  %5969 = vtanh.f32 %v5079_v12  ;;  %v5827_v12 = vld [vmem:[#allocation6 + $0xb04] ss:$16 sps:$4 sm:$0xff]   ;;  %v5830_v13 = vld [vmem:[#allocation6 + $0xb0c] ss:$16 sps:$4 sm:$0xff]  }
 0x41c   : > { %v5952_v22 = vpop.eup %5951  ;;  %5971 = vtanh.f32 %v5087_v15  ;;  %v5828_v15 = vld [vmem:[#allocation6 + $0xb08] ss:$16 sps:$4 sm:$0xff]  }
 0x41d   : > { %v5954_v23 = vpop.eup %5953  ;;  %5973 = vtanh.f32 %v5080_v18  ;;  %v5836_v18 = vld [vmem:[#allocation6 + $0xb2c] ss:$16 sps:$4 sm:$0xff]  }
 0x41e   : > { %v5956_v25 = vpop.eup %5955  ;;  %5975 = vtanh.f32 %v5088_v20  ;;  %v2838_v26 = vpack.c.bf16 %v5954_v23, %v5946_v16  ;;  %v5833_v16 = vld [vmem:[#allocation6 + $0xb24] ss:$16 sps:$4 sm:$0xff]   ;;  %v5834_v20 = vld [vmem:[#allocation6 + $0xb28] ss:$16 sps:$4 sm:$0xff]   ;;  %v5837_v23 = vld [vmem:[#allocation6 + $0xb40] ss:$16 sps:$4 sm:$0xff]  }
 0x41f   : > { %v5958_v27 = vpop.eup %5957  ;;  %v6592_v28 = vpack.c.bf16 %v5956_v25, %v5948_v19  ;;  %v5831_v19 = vld [vmem:[#allocation6 + $0xb20] ss:$16 sps:$4 sm:$0xff]   ;;  %v5840_v25 = vld [vmem:[#allocation6 + $0xb48] ss:$16 sps:$4 sm:$0xff]  }
 0x420   : > { %v5960_v29 = vpop.eup %5959  ;;  %v2839_v30 = vpack.c.bf16 %v5958_v27, %v5950_v21  ;;  %v5839_v21 = vld [vmem:[#allocation6 + $0xb44] ss:$16 sps:$4 sm:$0xff]   ;;  %v5848_v27 = vld [vmem:[#allocation6 + $0xb6c] ss:$16 sps:$4 sm:$0xff]  }
 0x421   : > { %v5962_v33 = vpop.eup %5961  ;;  %v2841_v36 = vpack.c.bf16 %v5960_v29, %v5952_v22  ;;  %v5842_v22 = vld [vmem:[#allocation6 + $0xb4c] ss:$16 sps:$4 sm:$0xff]   ;;  %v5843_v29 = vld [vmem:[#allocation6 + $0xb60] ss:$16 sps:$4 sm:$0xff]  }
 0x422   : > { %v5964_v37 = vpop.eup %5963  ;;  %3670 = vmatprep.mubr.bf16.mxu0 %v2839_v30  ;;  %3776 = vmatprep.mubr.bf16.mxu1 %v2839_v30  ;;  %v5846_v30 = vld [vmem:[#allocation6 + $0xb68] ss:$16 sps:$4 sm:$0xff]  }
 0x423   : > { %v5966_v40 = vpop.eup %5965  ;;  %3671 = vmatmul.mubr.bf16.vlgmr.msra.gmra.mrb[24].mxu0 %v2838_v26  ;;  %3777 = vmatmul.mubr.bf16.vlgmr.msra.gmra.mrb[24].mxu1 %v2838_v26  ;;  %v5845_v26 = vld [vmem:[#allocation6 + $0xb64] ss:$16 sps:$4 sm:$0xff]  }
 0x424   : > { %v5968_v24 = vpop.eup %5967  ;;  %3692 = vmatpush1.bf16.msra.mxu0 %v5777_v31  ;;  %3798 = vmatpush1.bf16.msra.mxu1 %v5780_v32  ;;  %v5851_v31 = vld [vmem:[#allocation6 + $0xb84] ss:$16 sps:$4 sm:$0xff]   ;;  %v5854_v32 = vld [vmem:[#allocation6 + $0xb8c] ss:$16 sps:$4 sm:$0xff]  }
 0x425   : > { %v5970_v46 = vpop.eup %5969  ;;  %3693 = vmatprep.subr.bf16.mxu0 %v5785_v34  ;;  %3799 = vmatprep.subr.bf16.mxu1 %v5788_v35  ;;  %v5852_v34 = vld [vmem:[#allocation6 + $0xb88] ss:$16 sps:$4 sm:$0xff]   ;;  %v5857_v35 = vld [vmem:[#allocation6 + $0xba4] ss:$16 sps:$4 sm:$0xff]  }
 0x426   : > { %v5972_v49 = vpop.eup %5971  ;;  %v2842_v50 = vpack.c.bf16 %v5970_v46, %v5962_v33  ;;  %v5849_v33 = vld [vmem:[#allocation6 + $0xb80] ss:$16 sps:$4 sm:$0xff]   ;;  %v5864_v46 = vld [vmem:[#allocation6 + $0xbc8] ss:$16 sps:$4 sm:$0xff]  }
 0x427   : > { %v5974_v51 = vpop.eup %5973  ;;  %v6594_v44 = vpack.c.bf16 %v5972_v49, %v5964_v37  ;;  %v5855_v37 = vld [vmem:[#allocation6 + $0xba0] ss:$16 sps:$4 sm:$0xff]  }
 0x428   : > { %v5976_v52 = vpop.eup %5975  ;;  %3694 = vmatpush1.bf16.msra.mxu0 %v5783_v42  ;;  %3800 = vmatpush1.bf16.msra.mxu1 %v5786_v43  ;;  %v2843_v17 = vpack.c.bf16 %v5974_v51, %v5966_v40  ;;  %v5858_v40 = vld [vmem:[#allocation6 + $0xba8] ss:$16 sps:$4 sm:$0xff]   ;;  %v5866_v42 = vld [vmem:[#allocation6 + $0xbcc] ss:$16 sps:$4 sm:$0xff]   ;;  %v5861_v43 = vld [vmem:[#allocation6 + $0xbc0] ss:$16 sps:$4 sm:$0xff]  }
 0x429   : > { %3695 = vmatprep.subr.bf16.mxu0 %v5791_v47  ;;  %3801 = vmatprep.subr.bf16.mxu1 %v5794_v48  ;;  %v6596_v55 = vpack.c.bf16 %v5976_v52, %v5968_v24  ;;  %v5863_v24 = vld [vmem:[#allocation6 + $0xbc4] ss:$16 sps:$4 sm:$0xff]   ;;  %v5872_v48 = vld [vmem:[#allocation6 + $0xbec] ss:$16 sps:$4 sm:$0xff]   ;;  %v5867_v49 = vld [vmem:[#allocation6 + $0xbe0] ss:$16 sps:$4 sm:$0xff]  }
 0x42a   : > { %3680 = vmatprep.mubr.bf16.mxu0 %v2843_v17  ;;  %3786 = vmatprep.mubr.bf16.mxu1 %v2843_v17  ;;  %v5869_v47 = vld [vmem:[#allocation6 + $0xbe4] ss:$16 sps:$4 sm:$0xff]   ;;  %v5873_v51 = vld [vmem:[#allocation9 + $0x40] sm:$0xff]  }
 0x42b   : > { %3681 = vmatmul.mubr.bf16.gmra.mrb[28].mxu0 %v2842_v50  ;;  %3787 = vmatmul.mubr.bf16.gmra.mrb[28].mxu1 %v2842_v50  ;;  %v5870_v50 = vld [vmem:[#allocation6 + $0xbe8] ss:$16 sps:$4 sm:$0xff]   ;;  %v5874_v52 = vld [vmem:[#allocation9 + $0xc0] sm:$0xff]  }
 0x42c   : > { %3696 = vmatpush1.bf16.msra.mxu0 %v5789_v45  ;;  %3802 = vmatpush1.bf16.msra.mxu1 %v5792_v54  ;;  %v5875_v17 = vld [vmem:[#allocation9] sm:$0xff]   ;;  %v5877_v54 = vld [vmem:[#allocation9 + $0x48] sm:$0xff]  }
 0x42d   : > { %3723 = vmatprep.mubr.bf16.mxu0 %v2841_v36  ;;  %3829 = vmatprep.mubr.bf16.mxu1 %v2841_v36  ;;  %v5860_v36 = vld [vmem:[#allocation6 + $0xbac] ss:$16 sps:$4 sm:$0xff]  }
 0x42e   : > { %3697 = vmatprep.subr.bf16.mxu0 %v5797_v56  ;;  %3803 = vmatprep.subr.bf16.mxu1 %v5800_v58  ;;  %v5876_v45 = vld [vmem:[#allocation9 + $0x80] sm:$0xff]   ;;  %v5878_v56 = vld [vmem:[#allocation9 + $0xc8] sm:$0xff]  }
 0x42f   : > { %v5879_v58 = vld [vmem:[#allocation9 + $0x8] sm:$0xff]  }
 0x430   : > { %3698 = vmatpush1.bf16.msra.mxu0 %v5795_v59  ;;  %3804 = vmatpush1.bf16.msra.mxu1 %v5798_v60  ;;  %v5880_v59 = vld [vmem:[#allocation9 + $0x88] sm:$0xff]   ;;  %v5881_v60 = vld [vmem:[#allocation9 + $0x50] sm:$0xff]  }
 0x431   : > { %3699 = vmatprep.subr.bf16.mxu0 %v5803_v61  ;;  %3805 = vmatprep.subr.bf16.mxu1 %v5806_v62  ;;  %v5882_v61 = vld [vmem:[#allocation9 + $0xd0] sm:$0xff]  }
 0x432   : > { %v5883_v62 = vld [vmem:[#allocation9 + $0x10] sm:$0xff]  }
 0x434   : > { %3700 = vmatpush1.bf16.msra.mxu0 %v5801_v38  ;;  %3806 = vmatpush1.bf16.msra.mxu1 %v5804_v63  ;;  %v5884_v38 = vld [vmem:[#allocation9 + $0x90] sm:$0xff]   ;;  %v5885_v63 = vld [vmem:[#allocation9 + $0x58] sm:$0xff]  }
 0x435   : > { %3701 = vmatprep.subr.bf16.mxu0 %v5809_v0  ;;  %3807 = vmatprep.subr.bf16.mxu1 %v5812_v1  ;;  %v5888_v0 = vld [vmem:[#allocation9 + $0x98] sm:$0xff]   ;;  %v5889_v1 = vld [vmem:[#allocation9 + $0x60] sm:$0xff]  }
 0x438   : > { %3702 = vmatpush1.bf16.msra.mxu0 %v5807_v2  ;;  %3808 = vmatpush1.bf16.msra.mxu1 %v5810_v3  ;;  %v5890_v2 = vld [vmem:[#allocation9 + $0xe0] sm:$0xff]  }
 0x439   : > { %3703 = vmatprep.subr.bf16.mxu0 %v5815_v4  ;;  %3809 = vmatprep.subr.bf16.mxu1 %v5818_v5  ;;  %v5891_v3 = vld [vmem:[#allocation9 + $0x20] sm:$0xff]   ;;  %v5893_v5 = vld [vmem:[#allocation9 + $0x68] sm:$0xff]  }
 0x43a   : > { %v5892_v4 = vld [vmem:[#allocation9 + $0xa0] sm:$0xff]  }
 0x43c   : > { %3704 = vmatpush1.bf16.msra.mxu0 %v5813_v6  ;;  %3810 = vmatpush1.bf16.msra.mxu1 %v5816_v7  ;;  %v5894_v6 = vld [vmem:[#allocation9 + $0xe8] sm:$0xff]  }
 0x43d   : > { %3705 = vmatprep.subr.bf16.mxu0 %v5821_v8  ;;  %3811 = vmatprep.subr.bf16.mxu1 %v5824_v9  ;;  %v5895_v7 = vld [vmem:[#allocation9 + $0x28] sm:$0xff]   ;;  %v5897_v8 = vld [vmem:[#allocation9 + $0x70] sm:$0xff]  }
 0x43e   : > { %v5898_v9 = vld [vmem:[#allocation9 + $0xf0] sm:$0xff]  }
 0x440   : > { %3706 = vmatpush1.bf16.msra.mxu0 %v5819_v10  ;;  %3812 = vmatpush1.bf16.msra.mxu1 %v5822_v11  ;;  %v5899_v10 = vld [vmem:[#allocation9 + $0x30] sm:$0xff]  }
 0x441   : > { %3707 = vmatprep.subr.bf16.mxu0 %v5827_v12  ;;  %3813 = vmatprep.subr.bf16.mxu1 %v5830_v13  ;;  %v5900_v11 = vld [vmem:[#allocation9 + $0xb0] sm:$0xff]   ;;  %v5901_v12 = vld [vmem:[#allocation9 + $0x78] sm:$0xff]  }
 0x442   : > { %v5902_v13 = vld [vmem:[#allocation9 + $0xf8] sm:$0xff]  }
 0x444   : > { %3708 = vmatpush1.bf16.msra.mxu0 %v5825_v14  ;;  %3814 = vmatpush1.bf16.msra.mxu1 %v5828_v15  ;;  %v5903_v14 = vld [vmem:[#allocation9 + $0x38] sm:$0xff]  }
 0x445   : > { %3709 = vmatprep.subr.bf16.mxu0 %v5833_v16  ;;  %3815 = vmatprep.subr.bf16.mxu1 %v5836_v18  ;;  %v5904_v15 = vld [vmem:[#allocation9 + $0xb8] sm:$0xff]   ;;  %v5905_v16 = vld [vmem:[#allocation12] sm:$0xff]  }
 0x446   : > { %v2976_v18 = vld [vmem:[#allocation7 + $0x8] sm:$0xf] }
 0x448   : > { %3710 = vmatpush1.bf16.msra.mxu0 %v5831_v19  ;;  %3816 = vmatpush1.bf16.msra.mxu1 %v5834_v20  ;;  %v2981_v19 = vrot.slane %v2976_v18, %v6548_v39  ;;  %v2989_v20 = vrot.slane %v2976_v18, %v6554_v53 }
 0x449   : > { %3711 = vmatprep.subr.bf16.mxu0 %v5839_v21  ;;  %3817 = vmatprep.subr.bf16.mxu1 %v5842_v22 }
 0x44c   : > { %3712 = vmatpush1.bf16.msra.mxu0 %v5837_v23  ;;  %3818 = vmatpush1.bf16.msra.mxu1 %v5840_v25  ;;  %v2985_v23 = vrot.slane %v2976_v18, %v6550_v41  ;;  %v2993_v25 = vrot.slane %v2976_v18, %v6556_v57 }
 0x44d   : > { %3713 = vmatprep.subr.bf16.mxu0 %v5845_v26  ;;  %3819 = vmatprep.subr.bf16.mxu1 %v5848_v27 }
 0x450   : > { %3714 = vmatpush1.bf16.msra.mxu0 %v5843_v29  ;;  %3820 = vmatpush1.bf16.msra.mxu1 %v5846_v30 }
 0x451   : > { %3715 = vmatprep.subr.bf16.mxu0 %v5851_v31  ;;  %3821 = vmatprep.subr.bf16.mxu1 %v5854_v32 }
 0x454   : > { %3716 = vmatpush1.bf16.msra.mxu0 %v5849_v33  ;;  %3822 = vmatpush1.bf16.msra.mxu1 %v5852_v34 }
 0x455   : > { %3717 = vmatprep.subr.bf16.mxu0 %v5857_v35  ;;  %3823 = vmatprep.subr.bf16.mxu1 %v5860_v36 }
 0x458   : > { %3718 = vmatpush1.bf16.msra.mxu0 %v5855_v37  ;;  %3824 = vmatpush1.bf16.msra.mxu1 %v5858_v40 }
 0x459   : > { %3719 = vmatprep.subr.bf16.mxu0 %v5863_v24  ;;  %3825 = vmatprep.subr.bf16.mxu1 %v5866_v42 }
 0x45c   : > { %3720 = vmatpush1.bf16.msra.mxu0 %v5861_v43  ;;  %3826 = vmatpush1.bf16.msra.mxu1 %v5864_v46 }
 0x45d   : > { %3721 = vmatprep.subr.bf16.mxu0 %v5869_v47  ;;  %3827 = vmatprep.subr.bf16.mxu1 %v5872_v48 }
 0x460   : > { %3722 = vmatpush1.bf16.msra.mxu0 %v5867_v49  ;;  %3828 = vmatpush1.bf16.msra.mxu1 %v5870_v50 }
 0x461   : > { %4971 = vmatprep.subr.bf16.mxu0 %v5873_v51  ;;  %4999 = vmatprep.subr.bf16.mxu1 %v5874_v52 }
 0x463   : > { %3724 = vmatmul.mubr.bf16.vlgmr.msra.gmra.mrb[24].mxu0 %v6592_v28  ;;  %3830 = vmatmul.mubr.bf16.vlgmr.msra.gmra.mrb[24].mxu1 %v6592_v28  ;;  %v5886_v28 = vld [vmem:[#allocation9 + $0xd8] sm:$0xff]  }
 0x464   : > { %3733 = vmatprep.mubr.bf16.mxu0 %v6596_v55  ;;  %3839 = vmatprep.mubr.bf16.mxu1 %v6596_v55  ;;  %v5887_v55 = vld [vmem:[#allocation9 + $0x18] sm:$0xff]  }
 0x465   : > { %4972 = vmatpush3.bf16.msra.mxu0 %v5875_v17  ;;  %5000 = vmatpush3.bf16.msra.mxu1 %v5876_v45 }
 0x466   : > { %4973 = vmatprep.subr.bf16.mxu0 %v5877_v54  ;;  %5001 = vmatprep.subr.bf16.mxu1 %v5878_v56 }
 0x469   : > { %4974 = vmatpush3.bf16.msra.mxu0 %v5879_v58  ;;  %5002 = vmatpush3.bf16.msra.mxu1 %v5880_v59 }
 0x46a   : > { %4975 = vmatprep.subr.bf16.mxu0 %v5881_v60  ;;  %5003 = vmatprep.subr.bf16.mxu1 %v5882_v61 }
 0x46b   : > { %3734 = vmatmul.mubr.bf16.gmra.mrb[28].mxu0 %v6594_v44  ;;  %3840 = vmatmul.mubr.bf16.gmra.mrb[28].mxu1 %v6594_v44  ;;  %v5896_v44 = vld [vmem:[#allocation9 + $0xa8] sm:$0xff]  }
 0x46d   : > { %4976 = vmatpush3.bf16.msra.mxu0 %v5883_v62  ;;  %5004 = vmatpush3.bf16.msra.mxu1 %v5884_v38 }
 0x46e   : > { %4977 = vmatprep.subr.bf16.mxu0 %v5885_v63  ;;  %5005 = vmatprep.subr.bf16.mxu1 %v5886_v28 }
 0x471   : > { %4978 = vmatpush3.bf16.msra.mxu0 %v5887_v55  ;;  %5006 = vmatpush3.bf16.msra.mxu1 %v5888_v0  ;;  %v5906_v55 = vld [vmem:[#allocation12 + $0x8] sm:$0xff]   ;;  %v5907_v0 = vld [vmem:[#allocation12 + $0x10] sm:$0xff]  }
 0x472   : > { %4979 = vmatprep.subr.bf16.mxu0 %v5889_v1  ;;  %5007 = vmatprep.subr.bf16.mxu1 %v5890_v2  ;;  %v5908_v1 = vld [vmem:[#allocation12 + $0x18] sm:$0xff]   ;;  %v5909_v2 = vld [vmem:[#allocation12 + $0x20] sm:$0xff]  }
 0x475   : > { %4980 = vmatpush3.bf16.msra.mxu0 %v5891_v3  ;;  %5008 = vmatpush3.bf16.msra.mxu1 %v5892_v4  ;;  %v5910_v3 = vld [vmem:[#allocation12 + $0x28] sm:$0xff]   ;;  %v5911_v4 = vld [vmem:[#allocation12 + $0x30] sm:$0xff]  }
 0x476   : > { %4981 = vmatprep.subr.bf16.mxu0 %v5893_v5  ;;  %5009 = vmatprep.subr.bf16.mxu1 %v5894_v6  ;;  %v5912_v5 = vld [vmem:[#allocation12 + $0x38] sm:$0xff]  }
 0x479   : > { %4982 = vmatpush3.bf16.msra.mxu0 %v5895_v7  ;;  %5010 = vmatpush3.bf16.msra.mxu1 %v5896_v44  ;;  %v4927_v44 = vld [vmem:[#allocation10] ss:$0 sm:$0xff] }
 0x47a   : > { %4983 = vmatprep.subr.bf16.mxu0 %v5897_v8  ;;  %5011 = vmatprep.subr.bf16.mxu1 %v5898_v9 }
 0x47d   : > { %4984 = vmatpush3.bf16.msra.mxu0 %v5899_v10  ;;  %5012 = vmatpush3.bf16.msra.mxu1 %v5900_v11 }
 0x47e   : > { %4985 = vmatprep.subr.bf16.mxu0 %v5901_v12  ;;  %5013 = vmatprep.subr.bf16.mxu1 %v5902_v13 }
 0x481   : > { %4986 = vmatpush3.bf16.msra.mxu0 %v5903_v14  ;;  %5014 = vmatpush3.bf16.msra.mxu1 %v5904_v15 }
 0x482   : > { %5037 = vmatprep.subr.bf16.mxu0 %v5905_v16 }
 0x536   : > { %v3725_v21 = vpop.f32.mrb[24].mxu0  ;;  %v3831_v22 = vpop.f32.mrb[24].mxu1 }
 0x537   : > { %v3727_v26 = vpop.f32.mrb[25].mxu0  ;;  %v3833_v27 = vpop.f32.mrb[25].mxu1  ;;  %v5089_v31 = vadd.f32 %v3725_v21, %v2981_v19  ;;  %v5097_v32 = vadd.f32 %v3831_v22, %v2989_v20 }
 0x538   : > { %v3729_v29 = vpop.f32.mrb[26].mxu0  ;;  %v3835_v30 = vpop.f32.mrb[26].mxu1  ;;  %v5090_v37 = vadd.f32 %v3727_v26, %v2985_v23  ;;  %v5098_v39 = vadd.f32 %v3833_v27, %v2993_v25 }
 0x539   : > { %v5091_v33 = vadd.f32 %v3729_v29, %v2981_v19  ;;  %v5099_v34 = vadd.f32 %v3835_v30, %v2989_v20  ;;  %v3731_v35 = vpop.f32.mrb[27].mxu0  ;;  %v3837_v36 = vpop.f32.mrb[27].mxu1 }
 0x53a   : > { %v5092_v40 = vadd.f32 %v3731_v35, %v2985_v23  ;;  %v5100_v53 = vadd.f32 %v3837_v36, %v2993_v25 }
 0x53b   : > { %v3850_v24 = vpack.c.bf16 %v5091_v33, %v5089_v31  ;;  %v3852_v42 = vpack.c.bf16 %v5099_v34, %v5097_v32 }
 0x53c   : > { %v3851_v43 = vpack.c.bf16 %v5092_v40, %v5090_v37  ;;  %v3853_v41 = vpack.c.bf16 %v5100_v53, %v5098_v39 }
 0x53e   : > { %v3735_v46 = vpop.f32.mrb[28].mxu0  ;;  %v3841_v57 = vpop.f32.mrb[28].mxu1  ;;  %4153 = vmatprep.mubr.bf16.mxu0 %v3851_v43  ;;  %4202 = vmatprep.mubr.bf16.mxu1 %v3853_v41 }
 0x53f   : > { %v3737_v47 = vpop.f32.mrb[29].mxu0  ;;  %v3843_v48 = vpop.f32.mrb[29].mxu1  ;;  %4154 = vmatmul.mubr.bf16.vlgmr.msra.gmra.mrb[32].mxu0 %v3850_v24  ;;  %4203 = vmatmul.mubr.bf16.vlgmr.msra.gmra.mrb[32].mxu1 %v3852_v42  ;;  %v5093_v51 = vadd.f32 %v3735_v46, %v2981_v19  ;;  %v5101_v52 = vadd.f32 %v3841_v57, %v2989_v20 }
 0x540   : > { %v3739_v49 = vpop.f32.mrb[30].mxu0  ;;  %v3845_v50 = vpop.f32.mrb[30].mxu1  ;;  %5038 = vmatpush3.bf16.msra.mxu0 %v5905_v16  ;;  %v5094_v58 = vadd.f32 %v3737_v47, %v2985_v23  ;;  %v5102_v59 = vadd.f32 %v3843_v48, %v2993_v25  ;;  %v4960_v47 = vld [vmem:[#allocation13] ss:$0 sm:$0xff] }
 0x541   : > { %v5095_v17 = vadd.f32 %v3739_v49, %v2981_v19  ;;  %v5103_v45 = vadd.f32 %v3845_v50, %v2989_v20  ;;  %v3741_v54 = vpop.f32.mrb[31].mxu0  ;;  %v3847_v56 = vpop.f32.mrb[31].mxu1  ;;  %5039 = vmatprep.subr.bf16.mxu0 %v5906_v55 }
 0x542   : > { %v5096_v60 = vadd.f32 %v3741_v54, %v2985_v23  ;;  %v5104_v61 = vadd.f32 %v3847_v56, %v2993_v25 }
 0x543   : > { %v3854_v62 = vpack.c.bf16 %v5095_v17, %v5093_v51  ;;  %v3856_v38 = vpack.c.bf16 %v5103_v45, %v5101_v52 }
 0x544   : > { %v3855_v63 = vpack.c.bf16 %v5096_v60, %v5094_v58  ;;  %v3857_v28 = vpack.c.bf16 %v5104_v61, %v5102_v59  ;;  %5040 = vmatpush3.bf16.msra.mxu0 %v5906_v55 }
 0x545   : > { %5041 = vmatprep.subr.bf16.mxu0 %v5907_v0 }
 0x546   : > { %4161 = vmatprep.mubr.bf16.mxu0 %v3855_v63  ;;  %4210 = vmatprep.mubr.bf16.mxu1 %v3857_v28 }
 0x547   : > { %4162 = vmatmul.mubr.bf16.gmra.mrb[36].mxu0 %v3854_v62  ;;  %4211 = vmatmul.mubr.bf16.gmra.mrb[36].mxu1 %v3856_v38 }
 0x548   : > { %5042 = vmatpush3.bf16.msra.mxu0 %v5907_v0 }
 0x549   : > { %5043 = vmatprep.subr.bf16.mxu0 %v5908_v1 }
 0x54c   : > { %5044 = vmatpush3.bf16.msra.mxu0 %v5908_v1 }
 0x54d   : > { %5045 = vmatprep.subr.bf16.mxu0 %v5909_v2 }
 0x550   : > { %5046 = vmatpush3.bf16.msra.mxu0 %v5909_v2 }
 0x551   : > { %5047 = vmatprep.subr.bf16.mxu0 %v5910_v3 }
 0x554   : > { %5048 = vmatpush3.bf16.msra.mxu0 %v5910_v3 }
 0x555   : > { %5049 = vmatprep.subr.bf16.mxu0 %v5911_v4 }
 0x558   : > { %5050 = vmatpush3.bf16.msra.mxu0 %v5911_v4 }
 0x559   : > { %5051 = vmatprep.subr.bf16.mxu0 %v5912_v5 }
 0x55c   : > { %5052 = vmatpush3.bf16.msra.mxu0 %v5912_v5 }
 0x612   : > { %v4987_v6 = vpop.f32.mrb[32].mxu0  ;;  %v5015_v7 = vpop.f32.mrb[32].mxu1 }
 0x613   : > { %v4988_v8 = vpop.f32.mrb[33].mxu0  ;;  %v5016_v9 = vpop.f32.mrb[33].mxu1 }
 0x614   : > { %v4989_v10 = vadd.f32 %v4988_v8, %v4987_v6  ;;  %v5017_v11 = vadd.f32 %v5016_v9, %v5015_v7  ;;  %v4990_v12 = vpop.f32.mrb[34].mxu0  ;;  %v5018_v13 = vpop.f32.mrb[34].mxu1 }
 0x615   : > { %v4991_v14 = vpop.f32.mrb[35].mxu0  ;;  %v5019_v15 = vpop.f32.mrb[35].mxu1 }
 0x616   : > { %v4156_v16 = vadd.f32 %v4989_v10, %v4927_v44  ;;  %v4992_v18 = vadd.f32 %v4991_v14, %v4990_v12  ;;  %v5020_v19 = vadd.f32 %v5019_v15, %v5018_v13 }
 0x618   : > { %v4205_v20 = vadd.f32 %v5017_v11, %v4156_v16  ;;  %v4159_v21 = vadd.f32 %v4992_v18, %v4927_v44 }
 0x61a   : > { %v4208_v22 = vadd.f32 %v5020_v19, %v4159_v21  ;;  %v4993_v23 = vpop.f32.mrb[36].mxu0  ;;  %v5021_v25 = vpop.f32.mrb[36].mxu1  ;;  %5977 = vtanh.f32 %v4205_v20 }
 0x61b   : > { %v4994_v26 = vpop.f32.mrb[37].mxu0  ;;  %v5022_v27 = vpop.f32.mrb[37].mxu1 }
 0x61c   : > { %5979 = vtanh.f32 %v4208_v22  ;;  %v4995_v29 = vadd.f32 %v4994_v26, %v4993_v23  ;;  %v5023_v30 = vadd.f32 %v5022_v27, %v5021_v25  ;;  %v4996_v31 = vpop.f32.mrb[38].mxu0  ;;  %v5024_v32 = vpop.f32.mrb[38].mxu1 }
 0x61d   : > { %v4997_v33 = vpop.f32.mrb[39].mxu0  ;;  %v5025_v34 = vpop.f32.mrb[39].mxu1 }
 0x61e   : > { %v4164_v35 = vadd.f32 %v4995_v29, %v4927_v44  ;;  %v4998_v36 = vadd.f32 %v4997_v33, %v4996_v31  ;;  %v5026_v37 = vadd.f32 %v5025_v34, %v5024_v32 }
 0x620   : > { %v4213_v39 = vadd.f32 %v5023_v30, %v4164_v35  ;;  %v4167_v40 = vadd.f32 %v4998_v36, %v4927_v44 }
 0x622   : > { %v4216_v53 = vadd.f32 %v5026_v37, %v4167_v40  ;;  %5981 = vtanh.f32 %v4213_v39 }
 0x624   : > { %5983 = vtanh.f32 %v4216_v53  ;;  %v5978_v24 = vpop.eup %5977 }
 0x626   : > { %v5980_v42 = vpop.eup %5979 }
 0x627   : > { %v4223_v43 = vpack.c.bf16 %v5980_v42, %v5978_v24 }
 0x629   : > { %5053 = vmatprep.mubr.bf16.mxu0 %v4223_v43 }
 0x62c   : > { %v5982_v41 = vpop.eup %5981 }
 0x62e   : > { %v5984_v46 = vpop.eup %5983 }
 0x62f   : > { %v4224_v57 = vpack.c.bf16 %v5984_v46, %v5982_v41 }
 0x631   : > { %5054 = vmatmul.mubr.bf16.vlgmr.msra.gmra.mrb[40].mxu0 %v4224_v57 }
 0x704   : > { %v5055_v48 = vpop.f32.mrb[40].mxu0 }
 0x705   : > { %v4330_v49 = vpop.f32.mrb[41].mxu0  ;;  %v4339_v45 = vadd.f32 %v5055_v48, %v4960_v47 }
 0x706   : > { %v4331_v50 = vadd.f32 %v4960_v47, %v4330_v49  ;;  %v5056_v51 = vpop.f32.mrb[42].mxu0 }
 0x707   : > { %v4333_v52 = vpop.f32.mrb[43].mxu0  ;;  %v4342_v54 = vadd.f32 %v5056_v51, %v4960_v47  ;;  %4347 = vst [vmem:[%s445_s21 + $0x10] sm:$0xff] %v4339_v45 }
 0x708   : > { %4345 = vst [vmem:[%s445_s21] sm:$0xff] %v4331_v50  ;;  %v4334_v17 = vadd.f32 %v4960_v47, %v4333_v52 }
 0x709   : > { %4348 = vst [vmem:[%s445_s21 + $0x18] sm:$0xff] %v4342_v54 }
 0x70a   : > { %4346 = vst [vmem:[%s445_s21 + $0x8] sm:$0xff] %v4334_v17 }
 0x70b PF: > { %s24_s30 = sadd.s32 1, %s6235_s30  }
 0x70c   : > { %p21_p7 = scmp.ge.s32.totalorder %s24_s30, 4  }
 0x70e   :  { %23 = sbr.rel (!%p21_p7) target bundleno = 5 (0x5), region = 123 }
 0x715   :  { %4371 = vsyncpa [#allocation3], 1 }
 0x716   :  { %4373 = vsyncpa [#allocation3 + $0x1], 1 }
 0x717   :  { %4374 = vsyncpa [#allocation5], 1 }
 0x718   :  { %4375 = vsyncpa [#allocation8], 1 }
 0x719   :  { %4376 = vsyncpa [#allocation11], 1 }
 0x71a   :  { %4377 = vsyncpa [#allocation14], 1 }

</bundles_post_ra>
